<compile_context>
chip_gen: v7x
topology: tpu7x:2x2x1
jax: 0.10.0
libtpu: 0.0.40
codegen_flags: <defaults>
</compile_context>

<pallas_src>
import functools

import jax
import jax.numpy as jnp
from jax.experimental import pallas as pl
from jax.experimental.pallas import tpu as pltpu

DP = 128          # padded lane width for every feature dimension
LN_EPS = 1e-5


# ----------------------------- fused kernel --------------------------------

def _rmdetr_fused_kernel(
        cols_ref,                                            # (1, L, DP)
        bb_w, bb_b,                                          # backbone conv
        enc_wqkv, enc_bqkv, enc_wo, enc_bo,
        enc_ln1_g, enc_ln1_b,
        enc_w1, enc_b1, enc_w2, enc_b2,
        enc_ln2_g, enc_ln2_b,
        q_embed,
        dec_wq, dec_bq, dec_wkv, dec_bkv, dec_wo, dec_bo,
        dec_ln_g, dec_ln_b,
        head_w, head_b,
        out_ref,                                             # (1, NQ, DP)
        *, d_true, n_cls, n_box):
    f32 = jnp.float32
    bf16 = jnp.bfloat16

    lane = jax.lax.broadcasted_iota(jnp.int32, (1, DP), 1)
    d_mask = (lane < d_true).astype(f32)
    inv_d = 1.0 / float(d_true)
    scale = 1.0 / float(d_true) ** 0.5

    def mm(a, w_ref):
        # bf16 on the MXU, f32 accumulation; elementwise math stays f32.
        return jnp.dot(a.astype(bf16), w_ref[...], preferred_element_type=f32)

    def qkt(a, b):
        # (M, D) x (N, D) -> (M, N): contract the last dim of both operands.
        return jax.lax.dot_general(
            a.astype(bf16), b.astype(bf16),
            (((1,), (1,)), ((), ())), preferred_element_type=f32)

    def layernorm(h, g_ref, b_ref):
        # Statistics over the TRUE (unpadded) feature width only; padded
        # lanes of h are zero by construction, masked out of the variance.
        mean = jnp.sum(h, axis=-1, keepdims=True) * inv_d
        c = (h - mean) * d_mask
        var = jnp.sum(c * c, axis=-1, keepdims=True) * inv_d
        inv = jax.lax.rsqrt(var + LN_EPS)
        return c * inv * g_ref[...] + b_ref[...]

    def softmax_rows(s):
        m = jnp.max(s, axis=-1, keepdims=True)
        p = jnp.exp(s - m)
        l = jnp.sum(p, axis=-1, keepdims=True)
        return p * pl.reciprocal(l, approx=True)

    # ---- backbone: 3x3 conv (as im2col matmul) + ReLU ----
    cols = cols_ref[0]                                           # (L, DP)
    memory = jnp.maximum(mm(cols, bb_w) + bb_b[...], 0.0)        # (L, DP)

    # ---- encoder layer: single-head self-attention + FFN (post-LN) ----
    qkv = mm(memory, enc_wqkv) + enc_bqkv[...]                   # (L, 3*DP)
    q, k, v = qkv[:, :DP], qkv[:, DP:2 * DP], qkv[:, 2 * DP:]
    p = softmax_rows(qkt(q, k) * scale)                          # (L, L)
    attn = jnp.dot(p.astype(bf16), v.astype(bf16),
                   preferred_element_type=f32)                   # (L, DP)
    attn = mm(attn, enc_wo) + enc_bo[...]
    h = layernorm(attn + memory, enc_ln1_g, enc_ln1_b)
    ff = jnp.maximum(mm(h, enc_w1) + enc_b1[...], 0.0)
    ff = mm(ff, enc_w2) + enc_b2[...]
    memory = layernorm(ff + h, enc_ln2_g, enc_ln2_b)

    # ---- decoder: learned queries cross-attend to encoder memory ----
    queries = q_embed[...]                                       # (NQ, DP)
    dq = mm(queries, dec_wq) + dec_bq[...]
    kv = mm(memory, dec_wkv) + dec_bkv[...]                      # (L, 2*DP)
    dk, dv = kv[:, :DP], kv[:, DP:]
    p2 = softmax_rows(qkt(dq, dk) * scale)                       # (NQ, L)
    dattn = jnp.dot(p2.astype(bf16), dv.astype(bf16),
                    preferred_element_type=f32)                  # (NQ, DP)
    dattn = mm(dattn, dec_wo) + dec_bo[...]
    hq = layernorm(dattn + queries, dec_ln_g, dec_ln_b)

    # ---- heads: [cls | box | zero-pad] as one lane-dense matmul ----
    y = mm(hq, head_w) + head_b[...]                             # (NQ, DP)
    box_lane = (lane >= n_cls) & (lane < n_cls + n_box)
    y = jnp.where(box_lane, jax.nn.sigmoid(y), y)
    out_ref[0] = y.astype(out_ref.dtype)


# ------------------------------ glue (JAX) ----------------------------------

def im2col_3x3_nhwc(x_nchw):
    """3x3, stride-1, pad-1 im2col, NHWC / channel-minor.  -> (B, H*W, 9*C)."""
    B, C, H, W = x_nchw.shape
    x = jnp.transpose(x_nchw, (0, 2, 3, 1))                      # NHWC once
    xp = jnp.pad(x, ((0, 0), (1, 1), (1, 1), (0, 0)))
    patches = [xp[:, dh:dh + H, dw:dw + W, :]
               for dh in range(3) for dw in range(3)]
    cols = jnp.concatenate(patches, axis=-1)                     # (B,H,W,9C)
    return cols.reshape(B, H * W, 9 * C)


def _pad2d(w, rows, cols, dtype=jnp.bfloat16):
    r, c = w.shape
    return jnp.pad(w, ((0, rows - r), (0, cols - c))).astype(dtype)


def _pad_row(v, n):
    return jnp.pad(v, (0, n - v.shape[0])).reshape(1, n).astype(jnp.float32)


# ------------------------------ parameters ----------------------------------

def init_params(key, c_in=4, d=32, d_ff=64, n_queries=8, n_classes=16):
    keys = jax.random.split(key, 32)
    k = iter(keys)

    def w(shape, scale=0.05):
        return (scale * jax.random.normal(next(k), shape)).astype(jnp.float32)

    def zeros(shape):
        return jnp.zeros(shape, jnp.float32)

    def ones(shape):
        return jnp.ones(shape, jnp.float32)

    # TODO(synk): bb_w rows are ordered [(kh,kw) outer, channel inner]; a real
    # PyTorch Conv2d checkpoint would need a permute before flattening.
    p = {
        "bb_w": w((9 * c_in, d)), "bb_b": zeros((d,)),
        "enc_wq": w((d, d)), "enc_bq": zeros((d,)),
        "enc_wk": w((d, d)), "enc_bk": zeros((d,)),
        "enc_wv": w((d, d)), "enc_bv": zeros((d,)),
        "enc_wo": w((d, d)), "enc_bo": zeros((d,)),
        "enc_ln1_g": ones((d,)), "enc_ln1_b": zeros((d,)),
        "enc_w1": w((d, d_ff)), "enc_b1": zeros((d_ff,)),
        "enc_w2": w((d_ff, d)), "enc_b2": zeros((d,)),
        "enc_ln2_g": ones((d,)), "enc_ln2_b": zeros((d,)),
        "query_embed": w((n_queries, d), scale=1.0),
        "dec_wq": w((d, d)), "dec_bq": zeros((d,)),
        "dec_wk": w((d, d)), "dec_bk": zeros((d,)),
        "dec_wv": w((d, d)), "dec_bv": zeros((d,)),
        "dec_wo": w((d, d)), "dec_bo": zeros((d,)),
        "dec_ln_g": ones((d,)), "dec_ln_b": zeros((d,)),
        "cls_w": w((d, n_classes)), "cls_b": zeros((n_classes,)),
        "box_w": w((d, 4)), "box_b": zeros((4,)),
    }
    return p


# -------------------------------- forward -----------------------------------

def rmdetr_forward(params, x_nchw, targets=None):
    # TODO(synk): multi_scale + F.interpolate is a training-only branch; this
    # implements the eval forward (self.training == False), which skips it.
    B, C, H, W = x_nchw.shape
    L = H * W
    d = params["enc_wq"].shape[0]
    n_q = params["query_embed"].shape[0]
    n_cls = params["cls_w"].shape[1]
    n_box = params["box_w"].shape[1]
    assert 9 * C <= DP and d <= DP and params["enc_w1"].shape[1] <= DP
    assert n_cls + n_box <= DP

    bf16 = jnp.bfloat16

    # ---- glue: im2col (single NHWC transpose) + zero-pad K to 128 lanes ----
    cols = im2col_3x3_nhwc(x_nchw)                               # (B,L,9C)
    cols = jnp.pad(cols, ((0, 0), (0, 0), (0, DP - cols.shape[-1])))
    cols = cols.astype(jnp.float32)

    # ---- pack / zero-pad parameters (zero padding keeps results exact) ----
    bb_w = _pad2d(params["bb_w"], DP, DP)
    bb_b = _pad_row(params["bb_b"], DP)

    enc_wqkv = jnp.concatenate(
        [_pad2d(params["enc_wq"], DP, DP),
         _pad2d(params["enc_wk"], DP, DP),
         _pad2d(params["enc_wv"], DP, DP)], axis=1)              # (DP, 3*DP)
    enc_bqkv = jnp.concatenate(
        [_pad_row(params["enc_bq"], DP),
         _pad_row(params["enc_bk"], DP),
         _pad_row(params["enc_bv"], DP)], axis=1)                # (1, 3*DP)
    enc_wo = _pad2d(params["enc_wo"], DP, DP)
    enc_bo = _pad_row(params["enc_bo"], DP)
    enc_ln1_g = _pad_row(params["enc_ln1_g"], DP)
    enc_ln1_b = _pad_row(params["enc_ln1_b"], DP)
    enc_w1 = _pad2d(params["enc_w1"], DP, DP)
    enc_b1 = _pad_row(params["enc_b1"], DP)
    enc_w2 = _pad2d(params["enc_w2"], DP, DP)
    enc_b2 = _pad_row(params["enc_b2"], DP)
    enc_ln2_g = _pad_row(params["enc_ln2_g"], DP)
    enc_ln2_b = _pad_row(params["enc_ln2_b"], DP)

    q_embed = jnp.pad(params["query_embed"],
                      ((0, 0), (0, DP - d))).astype(jnp.float32)  # (NQ, DP)

    dec_wq = _pad2d(params["dec_wq"], DP, DP)
    dec_bq = _pad_row(params["dec_bq"], DP)
    dec_wkv = jnp.concatenate(
        [_pad2d(params["dec_wk"], DP, DP),
         _pad2d(params["dec_wv"], DP, DP)], axis=1)              # (DP, 2*DP)
    dec_bkv = jnp.concatenate(
        [_pad_row(params["dec_bk"], DP),
         _pad_row(params["dec_bv"], DP)], axis=1)                # (1, 2*DP)
    dec_wo = _pad2d(params["dec_wo"], DP, DP)
    dec_bo = _pad_row(params["dec_bo"], DP)
    dec_ln_g = _pad_row(params["dec_ln_g"], DP)
    dec_ln_b = _pad_row(params["dec_ln_b"], DP)

    head_w = jnp.concatenate(
        [jnp.pad(params["cls_w"], ((0, DP - d), (0, 0))),
         jnp.pad(params["box_w"], ((0, DP - d), (0, 0)))], axis=1)
    head_w = jnp.pad(head_w,
                     ((0, 0), (0, DP - (n_cls + n_box)))).astype(bf16)
    head_b = jnp.pad(jnp.concatenate([params["cls_b"], params["box_b"]]),
                     (0, DP - (n_cls + n_box)))
    head_b = head_b.reshape(1, DP).astype(jnp.float32)

    weight_args = [bb_w, bb_b, enc_wqkv, enc_bqkv, enc_wo, enc_bo,
                   enc_ln1_g, enc_ln1_b, enc_w1, enc_b1, enc_w2, enc_b2,
                   enc_ln2_g, enc_ln2_b, q_embed,
                   dec_wq, dec_bq, dec_wkv, dec_bkv, dec_wo, dec_bo,
                   dec_ln_g, dec_ln_b, head_w, head_b]

    def _full_spec(a):
        zeros = (0,) * a.ndim
        return pl.BlockSpec(a.shape, lambda b: zeros)

    out = pl.pallas_call(
        functools.partial(_rmdetr_fused_kernel,
                          d_true=d, n_cls=n_cls, n_box=n_box),
        out_shape=jax.ShapeDtypeStruct((B, n_q, DP), jnp.float32),
        grid=(B,),
        in_specs=[pl.BlockSpec((1, L, DP), lambda b: (b, 0, 0))]
                 + [_full_spec(a) for a in weight_args],
        out_specs=pl.BlockSpec((1, n_q, DP), lambda b: (b, 0, 0)),
        compiler_params=pltpu.CompilerParams(
            dimension_semantics=("parallel",)),
    )(cols, *weight_args)

    pred_logits = out[:, :, :n_cls]
    pred_boxes = out[:, :, n_cls:n_cls + n_box]   # sigmoid applied in-kernel
    return {"pred_logits": pred_logits, "pred_boxes": pred_boxes}


# --------------------------------- main --------------------------------------

if __name__ == "__main__":
    key = jax.random.PRNGKey(0)
    k_param, k_x = jax.random.split(key)

    B, C, H, W = 2, 4, 16, 16
    x = jax.random.normal(k_x, (B, C, H, W), dtype=jnp.float32)

    params = init_params(k_param, c_in=C, d=32, d_ff=64,
                         n_queries=8, n_classes=16)

    out = jax.jit(rmdetr_forward)(params, x)
    jax.block_until_ready(out)

    assert out["pred_logits"].shape == (B, 8, 16)
    assert out["pred_boxes"].shape == (B, 8, 4)
    assert bool(jnp.all(jnp.isfinite(out["pred_logits"])))
    assert bool(jnp.all((out["pred_boxes"] >= 0) & (out["pred_boxes"] <= 1)))
    print("KERNEL_OK")
</pallas_src>

<mosaic_0001>
module attributes {stable_mosaic.version = 11 : i64} {
  func.func @_rmdetr_fused_kernel(%arg0: i32, %arg1: memref<1x256x128xf32, #tpu.memory_space<vmem>>, %arg2: memref<128x128xbf16, #tpu.memory_space<vmem>>, %arg3: memref<1x128xf32, #tpu.memory_space<vmem>>, %arg4: memref<128x384xbf16, #tpu.memory_space<vmem>>, %arg5: memref<1x384xf32, #tpu.memory_space<vmem>>, %arg6: memref<128x128xbf16, #tpu.memory_space<vmem>>, %arg7: memref<1x128xf32, #tpu.memory_space<vmem>>, %arg8: memref<1x128xf32, #tpu.memory_space<vmem>>, %arg9: memref<1x128xf32, #tpu.memory_space<vmem>>, %arg10: memref<128x128xbf16, #tpu.memory_space<vmem>>, %arg11: memref<1x128xf32, #tpu.memory_space<vmem>>, %arg12: memref<128x128xbf16, #tpu.memory_space<vmem>>, %arg13: memref<1x128xf32, #tpu.memory_space<vmem>>, %arg14: memref<1x128xf32, #tpu.memory_space<vmem>>, %arg15: memref<1x128xf32, #tpu.memory_space<vmem>>, %arg16: memref<8x128xf32, #tpu.memory_space<vmem>>, %arg17: memref<128x128xbf16, #tpu.memory_space<vmem>>, %arg18: memref<1x128xf32, #tpu.memory_space<vmem>>, %arg19: memref<128x256xbf16, #tpu.memory_space<vmem>>, %arg20: memref<1x256xf32, #tpu.memory_space<vmem>>, %arg21: memref<128x128xbf16, #tpu.memory_space<vmem>>, %arg22: memref<1x128xf32, #tpu.memory_space<vmem>>, %arg23: memref<1x128xf32, #tpu.memory_space<vmem>>, %arg24: memref<1x128xf32, #tpu.memory_space<vmem>>, %arg25: memref<128x128xbf16, #tpu.memory_space<vmem>>, %arg26: memref<1x128xf32, #tpu.memory_space<vmem>>, %arg27: memref<1x8x128xf32, #tpu.memory_space<vmem>>) attributes {dimension_semantics = [#tpu.dimension_semantics<parallel>], iteration_bounds = array<i64: 2>, scalar_prefetch = 0 : i64, scratch_operands = 0 : i64, tpu.core_type = #tpu.core_type<tc>, window_params = [{transform_indices = @transform_0, window_bounds = array<i64: 1, 256, 128>}, {pipeline_mode = #tpu.pipeline_mode<synchronous>, transform_indices = @transform_1, window_bounds = array<i64: 128, 128>}, {pipeline_mode = #tpu.pipeline_mode<synchronous>, transform_indices = @transform_2, window_bounds = array<i64: 1, 128>}, {pipeline_mode = #tpu.pipeline_mode<synchronous>, transform_indices = @transform_3, window_bounds = array<i64: 128, 384>}, {pipeline_mode = #tpu.pipeline_mode<synchronous>, transform_indices = @transform_4, window_bounds = array<i64: 1, 384>}, {pipeline_mode = #tpu.pipeline_mode<synchronous>, transform_indices = @transform_5, window_bounds = array<i64: 128, 128>}, {pipeline_mode = #tpu.pipeline_mode<synchronous>, transform_indices = @transform_6, window_bounds = array<i64: 1, 128>}, {pipeline_mode = #tpu.pipeline_mode<synchronous>, transform_indices = @transform_7, window_bounds = array<i64: 1, 128>}, {pipeline_mode = #tpu.pipeline_mode<synchronous>, transform_indices = @transform_8, window_bounds = array<i64: 1, 128>}, {pipeline_mode = #tpu.pipeline_mode<synchronous>, transform_indices = @transform_9, window_bounds = array<i64: 128, 128>}, {pipeline_mode = #tpu.pipeline_mode<synchronous>, transform_indices = @transform_10, window_bounds = array<i64: 1, 128>}, {pipeline_mode = #tpu.pipeline_mode<synchronous>, transform_indices = @transform_11, window_bounds = array<i64: 128, 128>}, {pipeline_mode = #tpu.pipeline_mode<synchronous>, transform_indices = @transform_12, window_bounds = array<i64: 1, 128>}, {pipeline_mode = #tpu.pipeline_mode<synchronous>, transform_indices = @transform_13, window_bounds = array<i64: 1, 128>}, {pipeline_mode = #tpu.pipeline_mode<synchronous>, transform_indices = @transform_14, window_bounds = array<i64: 1, 128>}, {pipeline_mode = #tpu.pipeline_mode<synchronous>, transform_indices = @transform_15, window_bounds = array<i64: 8, 128>}, {pipeline_mode = #tpu.pipeline_mode<synchronous>, transform_indices = @transform_16, window_bounds = array<i64: 128, 128>}, {pipeline_mode = #tpu.pipeline_mode<synchronous>, transform_indices = @transform_17, window_bounds = array<i64: 1, 128>}, {pipeline_mode = #tpu.pipeline_mode<synchronous>, transform_indices = @transform_18, window_bounds = array<i64: 128, 256>}, {pipeline_mode = #tpu.pipeline_mode<synchronous>, transform_indices = @transform_19, window_bounds = array<i64: 1, 256>}, {pipeline_mode = #tpu.pipeline_mode<synchronous>, transform_indices = @transform_20, window_bounds = array<i64: 128, 128>}, {pipeline_mode = #tpu.pipeline_mode<synchronous>, transform_indices = @transform_21, window_bounds = array<i64: 1, 128>}, {pipeline_mode = #tpu.pipeline_mode<synchronous>, transform_indices = @transform_22, window_bounds = array<i64: 1, 128>}, {pipeline_mode = #tpu.pipeline_mode<synchronous>, transform_indices = @transform_23, window_bounds = array<i64: 1, 128>}, {pipeline_mode = #tpu.pipeline_mode<synchronous>, transform_indices = @transform_24, window_bounds = array<i64: 128, 128>}, {pipeline_mode = #tpu.pipeline_mode<synchronous>, transform_indices = @transform_25, window_bounds = array<i64: 1, 128>}, {transform_indices = @transform_26, window_bounds = array<i64: 1, 8, 128>}]} {
    %0 = tpu.iota {dimensions = array<i32: 1>} : vector<1x128xi32>
    %c32_i32 = arith.constant 32 : i32
    %1 = vector.broadcast %c32_i32 : i32 to vector<1x128xi32>
    %2 = arith.cmpi slt, %0, %1 : vector<1x128xi32>
    %3 = arith.extui %2 : vector<1x128xi1> to vector<1x128xi32>
    %4 = arith.sitofp %3 : vector<1x128xi32> to vector<1x128xf32>
    %c0 = arith.constant 0 : index
    %c0_0 = arith.constant 0 : index
    %c0_1 = arith.constant 0 : index
    %5 = vector.load %arg1[%c0, %c0_0, %c0_1] : memref<1x256x128xf32, #tpu.memory_space<vmem>>, vector<1x256x128xf32>
    %6 = vector.shape_cast %5 : vector<1x256x128xf32> to vector<256x128xf32>
    %7 = arith.truncf %6 : vector<256x128xf32> to vector<256x128xbf16>
    %c0_2 = arith.constant 0 : index
    %c0_3 = arith.constant 0 : index
    %8 = vector.load %arg2[%c0_2, %c0_3] : memref<128x128xbf16, #tpu.memory_space<vmem>>, vector<128x128xbf16>
    %cst = arith.constant dense<0.000000e+00> : vector<256x128xf32>
    %9 = tpu.matmul %7, %8, %cst {dimension_numbers = #tpu.dot_dimension_numbers<[1], [0], [0], [1], [0, 0, 1, 1], [], []>} : vector<256x128xbf16>, vector<128x128xbf16>, vector<256x128xf32> -> vector<256x128xf32>
    %c0_4 = arith.constant 0 : index
    %c0_5 = arith.constant 0 : index
    %10 = vector.load %arg3[%c0_4, %c0_5] : memref<1x128xf32, #tpu.memory_space<vmem>>, vector<1x128xf32>
    %11 = vector.broadcast %10 : vector<1x128xf32> to vector<256x128xf32>
    %12 = arith.addf %9, %11 : vector<256x128xf32>
    %cst_6 = arith.constant 0.000000e+00 : f32
    %13 = vector.broadcast %cst_6 : f32 to vector<256x128xf32>
    %14 = arith.maximumf %12, %13 : vector<256x128xf32>
    %15 = arith.truncf %14 : vector<256x128xf32> to vector<256x128xbf16>
    %c0_7 = arith.constant 0 : index
    %c0_8 = arith.constant 0 : index
    %16 = vector.load %arg4[%c0_7, %c0_8] : memref<128x384xbf16, #tpu.memory_space<vmem>>, vector<128x384xbf16>
    %cst_9 = arith.constant dense<0.000000e+00> : vector<256x384xf32>
    %17 = tpu.matmul %15, %16, %cst_9 {dimension_numbers = #tpu.dot_dimension_numbers<[1], [0], [0], [1], [0, 0, 1, 1], [], []>} : vector<256x128xbf16>, vector<128x384xbf16>, vector<256x384xf32> -> vector<256x384xf32>
    %c0_10 = arith.constant 0 : index
    %c0_11 = arith.constant 0 : index
    %18 = vector.load %arg5[%c0_10, %c0_11] : memref<1x384xf32, #tpu.memory_space<vmem>>, vector<1x384xf32>
    %19 = vector.broadcast %18 : vector<1x384xf32> to vector<256x384xf32>
    %20 = arith.addf %17, %19 : vector<256x384xf32>
    %21 = vector.extract_strided_slice %20 {offsets = [0, 0], sizes = [256, 128], strides = [1, 1]} : vector<256x384xf32> to vector<256x128xf32>
    %22 = vector.extract_strided_slice %20 {offsets = [0, 128], sizes = [256, 128], strides = [1, 1]} : vector<256x384xf32> to vector<256x128xf32>
    %23 = vector.extract_strided_slice %20 {offsets = [0, 256], sizes = [256, 128], strides = [1, 1]} : vector<256x384xf32> to vector<256x128xf32>
    %24 = arith.truncf %21 : vector<256x128xf32> to vector<256x128xbf16>
    %25 = arith.truncf %22 : vector<256x128xf32> to vector<256x128xbf16>
    %cst_12 = arith.constant dense<0.000000e+00> : vector<256x256xf32>
    %26 = tpu.matmul %24, %25, %cst_12 {dimension_numbers = #tpu.dot_dimension_numbers<[1], [1], [0], [0], [0, 0, 1, 0], [], []>} : vector<256x128xbf16>, vector<256x128xbf16>, vector<256x256xf32> -> vector<256x256xf32>
    %cst_13 = arith.constant 0.176776692 : f32
    %27 = vector.broadcast %cst_13 : f32 to vector<256x256xf32>
    %28 = arith.mulf %26, %27 : vector<256x256xf32>
    %cst_14 = arith.constant dense<0xFF800000> : vector<256xf32>
    %29 = vector.multi_reduction <maximumf>, %28, %cst_14 [1] : vector<256x256xf32> to vector<256xf32>
    %30 = vector.shape_cast %29 : vector<256xf32> to vector<256x1xf32>
    %31 = vector.broadcast %30 : vector<256x1xf32> to vector<256x256xf32>
    %32 = arith.subf %28, %31 : vector<256x256xf32>
    %33 = math.exp %32 : vector<256x256xf32>
    %cst_15 = arith.constant dense<0.000000e+00> : vector<256xf32>
    %34 = vector.multi_reduction <add>, %33, %cst_15 [1] : vector<256x256xf32> to vector<256xf32>
    %35 = vector.shape_cast %34 : vector<256xf32> to vector<256x1xf32>
    %36 = tpu.reciprocal %35 {approx = true} : vector<256x1xf32> -> vector<256x1xf32>
    %37 = vector.broadcast %36 : vector<256x1xf32> to vector<256x256xf32>
    %38 = arith.mulf %33, %37 : vector<256x256xf32>
    %39 = arith.truncf %38 : vector<256x256xf32> to vector<256x256xbf16>
    %40 = arith.truncf %23 : vector<256x128xf32> to vector<256x128xbf16>
    %cst_16 = arith.constant dense<0.000000e+00> : vector<256x128xf32>
    %41 = tpu.matmul %39, %40, %cst_16 {dimension_numbers = #tpu.dot_dimension_numbers<[1], [0], [0], [1], [0, 0, 1, 1], [], []>} : vector<256x256xbf16>, vector<256x128xbf16>, vector<256x128xf32> -> vector<256x128xf32>
    %42 = arith.truncf %41 : vector<256x128xf32> to vector<256x128xbf16>
    %c0_17 = arith.constant 0 : index
    %c0_18 = arith.constant 0 : index
    %43 = vector.load %arg6[%c0_17, %c0_18] : memref<128x128xbf16, #tpu.memory_space<vmem>>, vector<128x128xbf16>
    %cst_19 = arith.constant dense<0.000000e+00> : vector<256x128xf32>
    %44 = tpu.matmul %42, %43, %cst_19 {dimension_numbers = #tpu.dot_dimension_numbers<[1], [0], [0], [1], [0, 0, 1, 1], [], []>} : vector<256x128xbf16>, vector<128x128xbf16>, vector<256x128xf32> -> vector<256x128xf32>
    %c0_20 = arith.constant 0 : index
    %c0_21 = arith.constant 0 : index
    %45 = vector.load %arg7[%c0_20, %c0_21] : memref<1x128xf32, #tpu.memory_space<vmem>>, vector<1x128xf32>
    %46 = vector.broadcast %45 : vector<1x128xf32> to vector<256x128xf32>
    %47 = arith.addf %44, %46 : vector<256x128xf32>
    %48 = arith.addf %47, %14 : vector<256x128xf32>
    %cst_22 = arith.constant dense<0.000000e+00> : vector<256xf32>
    %49 = vector.multi_reduction <add>, %48, %cst_22 [1] : vector<256x128xf32> to vector<256xf32>
    %50 = vector.shape_cast %49 : vector<256xf32> to vector<256x1xf32>
    %cst_23 = arith.constant 3.125000e-02 : f32
    %51 = vector.broadcast %cst_23 : f32 to vector<256x1xf32>
    %52 = arith.mulf %50, %51 : vector<256x1xf32>
    %53 = vector.broadcast %52 : vector<256x1xf32> to vector<256x128xf32>
    %54 = arith.subf %48, %53 : vector<256x128xf32>
    %55 = vector.broadcast %4 : vector<1x128xf32> to vector<256x128xf32>
    %56 = arith.mulf %54, %55 : vector<256x128xf32>
    %57 = arith.mulf %56, %56 : vector<256x128xf32>
    %cst_24 = arith.constant dense<0.000000e+00> : vector<256xf32>
    %58 = vector.multi_reduction <add>, %57, %cst_24 [1] : vector<256x128xf32> to vector<256xf32>
    %59 = vector.shape_cast %58 : vector<256xf32> to vector<256x1xf32>
    %cst_25 = arith.constant 3.125000e-02 : f32
    %60 = vector.broadcast %cst_25 : f32 to vector<256x1xf32>
    %61 = arith.mulf %59, %60 : vector<256x1xf32>
    %cst_26 = arith.constant 9.99999974E-6 : f32
    %62 = vector.broadcast %cst_26 : f32 to vector<256x1xf32>
    %63 = arith.addf %61, %62 : vector<256x1xf32>
    %64 = math.rsqrt %63 : vector<256x1xf32>
    %65 = vector.broadcast %64 : vector<256x1xf32> to vector<256x128xf32>
    %66 = arith.mulf %56, %65 : vector<256x128xf32>
    %c0_27 = arith.constant 0 : index
    %c0_28 = arith.constant 0 : index
    %67 = vector.load %arg8[%c0_27, %c0_28] : memref<1x128xf32, #tpu.memory_space<vmem>>, vector<1x128xf32>
    %68 = vector.broadcast %67 : vector<1x128xf32> to vector<256x128xf32>
    %69 = arith.mulf %66, %68 : vector<256x128xf32>
    %c0_29 = arith.constant 0 : index
    %c0_30 = arith.constant 0 : index
    %70 = vector.load %arg9[%c0_29, %c0_30] : memref<1x128xf32, #tpu.memory_space<vmem>>, vector<1x128xf32>
    %71 = vector.broadcast %70 : vector<1x128xf32> to vector<256x128xf32>
    %72 = arith.addf %69, %71 : vector<256x128xf32>
    %73 = arith.truncf %72 : vector<256x128xf32> to vector<256x128xbf16>
    %c0_31 = arith.constant 0 : index
    %c0_32 = arith.constant 0 : index
    %74 = vector.load %arg10[%c0_31, %c0_32] : memref<128x128xbf16, #tpu.memory_space<vmem>>, vector<128x128xbf16>
    %cst_33 = arith.constant dense<0.000000e+00> : vector<256x128xf32>
    %75 = tpu.matmul %73, %74, %cst_33 {dimension_numbers = #tpu.dot_dimension_numbers<[1], [0], [0], [1], [0, 0, 1, 1], [], []>} : vector<256x128xbf16>, vector<128x128xbf16>, vector<256x128xf32> -> vector<256x128xf32>
    %c0_34 = arith.constant 0 : index
    %c0_35 = arith.constant 0 : index
    %76 = vector.load %arg11[%c0_34, %c0_35] : memref<1x128xf32, #tpu.memory_space<vmem>>, vector<1x128xf32>
    %77 = vector.broadcast %76 : vector<1x128xf32> to vector<256x128xf32>
    %78 = arith.addf %75, %77 : vector<256x128xf32>
    %cst_36 = arith.constant 0.000000e+00 : f32
    %79 = vector.broadcast %cst_36 : f32 to vector<256x128xf32>
    %80 = arith.maximumf %78, %79 : vector<256x128xf32>
    %81 = arith.truncf %80 : vector<256x128xf32> to vector<256x128xbf16>
    %c0_37 = arith.constant 0 : index
    %c0_38 = arith.constant 0 : index
    %82 = vector.load %arg12[%c0_37, %c0_38] : memref<128x128xbf16, #tpu.memory_space<vmem>>, vector<128x128xbf16>
    %cst_39 = arith.constant dense<0.000000e+00> : vector<256x128xf32>
    %83 = tpu.matmul %81, %82, %cst_39 {dimension_numbers = #tpu.dot_dimension_numbers<[1], [0], [0], [1], [0, 0, 1, 1], [], []>} : vector<256x128xbf16>, vector<128x128xbf16>, vector<256x128xf32> -> vector<256x128xf32>
    %c0_40 = arith.constant 0 : index
    %c0_41 = arith.constant 0 : index
    %84 = vector.load %arg13[%c0_40, %c0_41] : memref<1x128xf32, #tpu.memory_space<vmem>>, vector<1x128xf32>
    %85 = vector.broadcast %84 : vector<1x128xf32> to vector<256x128xf32>
    %86 = arith.addf %83, %85 : vector<256x128xf32>
    %87 = arith.addf %86, %72 : vector<256x128xf32>
    %cst_42 = arith.constant dense<0.000000e+00> : vector<256xf32>
    %88 = vector.multi_reduction <add>, %87, %cst_42 [1] : vector<256x128xf32> to vector<256xf32>
    %89 = vector.shape_cast %88 : vector<256xf32> to vector<256x1xf32>
    %cst_43 = arith.constant 3.125000e-02 : f32
    %90 = vector.broadcast %cst_43 : f32 to vector<256x1xf32>
    %91 = arith.mulf %89, %90 : vector<256x1xf32>
    %92 = vector.broadcast %91 : vector<256x1xf32> to vector<256x128xf32>
    %93 = arith.subf %87, %92 : vector<256x128xf32>
    %94 = vector.broadcast %4 : vector<1x128xf32> to vector<256x128xf32>
    %95 = arith.mulf %93, %94 : vector<256x128xf32>
    %96 = arith.mulf %95, %95 : vector<256x128xf32>
    %cst_44 = arith.constant dense<0.000000e+00> : vector<256xf32>
    %97 = vector.multi_reduction <add>, %96, %cst_44 [1] : vector<256x128xf32> to vector<256xf32>
    %98 = vector.shape_cast %97 : vector<256xf32> to vector<256x1xf32>
    %cst_45 = arith.constant 3.125000e-02 : f32
    %99 = vector.broadcast %cst_45 : f32 to vector<256x1xf32>
    %100 = arith.mulf %98, %99 : vector<256x1xf32>
    %cst_46 = arith.constant 9.99999974E-6 : f32
    %101 = vector.broadcast %cst_46 : f32 to vector<256x1xf32>
    %102 = arith.addf %100, %101 : vector<256x1xf32>
    %103 = math.rsqrt %102 : vector<256x1xf32>
    %104 = vector.broadcast %103 : vector<256x1xf32> to vector<256x128xf32>
    %105 = arith.mulf %95, %104 : vector<256x128xf32>
    %c0_47 = arith.constant 0 : index
    %c0_48 = arith.constant 0 : index
    %106 = vector.load %arg14[%c0_47, %c0_48] : memref<1x128xf32, #tpu.memory_space<vmem>>, vector<1x128xf32>
    %107 = vector.broadcast %106 : vector<1x128xf32> to vector<256x128xf32>
    %108 = arith.mulf %105, %107 : vector<256x128xf32>
    %c0_49 = arith.constant 0 : index
    %c0_50 = arith.constant 0 : index
    %109 = vector.load %arg15[%c0_49, %c0_50] : memref<1x128xf32, #tpu.memory_space<vmem>>, vector<1x128xf32>
    %110 = vector.broadcast %109 : vector<1x128xf32> to vector<256x128xf32>
    %111 = arith.addf %108, %110 : vector<256x128xf32>
    %c0_51 = arith.constant 0 : index
    %c0_52 = arith.constant 0 : index
    %112 = vector.load %arg16[%c0_51, %c0_52] : memref<8x128xf32, #tpu.memory_space<vmem>>, vector<8x128xf32>
    %113 = arith.truncf %112 : vector<8x128xf32> to vector<8x128xbf16>
    %c0_53 = arith.constant 0 : index
    %c0_54 = arith.constant 0 : index
    %114 = vector.load %arg17[%c0_53, %c0_54] : memref<128x128xbf16, #tpu.memory_space<vmem>>, vector<128x128xbf16>
    %cst_55 = arith.constant dense<0.000000e+00> : vector<8x128xf32>
    %115 = tpu.matmul %113, %114, %cst_55 {dimension_numbers = #tpu.dot_dimension_numbers<[1], [0], [0], [1], [0, 0, 1, 1], [], []>} : vector<8x128xbf16>, vector<128x128xbf16>, vector<8x128xf32> -> vector<8x128xf32>
    %c0_56 = arith.constant 0 : index
    %c0_57 = arith.constant 0 : index
    %116 = vector.load %arg18[%c0_56, %c0_57] : memref<1x128xf32, #tpu.memory_space<vmem>>, vector<1x128xf32>
    %117 = vector.broadcast %116 : vector<1x128xf32> to vector<8x128xf32>
    %118 = arith.addf %115, %117 : vector<8x128xf32>
    %119 = arith.truncf %111 : vector<256x128xf32> to vector<256x128xbf16>
    %c0_58 = arith.constant 0 : index
    %c0_59 = arith.constant 0 : index
    %120 = vector.load %arg19[%c0_58, %c0_59] : memref<128x256xbf16, #tpu.memory_space<vmem>>, vector<128x256xbf16>
    %cst_60 = arith.constant dense<0.000000e+00> : vector<256x256xf32>
    %121 = tpu.matmul %119, %120, %cst_60 {dimension_numbers = #tpu.dot_dimension_numbers<[1], [0], [0], [1], [0, 0, 1, 1], [], []>} : vector<256x128xbf16>, vector<128x256xbf16>, vector<256x256xf32> -> vector<256x256xf32>
    %c0_61 = arith.constant 0 : index
    %c0_62 = arith.constant 0 : index
    %122 = vector.load %arg20[%c0_61, %c0_62] : memref<1x256xf32, #tpu.memory_space<vmem>>, vector<1x256xf32>
    %123 = vector.broadcast %122 : vector<1x256xf32> to vector<256x256xf32>
    %124 = arith.addf %121, %123 : vector<256x256xf32>
    %125 = vector.extract_strided_slice %124 {offsets = [0, 0], sizes = [256, 128], strides = [1, 1]} : vector<256x256xf32> to vector<256x128xf32>
    %126 = vector.extract_strided_slice %124 {offsets = [0, 128], sizes = [256, 128], strides = [1, 1]} : vector<256x256xf32> to vector<256x128xf32>
    %127 = arith.truncf %118 : vector<8x128xf32> to vector<8x128xbf16>
    %128 = arith.truncf %125 : vector<256x128xf32> to vector<256x128xbf16>
    %cst_63 = arith.constant dense<0.000000e+00> : vector<8x256xf32>
    %129 = tpu.matmul %127, %128, %cst_63 {dimension_numbers = #tpu.dot_dimension_numbers<[1], [1], [0], [0], [0, 0, 1, 0], [], []>} : vector<8x128xbf16>, vector<256x128xbf16>, vector<8x256xf32> -> vector<8x256xf32>
    %cst_64 = arith.constant 0.176776692 : f32
    %130 = vector.broadcast %cst_64 : f32 to vector<8x256xf32>
    %131 = arith.mulf %129, %130 : vector<8x256xf32>
    %cst_65 = arith.constant dense<0xFF800000> : vector<8xf32>
    %132 = vector.multi_reduction <maximumf>, %131, %cst_65 [1] : vector<8x256xf32> to vector<8xf32>
    %133 = vector.shape_cast %132 : vector<8xf32> to vector<8x1xf32>
    %134 = vector.broadcast %133 : vector<8x1xf32> to vector<8x256xf32>
    %135 = arith.subf %131, %134 : vector<8x256xf32>
    %136 = math.exp %135 : vector<8x256xf32>
    %cst_66 = arith.constant dense<0.000000e+00> : vector<8xf32>
    %137 = vector.multi_reduction <add>, %136, %cst_66 [1] : vector<8x256xf32> to vector<8xf32>
    %138 = vector.shape_cast %137 : vector<8xf32> to vector<8x1xf32>
    %139 = tpu.reciprocal %138 {approx = true} : vector<8x1xf32> -> vector<8x1xf32>
    %140 = vector.broadcast %139 : vector<8x1xf32> to vector<8x256xf32>
    %141 = arith.mulf %136, %140 : vector<8x256xf32>
    %142 = arith.truncf %141 : vector<8x256xf32> to vector<8x256xbf16>
    %143 = arith.truncf %126 : vector<256x128xf32> to vector<256x128xbf16>
    %cst_67 = arith.constant dense<0.000000e+00> : vector<8x128xf32>
    %144 = tpu.matmul %142, %143, %cst_67 {dimension_numbers = #tpu.dot_dimension_numbers<[1], [0], [0], [1], [0, 0, 1, 1], [], []>} : vector<8x256xbf16>, vector<256x128xbf16>, vector<8x128xf32> -> vector<8x128xf32>
    %145 = arith.truncf %144 : vector<8x128xf32> to vector<8x128xbf16>
    %c0_68 = arith.constant 0 : index
    %c0_69 = arith.constant 0 : index
    %146 = vector.load %arg21[%c0_68, %c0_69] : memref<128x128xbf16, #tpu.memory_space<vmem>>, vector<128x128xbf16>
    %cst_70 = arith.constant dense<0.000000e+00> : vector<8x128xf32>
    %147 = tpu.matmul %145, %146, %cst_70 {dimension_numbers = #tpu.dot_dimension_numbers<[1], [0], [0], [1], [0, 0, 1, 1], [], []>} : vector<8x128xbf16>, vector<128x128xbf16>, vector<8x128xf32> -> vector<8x128xf32>
    %c0_71 = arith.constant 0 : index
    %c0_72 = arith.constant 0 : index
    %148 = vector.load %arg22[%c0_71, %c0_72] : memref<1x128xf32, #tpu.memory_space<vmem>>, vector<1x128xf32>
    %149 = vector.broadcast %148 : vector<1x128xf32> to vector<8x128xf32>
    %150 = arith.addf %147, %149 : vector<8x128xf32>
    %151 = arith.addf %150, %112 : vector<8x128xf32>
    %cst_73 = arith.constant dense<0.000000e+00> : vector<8xf32>
    %152 = vector.multi_reduction <add>, %151, %cst_73 [1] : vector<8x128xf32> to vector<8xf32>
    %153 = vector.shape_cast %152 : vector<8xf32> to vector<8x1xf32>
    %cst_74 = arith.constant 3.125000e-02 : f32
    %154 = vector.broadcast %cst_74 : f32 to vector<8x1xf32>
    %155 = arith.mulf %153, %154 : vector<8x1xf32>
    %156 = vector.broadcast %155 : vector<8x1xf32> to vector<8x128xf32>
    %157 = arith.subf %151, %156 : vector<8x128xf32>
    %158 = vector.broadcast %4 : vector<1x128xf32> to vector<8x128xf32>
    %159 = arith.mulf %157, %158 : vector<8x128xf32>
    %160 = arith.mulf %159, %159 : vector<8x128xf32>
    %cst_75 = arith.constant dense<0.000000e+00> : vector<8xf32>
    %161 = vector.multi_reduction <add>, %160, %cst_75 [1] : vector<8x128xf32> to vector<8xf32>
    %162 = vector.shape_cast %161 : vector<8xf32> to vector<8x1xf32>
    %cst_76 = arith.constant 3.125000e-02 : f32
    %163 = vector.broadcast %cst_76 : f32 to vector<8x1xf32>
    %164 = arith.mulf %162, %163 : vector<8x1xf32>
    %cst_77 = arith.constant 9.99999974E-6 : f32
    %165 = vector.broadcast %cst_77 : f32 to vector<8x1xf32>
    %166 = arith.addf %164, %165 : vector<8x1xf32>
    %167 = math.rsqrt %166 : vector<8x1xf32>
    %168 = vector.broadcast %167 : vector<8x1xf32> to vector<8x128xf32>
    %169 = arith.mulf %159, %168 : vector<8x128xf32>
    %c0_78 = arith.constant 0 : index
    %c0_79 = arith.constant 0 : index
    %170 = vector.load %arg23[%c0_78, %c0_79] : memref<1x128xf32, #tpu.memory_space<vmem>>, vector<1x128xf32>
    %171 = vector.broadcast %170 : vector<1x128xf32> to vector<8x128xf32>
    %172 = arith.mulf %169, %171 : vector<8x128xf32>
    %c0_80 = arith.constant 0 : index
    %c0_81 = arith.constant 0 : index
    %173 = vector.load %arg24[%c0_80, %c0_81] : memref<1x128xf32, #tpu.memory_space<vmem>>, vector<1x128xf32>
    %174 = vector.broadcast %173 : vector<1x128xf32> to vector<8x128xf32>
    %175 = arith.addf %172, %174 : vector<8x128xf32>
    %176 = arith.truncf %175 : vector<8x128xf32> to vector<8x128xbf16>
    %c0_82 = arith.constant 0 : index
    %c0_83 = arith.constant 0 : index
    %177 = vector.load %arg25[%c0_82, %c0_83] : memref<128x128xbf16, #tpu.memory_space<vmem>>, vector<128x128xbf16>
    %cst_84 = arith.constant dense<0.000000e+00> : vector<8x128xf32>
    %178 = tpu.matmul %176, %177, %cst_84 {dimension_numbers = #tpu.dot_dimension_numbers<[1], [0], [0], [1], [0, 0, 1, 1], [], []>} : vector<8x128xbf16>, vector<128x128xbf16>, vector<8x128xf32> -> vector<8x128xf32>
    %c0_85 = arith.constant 0 : index
    %c0_86 = arith.constant 0 : index
    %179 = vector.load %arg26[%c0_85, %c0_86] : memref<1x128xf32, #tpu.memory_space<vmem>>, vector<1x128xf32>
    %180 = vector.broadcast %179 : vector<1x128xf32> to vector<8x128xf32>
    %181 = arith.addf %178, %180 : vector<8x128xf32>
    %c16_i32 = arith.constant 16 : i32
    %182 = vector.broadcast %c16_i32 : i32 to vector<1x128xi32>
    %183 = arith.cmpi sge, %0, %182 : vector<1x128xi32>
    %c20_i32 = arith.constant 20 : i32
    %184 = vector.broadcast %c20_i32 : i32 to vector<1x128xi32>
    %185 = arith.cmpi slt, %0, %184 : vector<1x128xi32>
    %186 = arith.andi %183, %185 : vector<1x128xi1>
    %187 = arith.negf %181 : vector<8x128xf32>
    %188 = math.exp %187 : vector<8x128xf32>
    %cst_87 = arith.constant 1.000000e+00 : f32
    %189 = vector.broadcast %cst_87 : f32 to vector<8x128xf32>
    %190 = arith.addf %189, %188 : vector<8x128xf32>
    %191 = arith.divf %189, %190 : vector<8x128xf32>
    %192 = vector.shape_cast %186 : vector<1x128xi1> to vector<1x128xi1>
    %193 = vector.broadcast %192 : vector<1x128xi1> to vector<8x128xi1>
    %194 = arith.select %193, %191, %181 : vector<8x128xi1>, vector<8x128xf32>
    %c0_88 = arith.constant 0 : index
    %c0_89 = arith.constant 0 : index
    %c0_90 = arith.constant 0 : index
    %195 = vector.load %arg27[%c0_88, %c0_89, %c0_90] : memref<1x8x128xf32, #tpu.memory_space<vmem>>, vector<1x8x128xf32>
    %196 = vector.shape_cast %195 : vector<1x8x128xf32> to vector<8x128xf32>
    %197 = vector.shape_cast %194 : vector<8x128xf32> to vector<1x8x128xf32>
    tpu.vector_store %arg27[%c0_88, %c0_89, %c0_90], %197 {strides = array<i32>} : memref<1x8x128xf32, #tpu.memory_space<vmem>>, vector<1x8x128xf32>,
    return
  }
  func.func @transform_0(%arg0: i32) -> (i32, i32, i32) {
    %c0_i32 = arith.constant 0 : i32
    %c0_i32_0 = arith.constant 0 : i32
    %c0_i32_1 = arith.constant 0 : i32
    return %arg0, %c0_i32, %c0_i32_0 : i32, i32, i32
  }
  func.func @transform_1(%arg0: i32) -> (i32, i32) {
    %c0_i32 = arith.constant 0 : i32
    %c0_i32_0 = arith.constant 0 : i32
    %c0_i32_1 = arith.constant 0 : i32
    return %c0_i32, %c0_i32_0 : i32, i32
  }
  func.func @transform_2(%arg0: i32) -> (i32, i32) {
    %c0_i32 = arith.constant 0 : i32
    %c0_i32_0 = arith.constant 0 : i32
    %c0_i32_1 = arith.constant 0 : i32
    return %c0_i32, %c0_i32_0 : i32, i32
  }
  func.func @transform_3(%arg0: i32) -> (i32, i32) {
    %c0_i32 = arith.constant 0 : i32
    %c0_i32_0 = arith.constant 0 : i32
    %c0_i32_1 = arith.constant 0 : i32
    return %c0_i32, %c0_i32_0 : i32, i32
  }
  func.func @transform_4(%arg0: i32) -> (i32, i32) {
    %c0_i32 = arith.constant 0 : i32
    %c0_i32_0 = arith.constant 0 : i32
    %c0_i32_1 = arith.constant 0 : i32
    return %c0_i32, %c0_i32_0 : i32, i32
  }
  func.func @transform_5(%arg0: i32) -> (i32, i32) {
    %c0_i32 = arith.constant 0 : i32
    %c0_i32_0 = arith.constant 0 : i32
    %c0_i32_1 = arith.constant 0 : i32
    return %c0_i32, %c0_i32_0 : i32, i32
  }
  func.func @transform_6(%arg0: i32) -> (i32, i32) {
    %c0_i32 = arith.constant 0 : i32
    %c0_i32_0 = arith.constant 0 : i32
    %c0_i32_1 = arith.constant 0 : i32
    return %c0_i32, %c0_i32_0 : i32, i32
  }
  func.func @transform_7(%arg0: i32) -> (i32, i32) {
    %c0_i32 = arith.constant 0 : i32
    %c0_i32_0 = arith.constant 0 : i32
    %c0_i32_1 = arith.constant 0 : i32
    return %c0_i32, %c0_i32_0 : i32, i32
  }
  func.func @transform_8(%arg0: i32) -> (i32, i32) {
    %c0_i32 = arith.constant 0 : i32
    %c0_i32_0 = arith.constant 0 : i32
    %c0_i32_1 = arith.constant 0 : i32
    return %c0_i32, %c0_i32_0 : i32, i32
  }
  func.func @transform_9(%arg0: i32) -> (i32, i32) {
    %c0_i32 = arith.constant 0 : i32
    %c0_i32_0 = arith.constant 0 : i32
    %c0_i32_1 = arith.constant 0 : i32
    return %c0_i32, %c0_i32_0 : i32, i32
  }
  func.func @transform_10(%arg0: i32) -> (i32, i32) {
    %c0_i32 = arith.constant 0 : i32
    %c0_i32_0 = arith.constant 0 : i32
    %c0_i32_1 = arith.constant 0 : i32
    return %c0_i32, %c0_i32_0 : i32, i32
  }
  func.func @transform_11(%arg0: i32) -> (i32, i32) {
    %c0_i32 = arith.constant 0 : i32
    %c0_i32_0 = arith.constant 0 : i32
    %c0_i32_1 = arith.constant 0 : i32
    return %c0_i32, %c0_i32_0 : i32, i32
  }
  func.func @transform_12(%arg0: i32) -> (i32, i32) {
    %c0_i32 = arith.constant 0 : i32
    %c0_i32_0 = arith.constant 0 : i32
    %c0_i32_1 = arith.constant 0 : i32
    return %c0_i32, %c0_i32_0 : i32, i32
  }
  func.func @transform_13(%arg0: i32) -> (i32, i32) {
    %c0_i32 = arith.constant 0 : i32
    %c0_i32_0 = arith.constant 0 : i32
    %c0_i32_1 = arith.constant 0 : i32
    return %c0_i32, %c0_i32_0 : i32, i32
  }
  func.func @transform_14(%arg0: i32) -> (i32, i32) {
    %c0_i32 = arith.constant 0 : i32
    %c0_i32_0 = arith.constant 0 : i32
    %c0_i32_1 = arith.constant 0 : i32
    return %c0_i32, %c0_i32_0 : i32, i32
  }
  func.func @transform_15(%arg0: i32) -> (i32, i32) {
    %c0_i32 = arith.constant 0 : i32
    %c0_i32_0 = arith.constant 0 : i32
    %c0_i32_1 = arith.constant 0 : i32
    return %c0_i32, %c0_i32_0 : i32, i32
  }
  func.func @transform_16(%arg0: i32) -> (i32, i32) {
    %c0_i32 = arith.constant 0 : i32
    %c0_i32_0 = arith.constant 0 : i32
    %c0_i32_1 = arith.constant 0 : i32
    return %c0_i32, %c0_i32_0 : i32, i32
  }
  func.func @transform_17(%arg0: i32) -> (i32, i32) {
    %c0_i32 = arith.constant 0 : i32
    %c0_i32_0 = arith.constant 0 : i32
    %c0_i32_1 = arith.constant 0 : i32
    return %c0_i32, %c0_i32_0 : i32, i32
  }
  func.func @transform_18(%arg0: i32) -> (i32, i32) {
    %c0_i32 = arith.constant 0 : i32
    %c0_i32_0 = arith.constant 0 : i32
    %c0_i32_1 = arith.constant 0 : i32
    return %c0_i32, %c0_i32_0 : i32, i32
  }
  func.func @transform_19(%arg0: i32) -> (i32, i32) {
    %c0_i32 = arith.constant 0 : i32
    %c0_i32_0 = arith.constant 0 : i32
    %c0_i32_1 = arith.constant 0 : i32
    return %c0_i32, %c0_i32_0 : i32, i32
  }
  func.func @transform_20(%arg0: i32) -> (i32, i32) {
    %c0_i32 = arith.constant 0 : i32
    %c0_i32_0 = arith.constant 0 : i32
    %c0_i32_1 = arith.constant 0 : i32
    return %c0_i32, %c0_i32_0 : i32, i32
  }
  func.func @transform_21(%arg0: i32) -> (i32, i32) {
    %c0_i32 = arith.constant 0 : i32
    %c0_i32_0 = arith.constant 0 : i32
    %c0_i32_1 = arith.constant 0 : i32
    return %c0_i32, %c0_i32_0 : i32, i32
  }
  func.func @transform_22(%arg0: i32) -> (i32, i32) {
    %c0_i32 = arith.constant 0 : i32
    %c0_i32_0 = arith.constant 0 : i32
    %c0_i32_1 = arith.constant 0 : i32
    return %c0_i32, %c0_i32_0 : i32, i32
  }
  func.func @transform_23(%arg0: i32) -> (i32, i32) {
    %c0_i32 = arith.constant 0 : i32
    %c0_i32_0 = arith.constant 0 : i32
    %c0_i32_1 = arith.constant 0 : i32
    return %c0_i32, %c0_i32_0 : i32, i32
  }
  func.func @transform_24(%arg0: i32) -> (i32, i32) {
    %c0_i32 = arith.constant 0 : i32
    %c0_i32_0 = arith.constant 0 : i32
    %c0_i32_1 = arith.constant 0 : i32
    return %c0_i32, %c0_i32_0 : i32, i32
  }
  func.func @transform_25(%arg0: i32) -> (i32, i32) {
    %c0_i32 = arith.constant 0 : i32
    %c0_i32_0 = arith.constant 0 : i32
    %c0_i32_1 = arith.constant 0 : i32
    return %c0_i32, %c0_i32_0 : i32, i32
  }
  func.func @transform_26(%arg0: i32) -> (i32, i32, i32) {
    %c0_i32 = arith.constant 0 : i32
    %c0_i32_0 = arith.constant 0 : i32
    %c0_i32_1 = arith.constant 0 : i32
    return %arg0, %c0_i32, %c0_i32_0 : i32, i32, i32
  }
}

</mosaic_0001>

<bundles_post_ra>
// kernel: rmdetr_forward.1
= control target key start
LH: loop header
LB: loop body
LE: loop exit
PB: predicated region body
PF: predicated region fallthrough
CT: control target
= control target key end

     0   :  { %s6650_s27 = smov 0   ;;  %s9490_s0 = inlined_call_operand.vmem [shape: f32[2,256,128], index: 0, kind: input, shape index: {}]   ;;  %s9491_s1 = inlined_call_operand.vmem [shape: bf16[128,128], index: 1, kind: input, shape index: {}]   ;;  %s9492_s2 = inlined_call_operand.vmem [shape: f32[1,128], index: 2, kind: input, shape index: {}]   ;;  %s9493_s3 = inlined_call_operand.vmem [shape: bf16[128,384], index: 3, kind: input, shape index: {}]   ;;  %s9494_s4 = inlined_call_operand.vmem [shape: f32[1,384], index: 4, kind: input, shape index: {}]   ;;  %s9495_s5 = inlined_call_operand.vmem [shape: bf16[128,128], index: 5, kind: input, shape index: {}]   ;;  %s9496_s6 = inlined_call_operand.vmem [shape: f32[1,128], index: 6, kind: input, shape index: {}]   ;;  %s9497_s7 = inlined_call_operand.vmem [shape: f32[1,128], index: 7, kind: input, shape index: {}]   ;;  %s9498_s8 = inlined_call_operand.vmem [shape: f32[1,128], index: 8, kind: input, shape index: {}]   ;;  %s9499_s9 = inlined_call_operand.vmem [shape: bf16[128,128], index: 9, kind: input, shape index: {}]   ;;  %s9500_s10 = inlined_call_operand.vmem [shape: f32[1,128], index: 10, kind: input, shape index: {}]   ;;  %s9501_s11 = inlined_call_operand.vmem [shape: bf16[128,128], index: 11, kind: input, shape index: {}]   ;;  %s9502_s12 = inlined_call_operand.vmem [shape: f32[1,128], index: 12, kind: input, shape index: {}]   ;;  %s9503_s13 = inlined_call_operand.vmem [shape: f32[1,128], index: 13, kind: input, shape index: {}]   ;;  %s9504_s14 = inlined_call_operand.vmem [shape: f32[1,128], index: 14, kind: input, shape index: {}]   ;;  %s9505_s15 = inlined_call_operand.vmem [shape: f32[8,128], index: 15, kind: input, shape index: {}]   ;;  %s9506_s16 = inlined_call_operand.vmem [shape: bf16[128,128], index: 16, kind: input, shape index: {}]   ;;  %s9507_s17 = inlined_call_operand.vmem [shape: f32[1,128], index: 17, kind: input, shape index: {}]   ;;  %s9508_s18 = inlined_call_operand.vmem [shape: bf16[128,256], index: 18, kind: input, shape index: {}]   ;;  %s9509_s19 = inlined_call_operand.vmem [shape: f32[1,256], index: 19, kind: input, shape index: {}]   ;;  %s9510_s20 = inlined_call_operand.vmem [shape: bf16[128,128], index: 20, kind: input, shape index: {}]   ;;  %s9511_s21 = inlined_call_operand.vmem [shape: f32[1,128], index: 21, kind: input, shape index: {}]   ;;  %s9512_s22 = inlined_call_operand.vmem [shape: f32[1,128], index: 22, kind: input, shape index: {}]   ;;  %s9513_s23 = inlined_call_operand.vmem [shape: f32[1,128], index: 23, kind: input, shape index: {}]   ;;  %s9514_s24 = inlined_call_operand.vmem [shape: bf16[128,128], index: 24, kind: input, shape index: {}]   ;;  %s9515_s25 = inlined_call_operand.vmem [shape: f32[1,128], index: 25, kind: input, shape index: {}]   ;;  %s9516_s26 = inlined_call_operand.vmem [shape: f32[2,8,128], index: 26, kind: output, shape index: {}]  }
   0x1   :  { %9621 = sst [smem:[#allocation49_spill]] %s9490_s0 }
   0x2   :  { %9622 = sst [smem:[#allocation50_spill]] %s9491_s1 }
   0x3   :  { %9623 = sst [smem:[#allocation51_spill]] %s9492_s2 }
   0x4   :  { %9624 = sst [smem:[#allocation52_spill]] %s9493_s3 }
   0x5   :  { %9625 = sst [smem:[#allocation53_spill]] %s9494_s4 }
   0x6   :  { %9626 = sst [smem:[#allocation54_spill]] %s9495_s5 }
   0x7   :  { %9627 = sst [smem:[#allocation55_spill]] %s9496_s6 }
   0x8   :  { %9628 = sst [smem:[#allocation56_spill]] %s9497_s7 }
   0x9   :  { %9629 = sst [smem:[#allocation57_spill]] %s9498_s8 }
   0xa   :  { %9630 = sst [smem:[#allocation58_spill]] %s9499_s9 }
   0xb   :  { %9631 = sst [smem:[#allocation59_spill]] %s9500_s10 }
   0xc LB: > { %s5279_s3 = sadd.s32 4294967295, %s6510_s27   ;;  %p5283_p0 = scmp.ge.s32.totalorder %s6510_s27, 1  ;;  %s6510_s27 = sphi %s6650_s27, %s36_s27  }
   0xd   : > { %p712_p1 = scmp.lt.s32.totalorder %s6510_s27, 3 }
   0xf   : > { %p713_p2 = pnand %p5283_p0, %p712_p1 }
  0x11   : > { %716 = sbr.rel (%p713_p2) target bundleno = 4634 (0x121a), region = 124 }
  0x18   : > { %s9632_s8 = sld [smem:[#allocation50_spill]]  ;;  %p781_p3 = scmp.lt.s32.totalorder %s5279_s3, 1  ;;  %vm6514_vm1 = vmmov 0  }
  0x19   : > { %s9633_s10 = sld [smem:[#allocation49_spill]]  ;;  %s9634_s2 = sld [smem:[#allocation52_spill]] }
  0x1a   : > { %s9817_s3 = smov (!%p781_p3, %s5279_s3), 1  ;;  %s9669_s28 = sld [smem:[#allocation53_spill]] }
  0x1b   : > { %s5400_s30 = sshll.u32 %s9817_s3, 8  ;;  %s9723_s29 = sld [smem:[#allocation54_spill]] }
  0x1c   : > { %s9738_s7 = sld [smem:[#allocation55_spill]]  ;;  %s9779_s4 = sld [smem:[#allocation58_spill]] }
  0x1d   : > { %s9806_s9 = sld [smem:[#allocation57_spill]] }
  0x1e   : > { %v6059_v0 = vld [vmem:[%s9632_s8] sm:$0xff]   ;;  %v6060_v1 = vld [vmem:[%s9632_s8 + $0x8] sm:$0xff]   ;;  %v6061_v2 = vld [vmem:[%s9632_s8 + $0x10] sm:$0xff]  }
  0x1f   : > { %5748 = vmatprep.subr.bf16.mxu0 %v6059_v0  ;;  %s6673_s6 = scalar_lea.vmem %s9633_s10, %s5400_s30  ;;  %v6062_v3 = vld [vmem:[%s9632_s8 + $0x18] sm:$0xff]   ;;  %v6063_v7 = vld [vmem:[%s9632_s8 + $0x20] sm:$0xff]   ;;  %v6064_v8 = vld [vmem:[%s9632_s8 + $0x28] sm:$0xff]   ;;  %s9635_s10 = sld [smem:[#allocation51_spill]] }
  0x20   : > { %5749 = vmatpush3.bf16.msra.mxu0 %v6059_v0  ;;  %v796_v4 = vld [vmem:[%s6673_s6] sm:$0xff]  ;;  %v797_v5 = vld [vmem:[%s6673_s6 + $0x8] sm:$0xff]  ;;  %v6065_v11 = vld [vmem:[%s9632_s8 + $0x30] sm:$0xff]   ;;  %s9807_s30 = sld [smem:[#allocation59_spill]] }
  0x21   : > { %5750 = vmatprep.subr.bf16.mxu0 %v6060_v1  ;;  %v828_v6 = vpack.c.bf16 %v797_v5, %v796_v4  ;;  %v6067_v9 = vld [vmem:[%s9634_s2 + $0x4] ss:$12 sps:$4 sm:$0xff]   ;;  %v6069_v10 = vld [vmem:[%s9634_s2] ss:$12 sps:$4 sm:$0xff]   ;;  %v6071_v12 = vld [vmem:[%s9634_s2 + $0x1c] ss:$12 sps:$4 sm:$0xff]  }
  0x22   : > { %1301 = vmatprep.subr.bf16.mxu1 %v6067_v9  ;;  %v6073_v13 = vld [vmem:[%s9634_s2 + $0x18] ss:$12 sps:$4 sm:$0xff]   ;;  %v6075_v15 = vld [vmem:[%s9634_s2 + $0x34] ss:$12 sps:$4 sm:$0xff]   ;;  %v801_v19 = vld [vmem:[%s6673_s6 + $0x28] sm:$0xff] }
  0x23   : > { %5764 = vmatprep.mubr.bf16.mxu0 %v828_v6  ;;  %1302 = vmatpush1.bf16.msra.mxu1 %v6069_v10  ;;  %v6066_v14 = vld [vmem:[%s9632_s8 + $0x38] sm:$0xff]   ;;  %v798_v16 = vld [vmem:[%s6673_s6 + $0x10] sm:$0xff]  ;;  %v800_v18 = vld [vmem:[%s6673_s6 + $0x20] sm:$0xff] }
  0x24   : > { %5751 = vmatpush3.bf16.msra.mxu0 %v6060_v1  ;;  %1303 = vmatprep.subr.bf16.mxu1 %v6071_v12  ;;  %v799_v17 = vld [vmem:[%s6673_s6 + $0x18] sm:$0xff]  ;;  %v6070_v22 = vld [vmem:[%s9634_s2 + $0x8] ss:$12 sps:$4 sm:$0xff]   ;;  %v830_v25 = vpack.c.bf16 %v801_v19, %v800_v18  ;;  %v6074_v26 = vld [vmem:[%s9634_s2 + $0x20] ss:$12 sps:$4 sm:$0xff]  }
  0x25   : > { %5752 = vmatprep.subr.bf16.mxu0 %v6061_v2  ;;  %v6077_v20 = vld [vmem:[%s9634_s2 + $0x30] ss:$12 sps:$4 sm:$0xff]   ;;  %v6079_v21 = vld [vmem:[%s9634_s2 + $0x4c] ss:$12 sps:$4 sm:$0xff]   ;;  %v829_v23 = vpack.c.bf16 %v799_v17, %v798_v16  ;;  %v6081_v24 = vld [vmem:[%s9634_s2 + $0x48] ss:$12 sps:$4 sm:$0xff]  }
  0x26   : > { %v6083_v27 = vld [vmem:[%s9634_s2 + $0x64] ss:$12 sps:$4 sm:$0xff]   ;;  %v6085_v28 = vld [vmem:[%s9634_s2 + $0x60] ss:$12 sps:$4 sm:$0xff]   ;;  %v803_v30 = vld [vmem:[%s6673_s6 + $0x38] sm:$0xff]  ;;  %v9533_v16 = vmov 0  }
  0x27   : > { %1304 = vmatpush1.bf16.msra.mxu1 %v6073_v13  ;;  %v802_v29 = vld [vmem:[%s6673_s6 + $0x30] sm:$0xff]  ;;  %v6087_v31 = vld [vmem:[%s9634_s2 + $0x7c] ss:$12 sps:$4 sm:$0xff]   ;;  %v804_v32 = vld [vmem:[%s6673_s6 + $0x40] sm:$0xff]  ;;  %1333 = vmatprep.mubr.bf16.mxu1 %v9533_v16 }
  0x28   : > { %5753 = vmatpush3.bf16.msra.mxu0 %v6061_v2  ;;  %1305 = vmatprep.subr.bf16.mxu1 %v6075_v15  ;;  %v805_v33 = vld [vmem:[%s6673_s6 + $0x48] sm:$0xff]  ;;  %v6078_v34 = vld [vmem:[%s9634_s2 + $0x38] ss:$12 sps:$4 sm:$0xff]   ;;  %v831_v36 = vpack.c.bf16 %v803_v30, %v802_v29  ;;  %v6082_v37 = vld [vmem:[%s9634_s2 + $0x50] ss:$12 sps:$4 sm:$0xff]  }
  0x29   : > { %5754 = vmatprep.subr.bf16.mxu0 %v6062_v3  ;;  %v6089_v35 = vld [vmem:[%s9634_s2 + $0x78] ss:$12 sps:$4 sm:$0xff]   ;;  %v832_v38 = vpack.c.bf16 %v805_v33, %v804_v32  ;;  %v806_v39 = vld [vmem:[%s6673_s6 + $0x50] sm:$0xff]  ;;  %v809_v42 = vld [vmem:[%s6673_s6 + $0x68] sm:$0xff] }
  0x2a   : > { %v807_v40 = vld [vmem:[%s6673_s6 + $0x58] sm:$0xff]  ;;  %v808_v41 = vld [vmem:[%s6673_s6 + $0x60] sm:$0xff]  ;;  %v6086_v43 = vld [vmem:[%s9634_s2 + $0x68] ss:$12 sps:$4 sm:$0xff]  }
  0x2b   : > { %1306 = vmatpush1.bf16.msra.mxu1 %v6077_v20  ;;  %v833_v44 = vpack.c.bf16 %v807_v40, %v806_v39  ;;  %v6090_v45 = vld [vmem:[%s9634_s2 + $0x80] ss:$12 sps:$4 sm:$0xff]   ;;  %v834_v46 = vpack.c.bf16 %v809_v42, %v808_v41  ;;  %v810_v47 = vld [vmem:[%s6673_s6 + $0x70] sm:$0xff]  ;;  %v811_v48 = vld [vmem:[%s6673_s6 + $0x78] sm:$0xff] }
  0x2c   : > { %5755 = vmatpush3.bf16.msra.mxu0 %v6062_v3  ;;  %1307 = vmatprep.subr.bf16.mxu1 %v6079_v21  ;;  %v812_v49 = vld [vmem:[%s6673_s6 + $0x80] sm:$0xff]  ;;  %v813_v50 = vld [vmem:[%s6673_s6 + $0x88] sm:$0xff]  ;;  %v835_v51 = vpack.c.bf16 %v811_v48, %v810_v47  ;;  %v814_v53 = vld [vmem:[%s6673_s6 + $0x90] sm:$0xff] }
  0x2d   : > { %5756 = vmatprep.subr.bf16.mxu0 %v6063_v7  ;;  %v836_v52 = vpack.c.bf16 %v813_v50, %v812_v49  ;;  %v815_v54 = vld [vmem:[%s6673_s6 + $0x98] sm:$0xff]  ;;  %v816_v55 = vld [vmem:[%s6673_s6 + $0xa0] sm:$0xff]  ;;  %v817_v56 = vld [vmem:[%s6673_s6 + $0xa8] sm:$0xff] }
  0x2e   : > { %v837_v57 = vpack.c.bf16 %v815_v54, %v814_v53  ;;  %v838_v58 = vpack.c.bf16 %v817_v56, %v816_v55  ;;  %v818_v59 = vld [vmem:[%s6673_s6 + $0xb0] sm:$0xff]  ;;  %v819_v60 = vld [vmem:[%s6673_s6 + $0xb8] sm:$0xff]  ;;  %v820_v61 = vld [vmem:[%s6673_s6 + $0xc0] sm:$0xff] }
  0x2f   : > { %1308 = vmatpush1.bf16.msra.mxu1 %v6081_v24  ;;  %v821_v62 = vld [vmem:[%s6673_s6 + $0xc8] sm:$0xff]  ;;  %v839_v63 = vpack.c.bf16 %v819_v60, %v818_v59  ;;  %v822_v1 = vld [vmem:[%s6673_s6 + $0xd0] sm:$0xff]  ;;  %v823_v2 = vld [vmem:[%s6673_s6 + $0xd8] sm:$0xff] }
  0x30   : > { %5757 = vmatpush3.bf16.msra.mxu0 %v6063_v7  ;;  %1309 = vmatprep.subr.bf16.mxu1 %v6083_v27  ;;  %v840_v0 = vpack.c.bf16 %v821_v62, %v820_v61  ;;  %v824_v3 = vld [vmem:[%s6673_s6 + $0xe0] sm:$0xff]  ;;  %v825_v4 = vld [vmem:[%s6673_s6 + $0xe8] sm:$0xff]  ;;  %v841_v5 = vpack.c.bf16 %v823_v2, %v822_v1  ;;  %v826_v7 = vld [vmem:[%s6673_s6 + $0xf0] sm:$0xff] }
  0x31   : > { %5758 = vmatprep.subr.bf16.mxu0 %v6064_v8  ;;  %v842_v6 = vpack.c.bf16 %v825_v4, %v824_v3  ;;  %v6091_v10 = vld [vmem:[%s9634_s2 + $0x94] ss:$12 sps:$4 sm:$0xff]   ;;  %v6094_v12 = vld [vmem:[%s9634_s2 + $0x98] ss:$12 sps:$4 sm:$0xff]   ;;  %v6098_v15 = vld [vmem:[%s9634_s2 + $0xb0] ss:$12 sps:$4 sm:$0xff]  }
  0x32   : > { %v6095_v13 = vld [vmem:[%s9634_s2 + $0xac] ss:$12 sps:$4 sm:$0xff]   ;;  %v6798_v17 = vld [vmem:[%s9635_s10] ss:$0 sm:$0xff] }
  0x33   : > { %1310 = vmatpush1.bf16.msra.mxu1 %v6085_v28 }
  0x34   : > { %5759 = vmatpush3.bf16.msra.mxu0 %v6064_v8  ;;  %1311 = vmatprep.subr.bf16.mxu1 %v6087_v31  ;;  %v827_v8 = vld [vmem:[%s6673_s6 + $0xf8] sm:$0xff] }
  0x35   : > { %5760 = vmatprep.subr.bf16.mxu0 %v6065_v11  ;;  %v843_v9 = vpack.c.bf16 %v827_v8, %v826_v7 }
  0x37   : > { %1312 = vmatpush1.bf16.msra.mxu1 %v6089_v35 }
  0x38   : > { %5761 = vmatpush3.bf16.msra.mxu0 %v6065_v11  ;;  %v6093_v11 = vld [vmem:[%s9634_s2 + $0x90] ss:$12 sps:$4 sm:$0xff]   ;;  %1313 = vmatprep.subr.bf16.mxu1 %v6091_v10 }
  0x39   : > { %5762 = vmatprep.subr.bf16.mxu0 %v6066_v14 }
  0x3b   : > { %1314 = vmatpush1.bf16.msra.mxu1 %v6093_v11 }
  0x3c   : > { %5763 = vmatpush3.bf16.msra.mxu0 %v6066_v14  ;;  %v6097_v14 = vld [vmem:[%s9634_s2 + $0xa8] ss:$12 sps:$4 sm:$0xff]   ;;  %1315 = vmatprep.subr.bf16.mxu1 %v6095_v13 }
  0x3d   : > { %5796 = vmatprep.subr.bf16.mxu0 %v6070_v22 }
  0x3f   : > { %5765 = vmatmul.mubr.bf16.vlgmr.msra.gmra.mrb[0].mxu0 %v829_v23  ;;  %1316 = vmatpush1.bf16.msra.mxu1 %v6097_v14 }
  0x40   : > { %5768 = vmatprep.mubr.bf16.mxu0 %v830_v25  ;;  %5797 = vmatpush3.bf16.msra.mxu0 %v6070_v22 }
  0x41   : > { %5798 = vmatprep.subr.bf16.mxu0 %v6074_v26 }
  0x44   : > { %5799 = vmatpush3.bf16.msra.mxu0 %v6074_v26 }
  0x45   : > { %5800 = vmatprep.subr.bf16.mxu0 %v6078_v34 }
  0x47   : > { %5769 = vmatmul.mubr.bf16.gmra.mrb[4].mxu0 %v831_v36 }
  0x48   : > { %5772 = vmatprep.mubr.bf16.mxu0 %v832_v38  ;;  %5801 = vmatpush3.bf16.msra.mxu0 %v6078_v34 }
  0x49   : > { %5802 = vmatprep.subr.bf16.mxu0 %v6082_v37 }
  0x4c   : > { %5803 = vmatpush3.bf16.msra.mxu0 %v6082_v37 }
  0x4d   : > { %5804 = vmatprep.subr.bf16.mxu0 %v6086_v43 }
  0x4f   : > { %5773 = vmatmul.mubr.bf16.gmra.mrb[8].mxu0 %v833_v44 }
  0x50   : > { %5776 = vmatprep.mubr.bf16.mxu0 %v834_v46  ;;  %5805 = vmatpush3.bf16.msra.mxu0 %v6086_v43 }
  0x51   : > { %5806 = vmatprep.subr.bf16.mxu0 %v6090_v45 }
  0x54   : > { %5807 = vmatpush3.bf16.msra.mxu0 %v6090_v45 }
  0x55   : > { %5808 = vmatprep.subr.bf16.mxu0 %v6094_v12 }
  0x57   : > { %5777 = vmatmul.mubr.bf16.gmra.mrb[12].mxu0 %v835_v51 }
  0x58   : > { %5780 = vmatprep.mubr.bf16.mxu0 %v836_v52  ;;  %5809 = vmatpush3.bf16.msra.mxu0 %v6094_v12 }
  0x59   : > { %5810 = vmatprep.subr.bf16.mxu0 %v6098_v15 }
  0x5c   : > { %5811 = vmatpush3.bf16.msra.mxu0 %v6098_v15 }
  0x5f   : > { %5781 = vmatmul.mubr.bf16.gmra.mrb[16].mxu0 %v837_v57 }
  0x60   : > { %5784 = vmatprep.mubr.bf16.mxu0 %v838_v58 }
  0x67   : > { %5785 = vmatmul.mubr.bf16.gmra.mrb[20].mxu0 %v839_v63 }
  0x68   : > { %5788 = vmatprep.mubr.bf16.mxu0 %v840_v0 }
  0x6f   : > { %5789 = vmatmul.mubr.bf16.gmra.mrb[24].mxu0 %v841_v5 }
  0x70   : > { %5792 = vmatprep.mubr.bf16.mxu0 %v842_v6 }
  0x77   : > { %5793 = vmatmul.mubr.bf16.gmra.mrb[28].mxu0 %v843_v9 }
 0x112   : > { %v5766_v18 = vpop.f32.mrb[0].mxu0 }
 0x113   : > { %v949_v19 = vpop.f32.mrb[1].mxu0  ;;  %v6804_v22 = vadd.f32 %v5766_v18, %v6798_v17 }
 0x114   : > { %v6801_v20 = vadd.f32 %v6798_v17, %v949_v19  ;;  %v5767_v21 = vpop.f32.mrb[2].mxu0 }
 0x115   : > { %9637 = vst [vmem:[#allocation3_spill] sm:$0xff] %v6804_v22  ;;  %v6807_v23 = vadd.f32 %v5767_v21, %v6798_v17  ;;  %v952_v24 = vpop.f32.mrb[3].mxu0  ;;  %v9555_v29 = vmax.f32 %v6804_v22, 0.0 }
 0x116   : > { %9636 = vst [vmem:[#allocation2_spill] sm:$0xff] %v6801_v20  ;;  %v6810_v25 = vadd.f32 %v6798_v17, %v952_v24  ;;  %v9557_v27 = vmax.f32 %v6801_v20, 0.0 }
 0x117   : > { %9638 = vst [vmem:[#allocation4_spill] sm:$0xff] %v6807_v23  ;;  %v9554_v26 = vmax.f32 %v6807_v23, 0.0 }
 0x118   : > { %9639 = vst [vmem:[#allocation5_spill] sm:$0xff] %v6810_v25  ;;  %v9556_v28 = vmax.f32 %v6810_v25, 0.0 }
 0x119   : > { %v1109_v32 = vpack.c.bf16 %v9554_v26, %v9555_v29 }
 0x11a   : > { %v1108_v30 = vpack.c.bf16 %v9556_v28, %v9557_v27  ;;  %v5770_v31 = vpop.f32.mrb[4].mxu0 }
 0x11b   : > { %v6825_v33 = vadd.f32 %v5770_v31, %v6798_v17  ;;  %v965_v34 = vpop.f32.mrb[5].mxu0 }
 0x11c   : > { %v6828_v35 = vadd.f32 %v6798_v17, %v965_v34  ;;  %v5771_v36 = vpop.f32.mrb[6].mxu0  ;;  %1334 = vmatmul.mubr.bf16.vlgmr.msra.gmra.mrb[0].mxu1 %v1108_v30  ;;  %5812 = vmatprep.mubr.bf16.mxu0 %v1108_v30 }
 0x11d   : > { %9640 = vst [vmem:[#allocation6_spill] sm:$0xff] %v6825_v33  ;;  %v9551_v37 = vmax.f32 %v6825_v33, 0.0  ;;  %v6832_v38 = vadd.f32 %v5771_v36, %v6798_v17  ;;  %v968_v39 = vpop.f32.mrb[7].mxu0  ;;  %5813 = vmatmul.mubr.bf16.vlgmr.msra.gmra.mrb[32].mxu0 %v1109_v32  ;;  %1343 = vmatprep.mubr.bf16.mxu1 %v9533_v16 }
 0x11e   : > { %9641 = vst [vmem:[#allocation7_spill] sm:$0xff] %v6828_v35  ;;  %v9553_v40 = vmax.f32 %v6828_v35, 0.0  ;;  %v6837_v41 = vadd.f32 %v6798_v17, %v968_v39 }
 0x11f   : > { %9642 = vst [vmem:[#allocation8_spill] sm:$0xff] %v6832_v38  ;;  %v9550_v42 = vmax.f32 %v6832_v38, 0.0 }
 0x120   : > { %9643 = vst [vmem:[#allocation9_spill] sm:$0xff] %v6837_v41  ;;  %v9552_v43 = vmax.f32 %v6837_v41, 0.0 }
 0x121   : > { %v1111_v44 = vpack.c.bf16 %v9550_v42, %v9551_v37 }
 0x122   : > { %v1110_v45 = vpack.c.bf16 %v9552_v43, %v9553_v40  ;;  %v5774_v46 = vpop.f32.mrb[8].mxu0 }
 0x123   : > { %v6850_v47 = vadd.f32 %v5774_v46, %v6798_v17  ;;  %v981_v48 = vpop.f32.mrb[9].mxu0 }
 0x124   : > { %v6853_v49 = vadd.f32 %v6798_v17, %v981_v48  ;;  %v5775_v50 = vpop.f32.mrb[10].mxu0  ;;  %1344 = vmatmul.mubr.bf16.gmra.mrb[4].mxu1 %v1109_v32  ;;  %5816 = vmatprep.mubr.bf16.mxu0 %v1110_v45 }
 0x125   : > { %9644 = vst [vmem:[#allocation10_spill] sm:$0xff] %v6850_v47  ;;  %v9547_v51 = vmax.f32 %v6850_v47, 0.0  ;;  %v6857_v52 = vadd.f32 %v5775_v50, %v6798_v17  ;;  %v984_v53 = vpop.f32.mrb[11].mxu0  ;;  %5817 = vmatmul.mubr.bf16.gmra.mrb[36].mxu0 %v1111_v44  ;;  %1353 = vmatprep.mubr.bf16.mxu1 %v9533_v16 }
 0x126   : > { %9645 = vst [vmem:[#allocation11_spill] sm:$0xff] %v6853_v49  ;;  %v9549_v54 = vmax.f32 %v6853_v49, 0.0  ;;  %v6862_v55 = vadd.f32 %v6798_v17, %v984_v53 }
 0x127   : > { %9646 = vst [vmem:[#allocation12_spill] sm:$0xff] %v6857_v52  ;;  %v9546_v56 = vmax.f32 %v6857_v52, 0.0 }
 0x128   : > { %9647 = vst [vmem:[#allocation13_spill] sm:$0xff] %v6862_v55  ;;  %v9548_v57 = vmax.f32 %v6862_v55, 0.0 }
 0x129   : > { %v1113_v58 = vpack.c.bf16 %v9546_v56, %v9547_v51 }
 0x12a   : > { %v1112_v59 = vpack.c.bf16 %v9548_v57, %v9549_v54  ;;  %v5778_v60 = vpop.f32.mrb[12].mxu0 }
 0x12b   : > { %v6875_v61 = vadd.f32 %v5778_v60, %v6798_v17  ;;  %v997_v62 = vpop.f32.mrb[13].mxu0 }
 0x12c   : > { %v6878_v63 = vadd.f32 %v6798_v17, %v997_v62  ;;  %v5779_v0 = vpop.f32.mrb[14].mxu0  ;;  %1354 = vmatmul.mubr.bf16.gmra.mrb[8].mxu1 %v1110_v45  ;;  %5820 = vmatprep.mubr.bf16.mxu0 %v1112_v59 }
 0x12d   : > { %9648 = vst [vmem:[#allocation14_spill] sm:$0xff] %v6875_v61  ;;  %v9542_v1 = vmax.f32 %v6875_v61, 0.0  ;;  %v6882_v2 = vadd.f32 %v5779_v0, %v6798_v17  ;;  %v1000_v3 = vpop.f32.mrb[15].mxu0  ;;  %5821 = vmatmul.mubr.bf16.gmra.mrb[40].mxu0 %v1113_v58  ;;  %1363 = vmatprep.mubr.bf16.mxu1 %v9533_v16 }
 0x12e   : > { %9649 = vst [vmem:[#allocation15_spill] sm:$0xff] %v6878_v63  ;;  %v9545_v4 = vmax.f32 %v6878_v63, 0.0  ;;  %v6887_v5 = vadd.f32 %v6798_v17, %v1000_v3 }
 0x12f   : > { %9650 = vst [vmem:[#allocation16_spill] sm:$0xff] %v6882_v2  ;;  %v9540_v6 = vmax.f32 %v6882_v2, 0.0 }
 0x130   : > { %9651 = vst [vmem:[#allocation17_spill] sm:$0xff] %v6887_v5  ;;  %v9544_v7 = vmax.f32 %v6887_v5, 0.0 }
 0x131   : > { %v6895_v8 = vpack.c.bf16 %v9540_v6, %v9542_v1 }
 0x132   : > { %v1114_v9 = vpack.c.bf16 %v9544_v7, %v9545_v4  ;;  %v5782_v10 = vpop.f32.mrb[16].mxu0 }
 0x133   : > { %v6902_v11 = vadd.f32 %v5782_v10, %v6798_v17  ;;  %v1013_v12 = vpop.f32.mrb[17].mxu0 }
 0x134   : > { %v6905_v13 = vadd.f32 %v6798_v17, %v1013_v12  ;;  %v5783_v14 = vpop.f32.mrb[18].mxu0  ;;  %1364 = vmatmul.mubr.bf16.gmra.mrb[12].mxu1 %v1111_v44  ;;  %5824 = vmatprep.mubr.bf16.mxu0 %v1114_v9 }
 0x135   : > { %9652 = vst [vmem:[#allocation18_spill] sm:$0xff] %v6902_v11  ;;  %v9526_v15 = vmax.f32 %v6902_v11, 0.0  ;;  %v6909_v18 = vadd.f32 %v5783_v14, %v6798_v17  ;;  %v1016_v19 = vpop.f32.mrb[19].mxu0  ;;  %5825 = vmatmul.mubr.bf16.gmra.mrb[44].mxu0 %v6895_v8  ;;  %1373 = vmatprep.mubr.bf16.mxu1 %v9533_v16 }
 0x136   : > { %9653 = vst [vmem:[#allocation19_spill] sm:$0xff] %v6905_v13  ;;  %v9528_v21 = vmax.f32 %v6905_v13, 0.0  ;;  %v6915_v24 = vadd.f32 %v6798_v17, %v1016_v19 }
 0x137   : > { %9654 = vst [vmem:[#allocation20_spill] sm:$0xff] %v6909_v18  ;;  %v9525_v30 = vmax.f32 %v6909_v18, 0.0 }
 0x138   : > { %9655 = vst [vmem:[#allocation21_spill] sm:$0xff] %v6915_v24  ;;  %v9527_v31 = vmax.f32 %v6915_v24, 0.0 }
 0x139   : > { %v1117_v32 = vpack.c.bf16 %v9525_v30, %v9526_v15 }
 0x13a   : > { %v1116_v34 = vpack.c.bf16 %v9527_v31, %v9528_v21  ;;  %v5786_v36 = vpop.f32.mrb[20].mxu0 }
 0x13b   : > { %v6928_v39 = vadd.f32 %v5786_v36, %v6798_v17  ;;  %v1029_v44 = vpop.f32.mrb[21].mxu0 }
 0x13c   : > { %v6931_v45 = vadd.f32 %v6798_v17, %v1029_v44  ;;  %v5787_v46 = vpop.f32.mrb[22].mxu0  ;;  %1374 = vmatmul.mubr.bf16.gmra.mrb[16].mxu1 %v1112_v59  ;;  %5828 = vmatprep.mubr.bf16.mxu0 %v1116_v34 }
 0x13d   : > { %9656 = vst [vmem:[#allocation22_spill] sm:$0xff] %v6928_v39  ;;  %v9524_v48 = vmax.f32 %v6928_v39, 0.0  ;;  %v6935_v50 = vadd.f32 %v5787_v46, %v6798_v17  ;;  %v1032_v53 = vpop.f32.mrb[23].mxu0  ;;  %5829 = vmatmul.mubr.bf16.gmra.mrb[48].mxu0 %v1117_v32  ;;  %1383 = vmatprep.mubr.bf16.mxu1 %v9533_v16 }
 0x13e   : > { %9657 = vst [vmem:[#allocation23_spill] sm:$0xff] %v6931_v45  ;;  %v9523_v60 = vmax.f32 %v6931_v45, 0.0  ;;  %v6940_v62 = vadd.f32 %v6798_v17, %v1032_v53 }
 0x13f   : > { %9658 = vst [vmem:[#allocation24_spill] sm:$0xff] %v6935_v50  ;;  %v9521_v0 = vmax.f32 %v6935_v50, 0.0 }
 0x140   : > { %9659 = vst [vmem:[#allocation25_spill] sm:$0xff] %v6940_v62  ;;  %v9522_v3 = vmax.f32 %v6940_v62, 0.0 }
 0x141   : > { %v1119_v59 = vpack.c.bf16 %v9521_v0, %v9524_v48 }
 0x142   : > { %v1118_v10 = vpack.c.bf16 %v9522_v3, %v9523_v60  ;;  %v5790_v12 = vpop.f32.mrb[24].mxu0 }
 0x143   : > { %v6953_v14 = vadd.f32 %v5790_v12, %v6798_v17  ;;  %v1045_v19 = vpop.f32.mrb[25].mxu0 }
 0x144   : > { %v6956_v36 = vadd.f32 %v6798_v17, %v1045_v19  ;;  %v5791_v44 = vpop.f32.mrb[26].mxu0  ;;  %1384 = vmatmul.mubr.bf16.gmra.mrb[20].mxu1 %v1113_v58  ;;  %5832 = vmatprep.mubr.bf16.mxu0 %v1118_v10 }
 0x145   : > { %9660 = vst [vmem:[#allocation26_spill] sm:$0xff] %v6953_v14  ;;  %v9530_v46 = vmax.f32 %v6953_v14, 0.0  ;;  %v6960_v53 = vadd.f32 %v5791_v44, %v6798_v17  ;;  %v1048_v0 = vpop.f32.mrb[27].mxu0  ;;  %5833 = vmatmul.mubr.bf16.gmra.mrb[52].mxu0 %v1119_v59  ;;  %1393 = vmatprep.mubr.bf16.mxu1 %v9533_v16 }
 0x146   : > { %9661 = vst [vmem:[#allocation27_spill] sm:$0xff] %v6956_v36  ;;  %v9532_v3 = vmax.f32 %v6956_v36, 0.0  ;;  %v6965_v12 = vadd.f32 %v6798_v17, %v1048_v0 }
 0x147   : > { %9662 = vst [vmem:[#allocation28_spill] sm:$0xff] %v6960_v53  ;;  %v9529_v19 = vmax.f32 %v6960_v53, 0.0 }
 0x148   : > { %9663 = vst [vmem:[#allocation29_spill] sm:$0xff] %v6965_v12  ;;  %v9531_v60 = vmax.f32 %v6965_v12, 0.0 }
 0x149   : > { %v1121_v58 = vpack.c.bf16 %v9529_v19, %v9530_v46 }
 0x14a   : > { %v1120_v44 = vpack.c.bf16 %v9531_v60, %v9532_v3  ;;  %v5794_v48 = vpop.f32.mrb[28].mxu0 }
 0x14b   : > { %v6978_v30 = vadd.f32 %v5794_v48, %v6798_v17  ;;  %v1061_v0 = vpop.f32.mrb[29].mxu0 }
 0x14c   : > { %v6981_v15 = vadd.f32 %v6798_v17, %v1061_v0  ;;  %v5795_v31 = vpop.f32.mrb[30].mxu0  ;;  %1394 = vmatmul.mubr.bf16.gmra.mrb[24].mxu1 %v1114_v9  ;;  %5836 = vmatprep.mubr.bf16.mxu0 %v1120_v44 }
 0x14d   : > { %9664 = vst [vmem:[#allocation30_spill] sm:$0xff] %v6978_v30  ;;  %v9536_v21 = vmax.f32 %v6978_v30, 0.0  ;;  %v6985_v19 = vadd.f32 %v5795_v31, %v6798_v17  ;;  %v1064_v46 = vpop.f32.mrb[31].mxu0  ;;  %5837 = vmatmul.mubr.bf16.gmra.mrb[56].mxu0 %v1121_v58  ;;  %1403 = vmatprep.mubr.bf16.mxu1 %v9533_v16 }
 0x14e   : > { %9665 = vst [vmem:[#allocation31_spill] sm:$0xff] %v6981_v15  ;;  %v9538_v60 = vmax.f32 %v6981_v15, 0.0  ;;  %v6990_v48 = vadd.f32 %v6798_v17, %v1064_v46  ;;  %v9539_v17 = vlaneseq }
 0x14f   : > { %9666 = vst [vmem:[#allocation32_spill] sm:$0xff] %v6985_v19  ;;  %v9535_v0 = vmax.f32 %v6985_v19, 0.0 }
 0x150   : > { %9667 = vst [vmem:[#allocation33_spill] sm:$0xff] %v6990_v48  ;;  %v9537_v3 = vmax.f32 %v6990_v48, 0.0 }
 0x151   : > { %v1123_v9 = vpack.c.bf16 %v9535_v0, %v9536_v21 }
 0x152   : > { %v1122_v31 = vpack.c.bf16 %v9537_v3, %v9538_v60 }
 0x154   : > { %1404 = vmatmul.mubr.bf16.gmra.mrb[28].mxu1 %v6895_v8  ;;  %5840 = vmatprep.mubr.bf16.mxu0 %v1122_v31  ;;  %v7012_v8 = vshrl.u32 %v9539_v17, 7 }
 0x155   : > { %5841 = vmatmul.mubr.bf16.gmra.mrb[60].mxu0 %v1123_v9  ;;  %1413 = vmatprep.mubr.bf16.mxu1 %v9533_v16 }
 0x156   : > { %9668 = vst [vmem:[#allocation34_spill] sm:$0xff] %v7012_v8 }
 0x15c   : > { %1414 = vmatmul.mubr.bf16.gmra.mrb[32].mxu1 %v1116_v34  ;;  %v1156_v34 = vld [vmem:[%s9669_s28] sm:$0x7]  ;;  %s9805_s28 = sld [smem:[#allocation56_spill]] }
 0x15d   : > { %1423 = vmatprep.mubr.bf16.mxu1 %v9533_v16 }
 0x164   : > { %1424 = vmatmul.mubr.bf16.gmra.mrb[36].mxu1 %v1117_v32  ;;  %v9541_v32 = vsub.s32 0, %v7012_v8 }
 0x165   : > { %1433 = vmatprep.mubr.bf16.mxu1 %v9533_v16 }
 0x166   : > { %v7022_v46 = vrot.slane %v1156_v34, %v9541_v32 }
 0x16c   : > { %1434 = vmatmul.mubr.bf16.gmra.mrb[40].mxu1 %v1118_v10  ;;  %v1168_v10 = vsub.s32 2, %v7012_v8 }
 0x16d   : > { %1443 = vmatprep.mubr.bf16.mxu1 %v9533_v16 }
 0x174   : > { %1444 = vmatmul.mubr.bf16.gmra.mrb[44].mxu1 %v1119_v59  ;;  %v9543_v59 = vsub.s32 1, %v7012_v8 }
 0x175   : > { %1453 = vmatprep.mubr.bf16.mxu1 %v9533_v16 }
 0x17c   : > { %1454 = vmatmul.mubr.bf16.gmra.mrb[48].mxu1 %v1120_v44  ;;  %v7026_v44 = vrot.slane %v1156_v34, %v9543_v59 }
 0x17d   : > { %1463 = vmatprep.mubr.bf16.mxu1 %v9533_v16 }
 0x184   : > { %1464 = vmatmul.mubr.bf16.gmra.mrb[52].mxu1 %v1121_v58 }
 0x185   : > { %1473 = vmatprep.mubr.bf16.mxu1 %v9533_v16 }
 0x18c   : > { %1474 = vmatmul.mubr.bf16.gmra.mrb[56].mxu1 %v1122_v31 }
 0x18d   : > { %1483 = vmatprep.mubr.bf16.mxu1 %v9533_v16 }
 0x194   : > { %1484 = vmatmul.mubr.bf16.gmra.mrb[60].mxu1 %v1123_v9  ;;  %v7028_v9 = vrot.slane %v1156_v34, %v1168_v10 }
 0x1ef   : > { %v1335_v58 = vpop.f32.mrb[0].mxu1 }
 0x1f0   : > { %v1337_v31 = vpop.f32.mrb[1].mxu1  ;;  %v5814_v16 = vpop.f32.mrb[32].mxu0  ;;  %v1336_v3 = vadd.f32 %v1335_v58, %v7022_v46 }
 0x1f1   : > { %v1339_v0 = vpop.f32.mrb[2].mxu1  ;;  %v1528_v21 = vpop.f32.mrb[33].mxu0  ;;  %v7033_v32 = vadd.f32 %v1337_v31, %v7026_v44  ;;  %v7036_v1 = vadd.f32 %v5814_v16, %v7028_v9 }
 0x1f2   : > { %v1340_v60 = vadd.f32 %v1339_v0, %v7022_v46  ;;  %v1341_v17 = vpop.f32.mrb[3].mxu1  ;;  %v5815_v6 = vpop.f32.mrb[34].mxu0  ;;  %v7047_v58 = vadd.f32 %v1528_v21, %v7028_v9 }
 0x1f3   : > { %v7039_v59 = vadd.f32 %v1341_v17, %v7026_v44  ;;  %v7042_v34 = vadd.f32 %v5815_v6, %v7028_v9  ;;  %v1531_v10 = vpop.f32.mrb[35].mxu0 }
 0x1f4   : > { %v7044_v7 = vpack.c.bf16 %v1340_v60, %v1336_v3  ;;  %v7050_v0 = vadd.f32 %v1531_v10, %v7028_v9 }
 0x1f6   : > { %5465 = vmatprep.mubr.bf16.mxu0 %v7044_v7 }
 0x1f7   : > { %v1345_v6 = vpop.f32.mrb[4].mxu1 }
 0x1f8   : > { %v1347_v60 = vpop.f32.mrb[5].mxu1  ;;  %v5818_v3 = vpop.f32.mrb[36].mxu0  ;;  %v1346_v56 = vadd.f32 %v1345_v6, %v7022_v46 }
 0x1f9   : > { %v1349_v4 = vpop.f32.mrb[6].mxu1  ;;  %v7060_v21 = vadd.f32 %v5818_v3, %v7028_v9  ;;  %v1544_v10 = vpop.f32.mrb[37].mxu0  ;;  %v7068_v37 = vadd.f32 %v1347_v60, %v7026_v44 }
 0x1fa   : > { %v1350_v51 = vadd.f32 %v1349_v4, %v7022_v46  ;;  %v1351_v57 = vpop.f32.mrb[7].mxu1  ;;  %v7065_v54 = vadd.f32 %v1544_v10, %v7028_v9  ;;  %v5819_v42 = vpop.f32.mrb[38].mxu0 }
 0x1fb   : > { %v7071_v43 = vadd.f32 %v1351_v57, %v7026_v44  ;;  %v7074_v40 = vadd.f32 %v5819_v42, %v7028_v9  ;;  %v1547_v3 = vpop.f32.mrb[39].mxu0 }
 0x1fc   : > { %v7076_v26 = vpack.c.bf16 %v1350_v51, %v1346_v56  ;;  %v7079_v6 = vadd.f32 %v1547_v3, %v7028_v9 }
 0x1ff   : > { %v1355_v57 = vpop.f32.mrb[8].mxu1 }
 0x200   : > { %v1357_v29 = vpop.f32.mrb[9].mxu1  ;;  %v5822_v28 = vpop.f32.mrb[40].mxu0  ;;  %v1356_v56 = vadd.f32 %v1355_v57, %v7022_v46 }
 0x201   : > { %v1359_v42 = vpop.f32.mrb[10].mxu1  ;;  %v7088_v27 = vadd.f32 %v5822_v28, %v7028_v9  ;;  %v1560_v51 = vpop.f32.mrb[41].mxu0  ;;  %v7096_v16 = vadd.f32 %v1357_v29, %v7026_v44 }
 0x202   : > { %v1360_v3 = vadd.f32 %v1359_v42, %v7022_v46  ;;  %v1361_v31 = vpop.f32.mrb[11].mxu1  ;;  %v7093_v4 = vadd.f32 %v1560_v51, %v7028_v9  ;;  %v5823_v10 = vpop.f32.mrb[42].mxu0 }
 0x203   : > { %v7099_v60 = vadd.f32 %v1361_v31, %v7026_v44  ;;  %v7102_v17 = vadd.f32 %v5823_v10, %v7028_v9  ;;  %v1563_v28 = vpop.f32.mrb[43].mxu0 }
 0x204   : > { %v7104_v8 = vpack.c.bf16 %v1360_v3, %v1356_v56  ;;  %v7107_v57 = vadd.f32 %v1563_v28, %v7028_v9 }
 0x207   : > { %v1365_v31 = vpop.f32.mrb[12].mxu1 }
 0x208   : > { %v1367_v19 = vpop.f32.mrb[13].mxu1  ;;  %v5826_v30 = vpop.f32.mrb[44].mxu0  ;;  %v1366_v3 = vadd.f32 %v1365_v31, %v7022_v46 }
 0x209   : > { %v1369_v10 = vpop.f32.mrb[14].mxu1  ;;  %v7116_v48 = vadd.f32 %v5826_v30, %v7028_v9  ;;  %v1576_v56 = vpop.f32.mrb[45].mxu0  ;;  %v7124_v53 = vadd.f32 %v1367_v19, %v7026_v44 }
 0x20a   : > { %v1370_v28 = vadd.f32 %v1369_v10, %v7022_v46  ;;  %v1371_v15 = vpop.f32.mrb[15].mxu1  ;;  %v7121_v42 = vadd.f32 %v1576_v56, %v7028_v9  ;;  %v5827_v51 = vpop.f32.mrb[46].mxu0 }
 0x20b   : > { %v7127_v29 = vadd.f32 %v1371_v15, %v7026_v44  ;;  %v7130_v14 = vadd.f32 %v5827_v51, %v7028_v9  ;;  %v1579_v30 = vpop.f32.mrb[47].mxu0 }
 0x20c   : > { %v7132_v12 = vpack.c.bf16 %v1370_v28, %v1366_v3  ;;  %v7135_v31 = vadd.f32 %v1579_v30, %v7028_v9 }
 0x20f   : > { %v1375_v15 = vpop.f32.mrb[16].mxu1 }
 0x210   : > { %v1377_v36 = vpop.f32.mrb[17].mxu1  ;;  %v5830_v62 = vpop.f32.mrb[48].mxu0  ;;  %v1376_v28 = vadd.f32 %v1375_v15, %v7022_v46 }
 0x211   : > { %v1601_v51 = vadd.f32 %v5830_v62, %v7028_v9  ;;  %v1379_v45 = vpop.f32.mrb[18].mxu1  ;;  %v1592_v3 = vpop.f32.mrb[49].mxu0  ;;  %v7148_v56 = vadd.f32 %v1377_v36, %v7026_v44 }
 0x212   : > { %v1380_v30 = vadd.f32 %v1379_v45, %v7022_v46  ;;  %v1593_v50 = vadd.f32 %v1592_v3, %v7028_v9  ;;  %v1381_v10 = vpop.f32.mrb[19].mxu1  ;;  %v5831_v39 = vpop.f32.mrb[50].mxu0 }
 0x213   : > { %v7151_v19 = vadd.f32 %v1381_v10, %v7026_v44  ;;  %v1604_v18 = vadd.f32 %v5831_v39, %v7028_v9  ;;  %v1595_v11 = vpop.f32.mrb[51].mxu0  ;;  %v9670_v39 = vpack.c.bf16 %v7050_v0, %v7047_v58 }
 0x214   : > { %v7154_v62 = vpack.c.bf16 %v1380_v30, %v1376_v28  ;;  %v1596_v24 = vadd.f32 %v1595_v11, %v7028_v9 }
 0x215   : > { %v2465_v15 = vpack.c.bf16 %v1604_v18, %v1601_v51 }
 0x216   : > { %v2464_v3 = vpack.c.bf16 %v1596_v24, %v1593_v50 }
 0x217   : > { %v1385_v13 = vpop.f32.mrb[20].mxu1 }
 0x218   : > { %v1387_v2 = vpop.f32.mrb[21].mxu1  ;;  %v5834_v61 = vpop.f32.mrb[52].mxu0  ;;  %5497 = vmatprep.subr.bf16.mxu1 %v2464_v3  ;;  %v1386_v28 = vadd.f32 %v1385_v13, %v7022_v46 }
 0x219   : > { %v1617_v36 = vadd.f32 %v5834_v61, %v7028_v9  ;;  %v1389_v10 = vpop.f32.mrb[22].mxu1  ;;  %v1608_v5 = vpop.f32.mrb[53].mxu0  ;;  %5498 = vmatpush3.bf16.msra.mxu1 %v9670_v39  ;;  %v7167_v50 = vadd.f32 %v1387_v2, %v7026_v44 }
 0x21a   : > { %v1390_v11 = vadd.f32 %v1389_v10, %v7022_v46  ;;  %v1609_v30 = vadd.f32 %v1608_v5, %v7028_v9  ;;  %v1391_v18 = vpop.f32.mrb[23].mxu1  ;;  %v5835_v24 = vpop.f32.mrb[54].mxu0  ;;  %5499 = vmatprep.subr.bf16.mxu1 %v2465_v15  ;;  %v9671_v15 = vpack.c.bf16 %v7042_v34, %v7036_v1 }
 0x21b   : > { %v7170_v61 = vadd.f32 %v1391_v18, %v7026_v44  ;;  %v1620_v51 = vadd.f32 %v5835_v24, %v7028_v9  ;;  %v1611_v3 = vpop.f32.mrb[55].mxu0 }
 0x21c   : > { %v7173_v58 = vpack.c.bf16 %v1390_v11, %v1386_v28  ;;  %v1612_v13 = vadd.f32 %v1611_v3, %v7028_v9  ;;  %v9672_v11 = vpack.c.bf16 %v7079_v6, %v7065_v54 }
 0x21d   : > { %v1676_v0 = vpack.c.bf16 %v7170_v61, %v7167_v50  ;;  %v2467_v5 = vpack.c.bf16 %v1620_v51, %v1617_v36  ;;  %5500 = vmatpush3.bf16.msra.mxu1 %v9671_v15 }
 0x21e   : > { %v2466_v2 = vpack.c.bf16 %v1612_v13, %v1609_v30 }
 0x21f   : > { %v1395_v10 = vpop.f32.mrb[24].mxu1 }
 0x220   : > { %v1397_v39 = vpop.f32.mrb[25].mxu1  ;;  %v5838_v18 = vpop.f32.mrb[56].mxu0  ;;  %5501 = vmatprep.subr.bf16.mxu1 %v2466_v2  ;;  %v1396_v3 = vadd.f32 %v1395_v10, %v7022_v46 }
 0x221   : > { %v1633_v24 = vadd.f32 %v5838_v18, %v7028_v9  ;;  %v1399_v45 = vpop.f32.mrb[26].mxu1  ;;  %v1624_v28 = vpop.f32.mrb[57].mxu0  ;;  %5502 = vmatpush3.bf16.msra.mxu1 %v9672_v11  ;;  %v7189_v51 = vadd.f32 %v1397_v39, %v7026_v44 }
 0x222   : > { %v1400_v36 = vadd.f32 %v1399_v45, %v7022_v46  ;;  %v1625_v1 = vadd.f32 %v1624_v28, %v7028_v9  ;;  %v1401_v34 = vpop.f32.mrb[27].mxu1  ;;  %v5839_v30 = vpop.f32.mrb[58].mxu0  ;;  %5503 = vmatprep.subr.bf16.mxu1 %v2467_v5  ;;  %v9673_v5 = vpack.c.bf16 %v7074_v40, %v7060_v21 }
 0x223   : > { %v7192_v13 = vadd.f32 %v1401_v34, %v7026_v44  ;;  %v1636_v15 = vadd.f32 %v5839_v30, %v7028_v9  ;;  %v1627_v2 = vpop.f32.mrb[59].mxu0 }
 0x224   : > { %v7195_v54 = vpack.c.bf16 %v1400_v36, %v1396_v3  ;;  %v1628_v6 = vadd.f32 %v1627_v2, %v7028_v9  ;;  %v9674_v36 = vpack.c.bf16 %v7107_v57, %v7093_v4 }
 0x225   : > { %v1677_v45 = vpack.c.bf16 %v7192_v13, %v7189_v51  ;;  %v2469_v10 = vpack.c.bf16 %v1636_v15, %v1633_v24  ;;  %5504 = vmatpush3.bf16.msra.mxu1 %v9673_v5 }
 0x226   : > { %v2468_v39 = vpack.c.bf16 %v1628_v6, %v1625_v1 }
 0x227   : > { %v1405_v18 = vpop.f32.mrb[28].mxu1 }
 0x228   : > { %v1407_v28 = vpop.f32.mrb[29].mxu1  ;;  %v5842_v11 = vpop.f32.mrb[60].mxu0  ;;  %5505 = vmatprep.subr.bf16.mxu1 %v2468_v39  ;;  %v1406_v2 = vadd.f32 %v1405_v18, %v7022_v46 }
 0x229   : > { %v1649_v34 = vadd.f32 %v5842_v11, %v7028_v9  ;;  %v1409_v30 = vpop.f32.mrb[30].mxu1  ;;  %v1640_v3 = vpop.f32.mrb[61].mxu0  ;;  %5506 = vmatpush3.bf16.msra.mxu1 %v9674_v36  ;;  %v7211_v15 = vadd.f32 %v1407_v28, %v7026_v44 }
 0x22a   : > { %v1410_v24 = vadd.f32 %v1409_v30, %v7022_v46  ;;  %v1641_v40 = vadd.f32 %v1640_v3, %v7028_v9  ;;  %v1411_v21 = vpop.f32.mrb[31].mxu1  ;;  %v5843_v1 = vpop.f32.mrb[62].mxu0  ;;  %5507 = vmatprep.subr.bf16.mxu1 %v2469_v10  ;;  %v9675_v10 = vpack.c.bf16 %v7102_v17, %v7088_v27 }
 0x22b   : > { %v7214_v6 = vadd.f32 %v1411_v21, %v7026_v44  ;;  %v1652_v5 = vadd.f32 %v5843_v1, %v7028_v9  ;;  %v1643_v39 = vpop.f32.mrb[63].mxu0  ;;  %v9676_v21 = vpack.c.bf16 %v7135_v31, %v7121_v42  ;;  %v9677_v1 = vpack.c.bf16 %v7130_v14, %v7116_v48 }
 0x22c   : > { %v7217_v4 = vpack.c.bf16 %v1410_v24, %v1406_v2  ;;  %v1644_v57 = vadd.f32 %v1643_v39, %v7028_v9  ;;  %v9678_v31 = vpack.c.bf16 %v7039_v59, %v7033_v32  ;;  %v9679_v32 = vpack.c.bf16 %v7071_v43, %v7068_v37 }
 0x22d   : > { %v1678_v18 = vpack.c.bf16 %v7214_v6, %v7211_v15  ;;  %v2471_v11 = vpack.c.bf16 %v1652_v5, %v1649_v34  ;;  %5508 = vmatpush3.bf16.msra.mxu1 %v9675_v10  ;;  %v9680_v37 = vpack.c.bf16 %v7099_v60, %v7096_v16  ;;  %v9681_v16 = vpack.c.bf16 %v7127_v29, %v7124_v53 }
 0x22e   : > { %v2470_v28 = vpack.c.bf16 %v1644_v57, %v1641_v40  ;;  %v9682_v53 = vpack.c.bf16 %v7151_v19, %v7148_v56 }
 0x22f   : > { %v1415_v30 = vpop.f32.mrb[32].mxu1 }
 0x230   : > { %v1417_v3 = vpop.f32.mrb[33].mxu1  ;;  %5509 = vmatprep.subr.bf16.mxu1 %v2470_v28  ;;  %v1416_v2 = vadd.f32 %v1415_v30, %v7022_v46 }
 0x231   : > { %v1419_v36 = vpop.f32.mrb[34].mxu1  ;;  %5510 = vmatpush3.bf16.msra.mxu1 %v9676_v21  ;;  %v1418_v34 = vadd.f32 %v1417_v3, %v7026_v44 }
 0x232   : > { %v1420_v9 = vadd.f32 %v1419_v36, %v7022_v46  ;;  %v1421_v24 = vpop.f32.mrb[35].mxu1  ;;  %5511 = vmatprep.subr.bf16.mxu1 %v2471_v11 }
 0x233   : > { %v1422_v27 = vadd.f32 %v1421_v24, %v7026_v44 }
 0x234   : > { %v7232_v17 = vpack.c.bf16 %v1420_v9, %v1416_v2 }
 0x235   : > { %v1679_v40 = vpack.c.bf16 %v1422_v27, %v1418_v34  ;;  %5512 = vmatpush3.bf16.msra.mxu1 %v9677_v1 }
 0x237   : > { %v1425_v5 = vpop.f32.mrb[36].mxu1  ;;  %5449 = vmatprep.subr.bf16.mxu0 %v1679_v40 }
 0x238   : > { %v1427_v42 = vpop.f32.mrb[37].mxu1  ;;  %5450 = vmatpush3.bf16.xpose.msra.mxu0 %v9678_v31  ;;  %v1426_v57 = vadd.f32 %v1425_v5, %v7022_v46 }
 0x239   : > { %v1429_v39 = vpop.f32.mrb[38].mxu1  ;;  %v1428_v28 = vadd.f32 %v1427_v42, %v7026_v44 }
 0x23a   : > { %v1430_v11 = vadd.f32 %v1429_v39, %v7022_v46  ;;  %v1431_v10 = vpop.f32.mrb[39].mxu1 }
 0x23b   : > { %v1432_v30 = vadd.f32 %v1431_v10, %v7026_v44 }
 0x23c   : > { %v7244_v3 = vpack.c.bf16 %v1430_v11, %v1426_v57 }
 0x23d   : > { %v1680_v14 = vpack.c.bf16 %v1432_v30, %v1428_v28 }
 0x23f   : > { %v1435_v48 = vpop.f32.mrb[40].mxu1  ;;  %5451 = vmatprep.subr.bf16.mxu0 %v1680_v14 }
 0x240   : > { %v1437_v36 = vpop.f32.mrb[41].mxu1  ;;  %5452 = vmatpush3.bf16.xpose.msra.mxu0 %v9679_v32  ;;  %v1436_v21 = vadd.f32 %v1435_v48, %v7022_v46 }
 0x241   : > { %v1439_v59 = vpop.f32.mrb[42].mxu1  ;;  %v1438_v24 = vadd.f32 %v1437_v36, %v7026_v44 }
 0x242   : > { %v1440_v2 = vadd.f32 %v1439_v59, %v7022_v46  ;;  %v1441_v9 = vpop.f32.mrb[43].mxu1 }
 0x243   : > { %v1442_v34 = vadd.f32 %v1441_v9, %v7026_v44 }
 0x244   : > { %v7253_v27 = vpack.c.bf16 %v1440_v2, %v1436_v21 }
 0x245   : > { %v1681_v40 = vpack.c.bf16 %v1442_v34, %v1438_v24 }
 0x247   : > { %v1445_v1 = vpop.f32.mrb[44].mxu1  ;;  %5453 = vmatprep.subr.bf16.mxu0 %v1681_v40 }
 0x248   : > { %v1447_v5 = vpop.f32.mrb[45].mxu1  ;;  %5454 = vmatpush3.bf16.xpose.msra.mxu0 %v9680_v37  ;;  %v1446_v42 = vadd.f32 %v1445_v1, %v7022_v46 }
 0x249   : > { %v1449_v43 = vpop.f32.mrb[46].mxu1  ;;  %v1448_v57 = vadd.f32 %v1447_v5, %v7026_v44 }
 0x24a   : > { %v1450_v31 = vadd.f32 %v1449_v43, %v7022_v46  ;;  %v1451_v39 = vpop.f32.mrb[47].mxu1 }
 0x24b   : > { %v1452_v11 = vadd.f32 %v1451_v39, %v7026_v44 }
 0x24c   : > { %v7262_v10 = vpack.c.bf16 %v1450_v31, %v1446_v42 }
 0x24d   : > { %v1682_v28 = vpack.c.bf16 %v1452_v11, %v1448_v57 }
 0x24f   : > { %v1455_v30 = vpop.f32.mrb[48].mxu1  ;;  %5455 = vmatprep.subr.bf16.mxu0 %v1682_v28 }
 0x250   : > { %v1457_v14 = vpop.f32.mrb[49].mxu1  ;;  %5456 = vmatpush3.bf16.xpose.msra.mxu0 %v9681_v16  ;;  %v1456_v48 = vadd.f32 %v1455_v30, %v7022_v46 }
 0x251   : > { %v1459_v60 = vpop.f32.mrb[50].mxu1  ;;  %v1458_v59 = vadd.f32 %v1457_v14, %v7026_v44 }
 0x252   : > { %v1460_v36 = vadd.f32 %v1459_v60, %v7022_v46  ;;  %v1461_v32 = vpop.f32.mrb[51].mxu1 }
 0x253   : > { %v1462_v21 = vadd.f32 %v1461_v32, %v7026_v44 }
 0x254   : > { %v7271_v2 = vpack.c.bf16 %v1460_v36, %v1456_v48 }
 0x255   : > { %v1683_v9 = vpack.c.bf16 %v1462_v21, %v1458_v59 }
 0x257   : > { %v1465_v24 = vpop.f32.mrb[52].mxu1  ;;  %5457 = vmatprep.subr.bf16.mxu0 %v1683_v9 }
 0x258   : > { %v1467_v34 = vpop.f32.mrb[53].mxu1  ;;  %5458 = vmatpush3.bf16.xpose.msra.mxu0 %v9682_v53  ;;  %v1466_v40 = vadd.f32 %v1465_v24, %v7022_v46 }
 0x259   : > { %v1469_v29 = vpop.f32.mrb[54].mxu1  ;;  %v1468_v37 = vadd.f32 %v1467_v34, %v7026_v44 }
 0x25a   : > { %v1470_v1 = vadd.f32 %v1469_v29, %v7022_v46  ;;  %v1471_v5 = vpop.f32.mrb[55].mxu1 }
 0x25b   : > { %v1472_v43 = vadd.f32 %v1471_v5, %v7026_v44 }
 0x25c   : > { %v1668_v42 = vpack.c.bf16 %v1470_v1, %v1466_v40 }
 0x25d   : > { %v1684_v31 = vpack.c.bf16 %v1472_v43, %v1468_v37 }
 0x25f   : > { %v1475_v39 = vpop.f32.mrb[56].mxu1  ;;  %5459 = vmatprep.subr.bf16.mxu0 %v1684_v31 }
 0x260   : > { %v1477_v57 = vpop.f32.mrb[57].mxu1  ;;  %5460 = vmatpush3.bf16.xpose.msra.mxu0 %v1676_v0  ;;  %v1476_v19 = vadd.f32 %v1475_v39, %v7022_v46 }
 0x261   : > { %v1479_v56 = vpop.f32.mrb[58].mxu1  ;;  %v1478_v30 = vadd.f32 %v1477_v57, %v7026_v44 }
 0x262   : > { %v1480_v11 = vadd.f32 %v1479_v56, %v7022_v46  ;;  %v1481_v28 = vpop.f32.mrb[59].mxu1 }
 0x263   : > { %v1482_v14 = vadd.f32 %v1481_v28, %v7026_v44 }
 0x264   : > { %v1669_v16 = vpack.c.bf16 %v1480_v11, %v1476_v19 }
 0x265   : > { %v1685_v60 = vpack.c.bf16 %v1482_v14, %v1478_v30 }
 0x267   : > { %v1485_v48 = vpop.f32.mrb[60].mxu1  ;;  %5461 = vmatprep.subr.bf16.mxu0 %v1685_v60 }
 0x268   : > { %v1487_v36 = vpop.f32.mrb[61].mxu1  ;;  %5462 = vmatpush3.bf16.xpose.msra.mxu0 %v1677_v45  ;;  %v1486_v61 = vadd.f32 %v1485_v48, %v7022_v46 }
 0x269   : > { %v1489_v50 = vpop.f32.mrb[62].mxu1  ;;  %v1488_v59 = vadd.f32 %v1487_v36, %v7026_v44 }
 0x26a   : > { %v1490_v0 = vadd.f32 %v1489_v50, %v7022_v46  ;;  %v1491_v32 = vpop.f32.mrb[63].mxu1 }
 0x26b   : > { %v1492_v21 = vadd.f32 %v1491_v32, %v7026_v44 }
 0x26c   : > { %v1670_v9 = vpack.c.bf16 %v1490_v0, %v1486_v61 }
 0x26d   : > { %v1686_v24 = vpack.c.bf16 %v1492_v21, %v1488_v59 }
 0x26f   : > { %5463 = vmatprep.subr.bf16.mxu0 %v1686_v24 }
 0x270   : > { %5464 = vmatpush3.bf16.xpose.msra.mxu0 %v1678_v18 }
 0x277   : > { %5466 = vmatmul.mubr.bf16.vlgmr.msra.gmra.mrb[64].mxu0 %v7044_v7 }
 0x278   : > { %5467 = vmatprep.mubr.bf16.mxu0 %v7076_v26 }
 0x27f   : > { %5468 = vmatmul.mubr.bf16.gmra.mrb[68].mxu0 %v7076_v26 }
 0x280   : > { %5469 = vmatprep.mubr.bf16.mxu0 %v7104_v8 }
 0x287   : > { %5470 = vmatmul.mubr.bf16.gmra.mrb[72].mxu0 %v7104_v8 }
 0x288   : > { %5471 = vmatprep.mubr.bf16.mxu0 %v7132_v12 }
 0x28f   : > { %5472 = vmatmul.mubr.bf16.gmra.mrb[76].mxu0 %v7132_v12 }
 0x290   : > { %5473 = vmatprep.mubr.bf16.mxu0 %v7154_v62 }
 0x297   : > { %5474 = vmatmul.mubr.bf16.gmra.mrb[80].mxu0 %v7154_v62 }
 0x298   : > { %5475 = vmatprep.mubr.bf16.mxu0 %v7173_v58 }
 0x29f   : > { %5476 = vmatmul.mubr.bf16.gmra.mrb[84].mxu0 %v7173_v58 }
 0x2a0   : > { %5477 = vmatprep.mubr.bf16.mxu0 %v7195_v54 }
 0x2a7   : > { %5478 = vmatmul.mubr.bf16.gmra.mrb[88].mxu0 %v7195_v54 }
 0x2a8   : > { %5479 = vmatprep.mubr.bf16.mxu0 %v7217_v4 }
 0x2af   : > { %5480 = vmatmul.mubr.bf16.gmra.mrb[92].mxu0 %v7217_v4 }
 0x2b0   : > { %5481 = vmatprep.mubr.bf16.mxu0 %v7232_v17 }
 0x2b7   : > { %5482 = vmatmul.mubr.bf16.gmra.mrb[96].mxu0 %v7232_v17 }
 0x2b8   : > { %5483 = vmatprep.mubr.bf16.mxu0 %v7244_v3 }
 0x2bf   : > { %5484 = vmatmul.mubr.bf16.gmra.mrb[100].mxu0 %v7244_v3 }
 0x2c0   : > { %5485 = vmatprep.mubr.bf16.mxu0 %v7253_v27 }
 0x2c7   : > { %5486 = vmatmul.mubr.bf16.gmra.mrb[104].mxu0 %v7253_v27 }
 0x2c8   : > { %5487 = vmatprep.mubr.bf16.mxu0 %v7262_v10 }
 0x2cf   : > { %5488 = vmatmul.mubr.bf16.gmra.mrb[108].mxu0 %v7262_v10 }
 0x2d0   : > { %5489 = vmatprep.mubr.bf16.mxu0 %v7271_v2 }
 0x2d7   : > { %5490 = vmatmul.mubr.bf16.gmra.mrb[112].mxu0 %v7271_v2 }
 0x2d8   : > { %5491 = vmatprep.mubr.bf16.mxu0 %v1668_v42 }
 0x2df   : > { %5492 = vmatmul.mubr.bf16.gmra.mrb[116].mxu0 %v1668_v42 }
 0x2e0   : > { %5493 = vmatprep.mubr.bf16.mxu0 %v1669_v16 }
 0x2e7   : > { %5494 = vmatmul.mubr.bf16.gmra.mrb[120].mxu0 %v1669_v16 }
 0x2e8   : > { %5495 = vmatprep.mubr.bf16.mxu0 %v1670_v9 }
 0x2ef   : > { %5496 = vmatmul.mubr.bf16.gmra.mrb[124].mxu0 %v1670_v9 }
 0x34a   : > { %v1721_v26 = vpop.f32.mrb[64].mxu0 }
 0x34b   : > { %v7322_v7 = vmul.f32 0.17677669, %v1721_v26  ;;  %v1723_v12 = vpop.f32.mrb[65].mxu0 }
 0x34c   : > { %v7324_v8 = vmul.f32 0.17677669, %v1723_v12  ;;  %v1725_v46 = vpop.f32.mrb[66].mxu0 }
 0x34d   : > { %v1727_v44 = vpop.f32.mrb[67].mxu0  ;;  %v7326_v62 = vmul.f32 0.17677669, %v1725_v46 }
 0x34e   : > { %v7328_v58 = vmul.f32 0.17677669, %v1727_v44  ;;  %v1944_v51 = vmax.f32 %v7322_v7, %v7324_v8 }
 0x350   : > { %1945 = vmax.xlane.f32.xlu0 %v1944_v51  ;;  %v1947_v54 = vmax.f32 %v7326_v62, %v7328_v58 }
 0x352   : > { %v1731_v13 = vpop.f32.mrb[68].mxu0 }
 0x353   : > { %v7334_v45 = vmul.f32 0.17677669, %v1731_v13  ;;  %v1733_v15 = vpop.f32.mrb[69].mxu0 }
 0x354   : > { %v7336_v6 = vmul.f32 0.17677669, %v1733_v15  ;;  %1948 = vmax.xlane.f32.xlu0 %v1947_v54  ;;  %v1735_v4 = vpop.f32.mrb[70].mxu0 }
 0x355   : > { %v1737_v18 = vpop.f32.mrb[71].mxu0  ;;  %v7338_v17 = vmul.f32 0.17677669, %v1735_v4 }
 0x356   : > { %v7340_v3 = vmul.f32 0.17677669, %v1737_v18  ;;  %v1950_v27 = vmax.f32 %v7334_v45, %v7336_v6 }
 0x358   : > { %1951 = vmax.xlane.f32.xlu1 %v1950_v27  ;;  %v1953_v2 = vmax.f32 %v7338_v17, %v7340_v3 }
 0x35a   : > { %v1741_v10 = vpop.f32.mrb[72].mxu0 }
 0x35b   : > { %v7346_v34 = vmul.f32 0.17677669, %v1741_v10  ;;  %v1743_v53 = vpop.f32.mrb[73].mxu0 }
 0x35c   : > { %v7348_v29 = vmul.f32 0.17677669, %v1743_v53  ;;  %1954 = vmax.xlane.f32.xlu1 %v1953_v2  ;;  %v1745_v40 = vpop.f32.mrb[74].mxu0 }
 0x35d   : > { %v7350_v1 = vmul.f32 0.17677669, %v1745_v40  ;;  %v1747_v5 = vpop.f32.mrb[75].mxu0 }
 0x35e   : > { %v7352_v37 = vmul.f32 0.17677669, %v1747_v5  ;;  %v1956_v43 = vmax.f32 %v7346_v34, %v7348_v29 }
 0x360   : > { %1957 = vmax.xlane.f32.xlu0 %v1956_v43  ;;  %v1959_v42 = vmax.f32 %v7350_v1, %v7352_v37 }
 0x362   : > { %1960 = vmax.xlane.f32.xlu1 %v1959_v42  ;;  %v1751_v31 = vpop.f32.mrb[76].mxu0 }
 0x363   : > { %v7358_v39 = vmul.f32 0.17677669, %v1751_v31  ;;  %v1753_v57 = vpop.f32.mrb[77].mxu0 }
 0x364   : > { %v7360_v56 = vmul.f32 0.17677669, %v1753_v57  ;;  %v1755_v19 = vpop.f32.mrb[78].mxu0 }
 0x365   : > { %v7362_v11 = vmul.f32 0.17677669, %v1755_v19  ;;  %v1757_v28 = vpop.f32.mrb[79].mxu0 }
 0x366   : > { %v7364_v30 = vmul.f32 0.17677669, %v1757_v28  ;;  %v1962_v14 = vmax.f32 %v7358_v39, %v7360_v56 }
 0x368   : > { %1963 = vmax.xlane.f32.xlu0 %v1962_v14  ;;  %v1965_v16 = vmax.f32 %v7362_v11, %v7364_v30 }
 0x36a   : > { %1966 = vmax.xlane.f32.xlu1 %v1965_v16  ;;  %v1761_v60 = vpop.f32.mrb[80].mxu0 }
 0x36b   : > { %v7370_v48 = vmul.f32 0.17677669, %v1761_v60  ;;  %v1763_v36 = vpop.f32.mrb[81].mxu0 }
 0x36c   : > { %v7372_v50 = vmul.f32 0.17677669, %v1763_v36  ;;  %v1765_v61 = vpop.f32.mrb[82].mxu0 }
 0x36d   : > { %v7374_v0 = vmul.f32 0.17677669, %v1765_v61  ;;  %v1767_v32 = vpop.f32.mrb[83].mxu0 }
 0x36e   : > { %v7376_v59 = vmul.f32 0.17677669, %v1767_v32  ;;  %v1968_v21 = vmax.f32 %v7370_v48, %v7372_v50 }
 0x370   : > { %1969 = vmax.xlane.f32.xlu0 %v1968_v21  ;;  %v1971_v9 = vmax.f32 %v7374_v0, %v7376_v59 }
 0x372   : > { %1972 = vmax.xlane.f32.xlu1 %v1971_v9  ;;  %v1771_v24 = vpop.f32.mrb[84].mxu0 }
 0x373   : > { %v7382_v26 = vmul.f32 0.17677669, %v1771_v24  ;;  %v1773_v12 = vpop.f32.mrb[85].mxu0 }
 0x374   : > { %v7384_v46 = vmul.f32 0.17677669, %v1773_v12  ;;  %v1775_v44 = vpop.f32.mrb[86].mxu0 }
 0x375   : > { %v7386_v51 = vmul.f32 0.17677669, %v1775_v44  ;;  %v1777_v13 = vpop.f32.mrb[87].mxu0 }
 0x376   : > { %v7388_v54 = vmul.f32 0.17677669, %v1777_v13  ;;  %v1974_v15 = vmax.f32 %v7382_v26, %v7384_v46 }
 0x378   : > { %1975 = vmax.xlane.f32.xlu0 %v1974_v15  ;;  %v1977_v4 = vmax.f32 %v7386_v51, %v7388_v54 }
 0x37a   : > { %1978 = vmax.xlane.f32.xlu1 %v1977_v4  ;;  %v1781_v18 = vpop.f32.mrb[88].mxu0 }
 0x37b   : > { %v7394_v27 = vmul.f32 0.17677669, %v1781_v18  ;;  %v1783_v10 = vpop.f32.mrb[89].mxu0 }
 0x37c   : > { %v7396_v2 = vmul.f32 0.17677669, %v1783_v10  ;;  %v1785_v53 = vpop.f32.mrb[90].mxu0 }
 0x37d   : > { %v7398_v40 = vmul.f32 0.17677669, %v1785_v53  ;;  %v1787_v5 = vpop.f32.mrb[91].mxu0 }
 0x37e   : > { %v7400_v43 = vmul.f32 0.17677669, %v1787_v5  ;;  %v1980_v42 = vmax.f32 %v7394_v27, %v7396_v2 }
 0x380   : > { %1981 = vmax.xlane.f32.xlu0 %v1980_v42  ;;  %v1983_v31 = vmax.f32 %v7398_v40, %v7400_v43 }
 0x382   : > { %1984 = vmax.xlane.f32.xlu1 %v1983_v31  ;;  %v1791_v57 = vpop.f32.mrb[92].mxu0 }
 0x383   : > { %v7406_v19 = vmul.f32 0.17677669, %v1791_v57  ;;  %v1793_v28 = vpop.f32.mrb[93].mxu0 }
 0x384   : > { %v7408_v14 = vmul.f32 0.17677669, %v1793_v28  ;;  %v1795_v16 = vpop.f32.mrb[94].mxu0 }
 0x385   : > { %v7410_v60 = vmul.f32 0.17677669, %v1795_v16  ;;  %v1797_v36 = vpop.f32.mrb[95].mxu0 }
 0x386   : > { %v7412_v61 = vmul.f32 0.17677669, %v1797_v36  ;;  %v1986_v32 = vmax.f32 %v7406_v19, %v7408_v14 }
 0x388   : > { %1987 = vmax.xlane.f32.xlu0 %v1986_v32  ;;  %v1989_v21 = vmax.f32 %v7410_v60, %v7412_v61 }
 0x38a   : > { %1990 = vmax.xlane.f32.xlu1 %v1989_v21  ;;  %v1801_v9 = vpop.f32.mrb[96].mxu0 }
 0x38b   : > { %v7418_v24 = vmul.f32 0.17677669, %v1801_v9  ;;  %v1803_v12 = vpop.f32.mrb[97].mxu0 }
 0x38c   : > { %v7420_v44 = vmul.f32 0.17677669, %v1803_v12  ;;  %v1805_v13 = vpop.f32.mrb[98].mxu0 }
 0x38d   : > { %v7422_v15 = vmul.f32 0.17677669, %v1805_v13  ;;  %v1807_v4 = vpop.f32.mrb[99].mxu0 }
 0x38e   : > { %v7424_v18 = vmul.f32 0.17677669, %v1807_v4  ;;  %v1992_v10 = vmax.f32 %v7418_v24, %v7420_v44 }
 0x390   : > { %9683 = vst [vmem:[#allocation35_spill] sm:$0xff] %v7424_v18  ;;  %1993 = vmax.xlane.f32.xlu0 %v1992_v10  ;;  %v1995_v53 = vmax.f32 %v7422_v15, %v7424_v18 }
 0x392   : > { %1996 = vmax.xlane.f32.xlu1 %v1995_v53  ;;  %v1811_v5 = vpop.f32.mrb[100].mxu0 }
 0x393   : > { %v7430_v42 = vmul.f32 0.17677669, %v1811_v5  ;;  %v1813_v31 = vpop.f32.mrb[101].mxu0 }
 0x394   : > { %v7432_v57 = vmul.f32 0.17677669, %v1813_v31  ;;  %v1815_v28 = vpop.f32.mrb[102].mxu0 }
 0x395   : > { %9684 = vst [vmem:[#allocation36_spill] sm:$0xff] %v7430_v42  ;;  %v7434_v16 = vmul.f32 0.17677669, %v1815_v28  ;;  %v1817_v36 = vpop.f32.mrb[103].mxu0 }
 0x396   : > { %9685 = vst [vmem:[#allocation37_spill] sm:$0xff] %v7432_v57  ;;  %v7436_v32 = vmul.f32 0.17677669, %v1817_v36  ;;  %v1998_v21 = vmax.f32 %v7430_v42, %v7432_v57 }
 0x397   : > { %9686 = vst [vmem:[#allocation38_spill] sm:$0xff] %v7434_v16 }
 0x398   : > { %9687 = vst [vmem:[#allocation39_spill] sm:$0xff] %v7436_v32  ;;  %1999 = vmax.xlane.f32.xlu0 %v1998_v21  ;;  %v2001_v9 = vmax.f32 %v7434_v16, %v7436_v32 }
 0x39a   : > { %2002 = vmax.xlane.f32.xlu1 %v2001_v9  ;;  %v1821_v12 = vpop.f32.mrb[104].mxu0 }
 0x39b   : > { %v7442_v13 = vmul.f32 0.17677669, %v1821_v12  ;;  %v1823_v4 = vpop.f32.mrb[105].mxu0 }
 0x39c   : > { %v7444_v10 = vmul.f32 0.17677669, %v1823_v4  ;;  %v1825_v53 = vpop.f32.mrb[106].mxu0 }
 0x39d   : > { %9688 = vst [vmem:[#allocation40_spill] sm:$0xff] %v7442_v13  ;;  %v7446_v5 = vmul.f32 0.17677669, %v1825_v53  ;;  %v1827_v31 = vpop.f32.mrb[107].mxu0 }
 0x39e   : > { %9689 = vst [vmem:[#allocation41_spill] sm:$0xff] %v7444_v10  ;;  %v7448_v28 = vmul.f32 0.17677669, %v1827_v31  ;;  %v2004_v36 = vmax.f32 %v7442_v13, %v7444_v10 }
 0x39f   : > { %9690 = vst [vmem:[#allocation42_spill] sm:$0xff] %v7446_v5 }
 0x3a0   : > { %9691 = vst [vmem:[#allocation43_spill] sm:$0xff] %v7448_v28  ;;  %2005 = vmax.xlane.f32.xlu0 %v2004_v36  ;;  %v2007_v21 = vmax.f32 %v7446_v5, %v7448_v28 }
 0x3a2   : > { %2008 = vmax.xlane.f32.xlu1 %v2007_v21  ;;  %v1831_v9 = vpop.f32.mrb[108].mxu0 }
 0x3a3   : > { %v7454_v12 = vmul.f32 0.17677669, %v1831_v9  ;;  %v1833_v63 = vpop.f32.mrb[109].mxu0 }
 0x3a4   : > { %v7456_v4 = vmul.f32 0.17677669, %v1833_v63  ;;  %v1835_v52 = vpop.f32.mrb[110].mxu0 }
 0x3a5   : > { %9692 = vst [vmem:[#allocation44_spill] sm:$0xff] %v7454_v12  ;;  %v7458_v53 = vmul.f32 0.17677669, %v1835_v52  ;;  %v1837_v47 = vpop.f32.mrb[111].mxu0 }
 0x3a6   : > { %9693 = vst [vmem:[#allocation45_spill] sm:$0xff] %v7456_v4  ;;  %v7460_v31 = vmul.f32 0.17677669, %v1837_v47  ;;  %v2010_v55 = vmax.f32 %v7454_v12, %v7456_v4 }
 0x3a7   : > { %9694 = vst [vmem:[#allocation46_spill] sm:$0xff] %v7458_v53 }
 0x3a8   : > { %9695 = vst [vmem:[#allocation47_spill] sm:$0xff] %v7460_v31  ;;  %2011 = vmax.xlane.f32.xlu0 %v2010_v55  ;;  %v2013_v36 = vmax.f32 %v7458_v53, %v7460_v31 }
 0x3aa   : > { %2014 = vmax.xlane.f32.xlu1 %v2013_v36  ;;  %v1841_v21 = vpop.f32.mrb[112].mxu0 }
 0x3ab   : > { %v1843_v9 = vpop.f32.mrb[113].mxu0 }
 0x3ac   : > { %v1845_v49 = vpop.f32.mrb[114].mxu0 }
 0x3ad   : > { %v1847_v38 = vpop.f32.mrb[115].mxu0 }
 0x3b2   : > { %v7466_v63 = vpop.f32.mrb[116].mxu0 }
 0x3b3   : > { %v7468_v33 = vpop.f32.mrb[117].mxu0 }
 0x3b4   : > { %v7470_v52 = vpop.f32.mrb[118].mxu0 }
 0x3b5   : > { %v7472_v47 = vpop.f32.mrb[119].mxu0 }
 0x3ba   : > { %v7474_v41 = vpop.f32.mrb[120].mxu0 }
 0x3bb   : > { %v7476_v35 = vpop.f32.mrb[121].mxu0 }
 0x3bc   : > { %v7478_v55 = vpop.f32.mrb[122].mxu0 }
 0x3bd   : > { %v7480_v23 = vpop.f32.mrb[123].mxu0 }
 0x3c2   : > { %v7482_v36 = vpop.f32.mrb[124].mxu0 }
 0x3c3   : > { %v7484_v22 = vpop.f32.mrb[125].mxu0 }
 0x3c4   : > { %v7486_v25 = vpop.f32.mrb[126].mxu0 }
 0x3c5   : > { %v7488_v20 = vpop.f32.mrb[127].mxu0 }
 0x3dd   : > { %v1946_v31 = vpop.xlane.xlu0 %1945 }
 0x3de   : > { %v2040_v53 = vsub.f32 %v7322_v7, %v1946_v31  ;;  %v2041_v4 = vsub.f32 %v7324_v8, %v1946_v31 }
 0x3e0   : > { %v2104_v12 = vmul.f32 1.442695, %v2040_v53  ;;  %v2106_v28 = vmul.f32 1.442695, %v2041_v4 }
 0x3e1   : > { %v1949_v5 = vpop.xlane.xlu0 %1948 }
 0x3e2   : > { %6171 = vpow2.f32 %v2104_v12  ;;  %v2042_v10 = vsub.f32 %v7326_v62, %v1949_v5  ;;  %v2043_v13 = vsub.f32 %v7328_v58, %v1949_v5 }
 0x3e3   : > { %6173 = vpow2.f32 %v2106_v28 }
 0x3e4   : > { %v2108_v32 = vmul.f32 1.442695, %v2042_v10  ;;  %v2110_v16 = vmul.f32 1.442695, %v2043_v13 }
 0x3e5   : > { %v1952_v57 = vpop.xlane.xlu1 %1951 }
 0x3e6   : > { %6175 = vpow2.f32 %v2108_v32  ;;  %v2044_v42 = vsub.f32 %v7334_v45, %v1952_v57  ;;  %v2045_v18 = vsub.f32 %v7336_v6, %v1952_v57  ;;  %v7502_v32 = vmul.f32 0.17677669, %v1841_v21 }
 0x3e7   : > { %6177 = vpow2.f32 %v2110_v16  ;;  %v7504_v45 = vmul.f32 0.17677669, %v1843_v9  ;;  %v7516_v9 = vmul.f32 0.17677669, %v1845_v49  ;;  %v7532_v49 = vmul.f32 0.17677669, %v7468_v33 }
 0x3e8   : > { %v2112_v7 = vmul.f32 1.442695, %v2044_v42  ;;  %v2114_v8 = vmul.f32 1.442695, %v2045_v18 }
 0x3e9   : > { %v1955_v53 = vpop.xlane.xlu1 %1954 }
 0x3ea   : > { %6179 = vpow2.f32 %v2112_v7  ;;  %v2046_v12 = vsub.f32 %v7338_v17, %v1955_v53  ;;  %v2047_v62 = vsub.f32 %v7340_v3, %v1955_v53 }
 0x3eb   : > { %6181 = vpow2.f32 %v2114_v8 }
 0x3ec   : > { %v7498_v58 = vpop.eup %6171  ;;  %v2116_v10 = vmul.f32 1.442695, %v2046_v12  ;;  %v2118_v13 = vmul.f32 1.442695, %v2047_v62 }
 0x3ed   : > { %v7500_v5 = vpop.eup %6173  ;;  %v1958_v6 = vpop.xlane.xlu0 %1957 }
 0x3ee   : > { %6183 = vpow2.f32 %v2116_v10  ;;  %v2048_v18 = vsub.f32 %v7346_v34, %v1958_v6  ;;  %v2049_v42 = vsub.f32 %v7348_v29, %v1958_v6  ;;  %v2232_v17 = vadd.f32 %v7500_v5, %v7498_v58 }
 0x3ef   : > { %6185 = vpow2.f32 %v2118_v13  ;;  %v1961_v3 = vpop.xlane.xlu1 %1960  ;;  %v7518_v34 = vmul.f32 0.17677669, %v1847_v38  ;;  %v2016_v29 = vmax.f32 %v7502_v32, %v7504_v45  ;;  %v7529_v38 = vmul.f32 0.17677669, %v7466_v63 }
 0x3f0   : > { %v7510_v57 = vpop.eup %6175  ;;  %v2120_v16 = vmul.f32 1.442695, %v2048_v18  ;;  %v2122_v28 = vmul.f32 1.442695, %v2049_v42  ;;  %v2050_v4 = vsub.f32 %v7350_v1, %v1961_v3  ;;  %v2051_v31 = vsub.f32 %v7352_v37, %v1961_v3  ;;  %2233 = vadd.xlane.f32.xlu0 %v2232_v17 }
 0x3f1   : > { %v7514_v21 = vpop.eup %6177  ;;  %v2019_v6 = vmax.f32 %v7516_v9, %v7518_v34 }
 0x3f2   : > { %6187 = vpow2.f32 %v2120_v16  ;;  %v2124_v7 = vmul.f32 1.442695, %v2050_v4  ;;  %v2126_v8 = vmul.f32 1.442695, %v2051_v31  ;;  %v2235_v53 = vadd.f32 %v7514_v21, %v7510_v57 }
 0x3f3   : > { %6189 = vpow2.f32 %v2122_v28  ;;  %v7550_v16 = vmul.f32 0.17677669, %v7472_v47  ;;  %v2022_v28 = vmax.f32 %v7529_v38, %v7532_v49  ;;  %v7561_v47 = vmul.f32 0.17677669, %v7474_v41 }
 0x3f4   : > { %v7524_v1 = vpop.eup %6179  ;;  %6191 = vpow2.f32 %v2124_v7  ;;  %2236 = vadd.xlane.f32.xlu1 %v2235_v53  ;;  %2017 = vmax.xlane.f32.xlu0 %v2016_v29  ;;  %v7564_v29 = vmul.f32 0.17677669, %v7476_v35 }
 0x3f5   : > { %v7526_v37 = vpop.eup %6181  ;;  %6193 = vpow2.f32 %v2126_v8  ;;  %v1964_v12 = vpop.xlane.xlu0 %1963 }
 0x3f6   : > { %v2052_v62 = vsub.f32 %v7358_v39, %v1964_v12  ;;  %v2053_v10 = vsub.f32 %v7360_v56, %v1964_v12  ;;  %v2238_v13 = vadd.f32 %v7526_v37, %v7524_v1  ;;  %v7547_v56 = vmul.f32 0.17677669, %v7470_v52 }
 0x3f7   : > { %v1967_v18 = vpop.xlane.xlu1 %1966 }
 0x3f8   : > { %v7540_v42 = vpop.eup %6183  ;;  %v2128_v63 = vmul.f32 1.442695, %v2052_v62  ;;  %v2130_v17 = vmul.f32 1.442695, %v2053_v10  ;;  %v2054_v33 = vsub.f32 %v7362_v11, %v1967_v18  ;;  %v2055_v3 = vsub.f32 %v7364_v30, %v1967_v18  ;;  %2239 = vadd.xlane.f32.xlu0 %v2238_v13  ;;  %2020 = vmax.xlane.f32.xlu1 %v2019_v6 }
 0x3f9   : > { %v7544_v39 = vpop.eup %6185  ;;  %v2025_v10 = vmax.f32 %v7547_v56, %v7550_v16 }
 0x3fa   : > { %6195 = vpow2.f32 %v2128_v63  ;;  %v2132_v4 = vmul.f32 1.442695, %v2054_v33  ;;  %v2134_v31 = vmul.f32 1.442695, %v2055_v3  ;;  %v2241_v11 = vadd.f32 %v7544_v39, %v7540_v42 }
 0x3fb   : > { %6197 = vpow2.f32 %v2130_v17  ;;  %v2028_v17 = vmax.f32 %v7561_v47, %v7564_v29 }
 0x3fc   : > { %v7556_v30 = vpop.eup %6187  ;;  %6199 = vpow2.f32 %v2132_v4  ;;  %2242 = vadd.xlane.f32.xlu1 %v2241_v11  ;;  %2023 = vmax.xlane.f32.xlu0 %v2022_v28 }
 0x3fd   : > { %v7558_v52 = vpop.eup %6189  ;;  %6201 = vpow2.f32 %v2134_v31  ;;  %v1970_v7 = vpop.xlane.xlu0 %1969 }
 0x3fe   : > { %v7566_v8 = vpop.eup %6191  ;;  %v2056_v53 = vsub.f32 %v7370_v48, %v1970_v7  ;;  %v2057_v12 = vsub.f32 %v7372_v50, %v1970_v7  ;;  %v2244_v62 = vadd.f32 %v7558_v52, %v7556_v30  ;;  %v7579_v48 = vmul.f32 0.17677669, %v7478_v55 }
 0x3ff   : > { %v7574_v13 = vpop.eup %6193  ;;  %v1973_v41 = vpop.xlane.xlu1 %1972  ;;  %v7582_v50 = vmul.f32 0.17677669, %v7480_v23  ;;  %v7593_v23 = vmul.f32 0.17677669, %v7482_v36  ;;  %v7596_v55 = vmul.f32 0.17677669, %v7484_v22 }
 0x400   : > { %v2136_v6 = vmul.f32 1.442695, %v2056_v53  ;;  %v2138_v35 = vmul.f32 1.442695, %v2057_v12  ;;  %v2058_v18 = vsub.f32 %v7374_v0, %v1973_v41  ;;  %v2059_v63 = vsub.f32 %v7376_v59, %v1973_v41  ;;  %2245 = vadd.xlane.f32.xlu0 %v2244_v62  ;;  %2026 = vmax.xlane.f32.xlu1 %v2025_v10 }
 0x401   : > { %v2247_v28 = vadd.f32 %v7574_v13, %v7566_v8  ;;  %v2031_v12 = vmax.f32 %v7579_v48, %v7582_v50 }
 0x402   : > { %6203 = vpow2.f32 %v2136_v6  ;;  %v2140_v33 = vmul.f32 1.442695, %v2058_v18  ;;  %v2142_v3 = vmul.f32 1.442695, %v2059_v63 }
 0x403   : > { %6205 = vpow2.f32 %v2138_v35  ;;  %v2034_v35 = vmax.f32 %v7593_v23, %v7596_v55 }
 0x404   : > { %v7588_v0 = vpop.eup %6195  ;;  %6207 = vpow2.f32 %v2140_v33  ;;  %2248 = vadd.xlane.f32.xlu1 %v2247_v28  ;;  %2029 = vmax.xlane.f32.xlu0 %v2028_v17 }
 0x405   : > { %v7590_v59 = vpop.eup %6197  ;;  %6209 = vpow2.f32 %v2142_v3  ;;  %v1976_v4 = vpop.xlane.xlu0 %1975 }
 0x406   : > { %v7598_v31 = vpop.eup %6199  ;;  %v2060_v11 = vsub.f32 %v7382_v26, %v1976_v4  ;;  %v2061_v7 = vsub.f32 %v7384_v46, %v1976_v4  ;;  %v2250_v53 = vadd.f32 %v7590_v59, %v7588_v0  ;;  %v7611_v26 = vmul.f32 0.17677669, %v7486_v25 }
 0x407   : > { %v7606_v62 = vpop.eup %6201  ;;  %v1979_v36 = vpop.xlane.xlu1 %1978  ;;  %v7614_v46 = vmul.f32 0.17677669, %v7488_v20 }
 0x408   : > { %v2144_v10 = vmul.f32 1.442695, %v2060_v11  ;;  %v2146_v22 = vmul.f32 1.442695, %v2061_v7  ;;  %v2062_v41 = vsub.f32 %v7386_v51, %v1979_v36  ;;  %v2063_v6 = vsub.f32 %v7388_v54, %v1979_v36  ;;  %2251 = vadd.xlane.f32.xlu0 %v2250_v53  ;;  %2032 = vmax.xlane.f32.xlu1 %v2031_v12 }
 0x409   : > { %v2253_v17 = vadd.f32 %v7606_v62, %v7598_v31  ;;  %v2037_v4 = vmax.f32 %v7611_v26, %v7614_v46 }
 0x40a   : > { %6211 = vpow2.f32 %v2144_v10  ;;  %v2148_v18 = vmul.f32 1.442695, %v2062_v41  ;;  %v2150_v63 = vmul.f32 1.442695, %v2063_v6 }
 0x40b   : > { %6213 = vpow2.f32 %v2146_v22 }
 0x40c   : > { %v7620_v51 = vpop.eup %6203  ;;  %6215 = vpow2.f32 %v2148_v18  ;;  %2254 = vadd.xlane.f32.xlu1 %v2253_v17  ;;  %2035 = vmax.xlane.f32.xlu0 %v2034_v35 }
 0x40d   : > { %v7622_v25 = vpop.eup %6205  ;;  %6217 = vpow2.f32 %v2150_v63  ;;  %v1982_v20 = vpop.xlane.xlu0 %1981 }
 0x40e   : > { %v7624_v54 = vpop.eup %6207  ;;  %v2064_v33 = vsub.f32 %v7394_v27, %v1982_v20  ;;  %v2065_v3 = vsub.f32 %v7396_v2, %v1982_v20  ;;  %v2256_v28 = vadd.f32 %v7622_v25, %v7620_v51 }
 0x40f   : > { %v7632_v11 = vpop.eup %6209  ;;  %v1985_v7 = vpop.xlane.xlu1 %1984 }
 0x410   : > { %v2152_v53 = vmul.f32 1.442695, %v2064_v33  ;;  %v2154_v12 = vmul.f32 1.442695, %v2065_v3  ;;  %v2066_v36 = vsub.f32 %v7398_v40, %v1985_v7  ;;  %v2067_v10 = vsub.f32 %v7400_v43, %v1985_v7  ;;  %2257 = vadd.xlane.f32.xlu0 %v2256_v28  ;;  %2038 = vmax.xlane.f32.xlu1 %v2037_v4 }
 0x411   : > { %v2259_v22 = vadd.f32 %v7632_v11, %v7624_v54 }
 0x412   : > { %6219 = vpow2.f32 %v2152_v53  ;;  %v2156_v27 = vmul.f32 1.442695, %v2066_v36  ;;  %v2158_v2 = vmul.f32 1.442695, %v2067_v10 }
 0x413   : > { %6221 = vpow2.f32 %v2154_v12 }
 0x414   : > { %v7638_v41 = vpop.eup %6211  ;;  %6223 = vpow2.f32 %v2156_v27  ;;  %2260 = vadd.xlane.f32.xlu1 %v2259_v22 }
 0x415   : > { %v7640_v6 = vpop.eup %6213  ;;  %6225 = vpow2.f32 %v2158_v2  ;;  %v1988_v35 = vpop.xlane.xlu0 %1987 }
 0x416   : > { %v7642_v40 = vpop.eup %6215  ;;  %v2068_v43 = vsub.f32 %v7406_v19, %v1988_v35  ;;  %v2069_v18 = vsub.f32 %v7408_v14, %v1988_v35  ;;  %v2262_v63 = vadd.f32 %v7640_v6, %v7638_v41 }
 0x417   : > { %v7648_v17 = vpop.eup %6217  ;;  %v1991_v20 = vpop.xlane.xlu1 %1990 }
 0x418   : > { %v2160_v33 = vmul.f32 1.442695, %v2068_v43  ;;  %v2162_v3 = vmul.f32 1.442695, %v2069_v18  ;;  %v2070_v28 = vsub.f32 %v7410_v60, %v1991_v20  ;;  %v2071_v4 = vsub.f32 %v7412_v61, %v1991_v20  ;;  %2263 = vadd.xlane.f32.xlu0 %v2262_v63  ;;  %v9696_v63 = vld [vmem:[#allocation35_spill] sm:$0xff] }
 0x419   : > { %v2265_v7 = vadd.f32 %v7648_v17, %v7642_v40 }
 0x41a   : > { %6227 = vpow2.f32 %v2160_v33  ;;  %v2164_v19 = vmul.f32 1.442695, %v2070_v28  ;;  %v2166_v53 = vmul.f32 1.442695, %v2071_v4 }
 0x41b   : > { %6229 = vpow2.f32 %v2162_v3  ;;  %2266 = vadd.xlane.f32.xlu1 %v2265_v7 }
 0x41c   : > { %v7654_v14 = vpop.eup %6219  ;;  %6231 = vpow2.f32 %v2164_v19 }
 0x41d   : > { %v7656_v12 = vpop.eup %6221  ;;  %6233 = vpow2.f32 %v2166_v53  ;;  %v1994_v36 = vpop.xlane.xlu0 %1993  ;;  %v9700_v53 = vld [vmem:[#allocation37_spill] sm:$0xff] }
 0x41e   : > { %v7658_v10 = vpop.eup %6223  ;;  %v2072_v60 = vsub.f32 %v7418_v24, %v1994_v36  ;;  %v2073_v61 = vsub.f32 %v7420_v44, %v1994_v36  ;;  %v2268_v27 = vadd.f32 %v7656_v12, %v7654_v14 }
 0x41f   : > { %v7664_v2 = vpop.eup %6225  ;;  %v1997_v22 = vpop.xlane.xlu1 %1996 }
 0x420   : > { %v2168_v35 = vmul.f32 1.442695, %v2072_v60  ;;  %v2170_v43 = vmul.f32 1.442695, %v2073_v61  ;;  %v2074_v18 = vsub.f32 %v7422_v15, %v1997_v22  ;;  %v2075_v20 = vsub.f32 %v9696_v63, %v1997_v22  ;;  %2269 = vadd.xlane.f32.xlu0 %v2268_v27  ;;  %v9699_v15 = vld [vmem:[#allocation36_spill] sm:$0xff]  ;;  %v9703_v63 = vld [vmem:[#allocation39_spill] sm:$0xff] }
 0x421   : > { %v2271_v33 = vadd.f32 %v7664_v2, %v7658_v10 }
 0x422   : > { %6235 = vpow2.f32 %v2168_v35  ;;  %v2172_v24 = vmul.f32 1.442695, %v2074_v18  ;;  %v2174_v3 = vmul.f32 1.442695, %v2075_v20 }
 0x423   : > { %6237 = vpow2.f32 %v2170_v43  ;;  %2272 = vadd.xlane.f32.xlu1 %v2271_v33  ;;  %v9702_v43 = vld [vmem:[#allocation38_spill] sm:$0xff] }
 0x424   : > { %v7670_v44 = vpop.eup %6227  ;;  %6239 = vpow2.f32 %v2172_v24 }
 0x425   : > { %9697 = vst [vmem:[#allocation35_spill] sm:$0xff] %v7670_v44  ;;  %v7672_v28 = vpop.eup %6229  ;;  %6241 = vpow2.f32 %v2174_v3  ;;  %v2000_v4 = vpop.xlane.xlu0 %1999 }
 0x426   : > { %v7674_v7 = vpop.eup %6231  ;;  %v2076_v19 = vsub.f32 %v9699_v15, %v2000_v4  ;;  %v2077_v36 = vsub.f32 %v9700_v53, %v2000_v4  ;;  %v2274_v60 = vadd.f32 %v7672_v28, %v7670_v44  ;;  %v9711_v44 = vld [vmem:[#allocation43_spill] sm:$0xff] }
 0x427   : > { %9698 = vst [vmem:[#allocation48_spill] sm:$0xff] %v7674_v7  ;;  %v7680_v61 = vpop.eup %6233  ;;  %v2003_v27 = vpop.xlane.xlu1 %2002 }
 0x428   : > { %9701 = vst [vmem:[#allocation36_spill] sm:$0xff] %v7680_v61  ;;  %v2176_v22 = vmul.f32 1.442695, %v2076_v19  ;;  %v2178_v35 = vmul.f32 1.442695, %v2077_v36  ;;  %v2078_v18 = vsub.f32 %v9702_v43, %v2003_v27  ;;  %v2079_v20 = vsub.f32 %v9703_v63, %v2003_v27  ;;  %2275 = vadd.xlane.f32.xlu0 %v2274_v60  ;;  %v9707_v36 = vld [vmem:[#allocation40_spill] sm:$0xff] }
 0x429   : > { %v2277_v33 = vadd.f32 %v7680_v61, %v7674_v7  ;;  %v9708_v60 = vld [vmem:[#allocation41_spill] sm:$0xff] }
 0x42a   : > { %6243 = vpow2.f32 %v2176_v22  ;;  %v2180_v24 = vmul.f32 1.442695, %v2078_v18  ;;  %v2182_v3 = vmul.f32 1.442695, %v2079_v20 }
 0x42b   : > { %6245 = vpow2.f32 %v2178_v35  ;;  %2278 = vadd.xlane.f32.xlu1 %v2277_v33  ;;  %v9710_v33 = vld [vmem:[#allocation42_spill] sm:$0xff] }
 0x42c   : > { %v7686_v4 = vpop.eup %6235  ;;  %6247 = vpow2.f32 %v2180_v24 }
 0x42d   : > { %9704 = vst [vmem:[#allocation37_spill] sm:$0xff] %v7686_v4  ;;  %v7688_v15 = vpop.eup %6237  ;;  %6249 = vpow2.f32 %v2182_v3  ;;  %v2006_v19 = vpop.xlane.xlu0 %2005 }
 0x42e   : > { %9705 = vst [vmem:[#allocation38_spill] sm:$0xff] %v7688_v15  ;;  %v7690_v53 = vpop.eup %6239  ;;  %v2080_v27 = vsub.f32 %v9707_v36, %v2006_v19  ;;  %v2081_v43 = vsub.f32 %v9708_v60, %v2006_v19  ;;  %v2280_v22 = vadd.f32 %v7688_v15, %v7686_v4  ;;  %v9714_v4 = vld [vmem:[#allocation46_spill] sm:$0xff] }
 0x42f   : > { %9706 = vst [vmem:[#allocation39_spill] sm:$0xff] %v7690_v53  ;;  %v7696_v18 = vpop.eup %6241  ;;  %v2009_v35 = vpop.xlane.xlu1 %2008 }
 0x430   : > { %9709 = vst [vmem:[#allocation40_spill] sm:$0xff] %v7696_v18  ;;  %v2184_v63 = vmul.f32 1.442695, %v2080_v27  ;;  %v2186_v20 = vmul.f32 1.442695, %v2081_v43  ;;  %v2082_v24 = vsub.f32 %v9710_v33, %v2009_v35  ;;  %v2083_v7 = vsub.f32 %v9711_v44, %v2009_v35  ;;  %2281 = vadd.xlane.f32.xlu0 %v2280_v22  ;;  %v9712_v33 = vld [vmem:[#allocation44_spill] sm:$0xff] }
 0x431   : > { %v2283_v3 = vadd.f32 %v7696_v18, %v7690_v53  ;;  %v9713_v22 = vld [vmem:[#allocation45_spill] sm:$0xff]  ;;  %v9715_v53 = vld [vmem:[#allocation47_spill] sm:$0xff] }
 0x432   : > { %6251 = vpow2.f32 %v2184_v63  ;;  %v2188_v36 = vmul.f32 1.442695, %v2082_v24  ;;  %v2190_v61 = vmul.f32 1.442695, %v2083_v7 }
 0x433   : > { %6253 = vpow2.f32 %v2186_v20  ;;  %2284 = vadd.xlane.f32.xlu1 %v2283_v3 }
 0x434   : > { %v7702_v19 = vpop.eup %6243  ;;  %6255 = vpow2.f32 %v2188_v36 }
 0x435   : > { %v7704_v60 = vpop.eup %6245  ;;  %6257 = vpow2.f32 %v2190_v61  ;;  %v2012_v27 = vpop.xlane.xlu0 %2011 }
 0x436   : > { %v7706_v43 = vpop.eup %6247  ;;  %v2084_v44 = vsub.f32 %v9712_v33, %v2012_v27  ;;  %v2085_v35 = vsub.f32 %v9713_v22, %v2012_v27  ;;  %v2286_v63 = vadd.f32 %v7704_v60, %v7702_v19 }
 0x437   : > { %v7712_v24 = vpop.eup %6249  ;;  %v2015_v7 = vpop.xlane.xlu1 %2014 }
 0x438   : > { %v2192_v20 = vmul.f32 1.442695, %v2084_v44  ;;  %v2194_v3 = vmul.f32 1.442695, %v2085_v35  ;;  %v2086_v36 = vsub.f32 %v9714_v4, %v2015_v7  ;;  %v2087_v18 = vsub.f32 %v9715_v53, %v2015_v7  ;;  %2287 = vadd.xlane.f32.xlu0 %v2286_v63 }
 0x439   : > { %v2289_v61 = vadd.f32 %v7712_v24, %v7706_v43 }
 0x43a   : > { %6259 = vpow2.f32 %v2192_v20  ;;  %v2196_v33 = vmul.f32 1.442695, %v2086_v36  ;;  %v2198_v15 = vmul.f32 1.442695, %v2087_v18  ;;  %v6099_v36 = vld [vmem:[%s9723_s29] sm:$0xff]  }
 0x43b   : > { %6261 = vpow2.f32 %v2194_v3  ;;  %2290 = vadd.xlane.f32.xlu1 %v2289_v61  ;;  %v6100_v61 = vld [vmem:[%s9723_s29 + $0x8] sm:$0xff]   ;;  %5844 = vmatprep.subr.bf16.mxu0 %v6099_v36 }
 0x43c   : > { %v7718_v27 = vpop.eup %6251  ;;  %6263 = vpow2.f32 %v2196_v33  ;;  %5845 = vmatpush3.bf16.msra.mxu0 %v6099_v36  ;;  %v6101_v33 = vld [vmem:[%s9723_s29 + $0x10] sm:$0xff]  }
 0x43d   : > { %9716 = vst [vmem:[#allocation41_spill] sm:$0xff] %v7718_v27  ;;  %v7720_v22 = vpop.eup %6253  ;;  %6265 = vpow2.f32 %v2198_v15  ;;  %5846 = vmatprep.subr.bf16.mxu0 %v6100_v61 }
 0x43e   : > { %v7722_v44 = vpop.eup %6255  ;;  %v2292_v4 = vadd.f32 %v7720_v22, %v7718_v27 }
 0x43f   : > { %9717 = vst [vmem:[#allocation42_spill] sm:$0xff] %v7722_v44  ;;  %v7726_v53 = vpop.eup %6257 }
 0x440   : > { %9718 = vst [vmem:[#allocation43_spill] sm:$0xff] %v7726_v53  ;;  %2293 = vadd.xlane.f32.xlu0 %v2292_v4  ;;  %v2295_v35 = vadd.f32 %v7726_v53, %v7722_v44  ;;  %5847 = vmatpush3.bf16.msra.mxu0 %v6100_v61 }
 0x441   : > { %5848 = vmatprep.subr.bf16.mxu0 %v6101_v33 }
 0x442   : > { %2296 = vadd.xlane.f32.xlu1 %v2295_v35 }
 0x444   : > { %v7730_v18 = vpop.eup %6259  ;;  %5849 = vmatpush3.bf16.msra.mxu0 %v6101_v33 }
 0x445   : > { %9719 = vst [vmem:[#allocation44_spill] sm:$0xff] %v7730_v18  ;;  %v7732_v63 = vpop.eup %6261 }
 0x446   : > { %9720 = vst [vmem:[#allocation45_spill] sm:$0xff] %v7732_v63  ;;  %v7734_v7 = vpop.eup %6263  ;;  %v2298_v15 = vadd.f32 %v7732_v63, %v7730_v18 }
 0x447   : > { %9721 = vst [vmem:[#allocation46_spill] sm:$0xff] %v7734_v7  ;;  %v7738_v20 = vpop.eup %6265 }
 0x448   : > { %9722 = vst [vmem:[#allocation47_spill] sm:$0xff] %v7738_v20  ;;  %2299 = vadd.xlane.f32.xlu0 %v2298_v15  ;;  %v2301_v3 = vadd.f32 %v7738_v20, %v7734_v7 }
 0x44a   : > { %2302 = vadd.xlane.f32.xlu1 %v2301_v3 }
 0x47d   : > { %v2234_v4 = vpop.xlane.xlu0 %2233 }
 0x47e   : > { %6267 = vrcp.f32 %v2234_v4 }
 0x481   : > { %v2237_v35 = vpop.xlane.xlu1 %2236  ;;  %v2018_v15 = vpop.xlane.xlu0 %2017 }
 0x482   : > { %6269 = vrcp.f32 %v2237_v35  ;;  %v2088_v3 = vsub.f32 %v7502_v32, %v2018_v15  ;;  %v2089_v18 = vsub.f32 %v7504_v45, %v2018_v15 }
 0x484   : > { %v2200_v7 = vmul.f32 1.442695, %v2088_v3  ;;  %v2202_v20 = vmul.f32 1.442695, %v2089_v18 }
 0x485   : > { %v2240_v36 = vpop.xlane.xlu0 %2239  ;;  %v2021_v63 = vpop.xlane.xlu1 %2020 }
 0x486   : > { %6271 = vpow2.f32 %v2200_v7  ;;  %v2090_v27 = vsub.f32 %v7516_v9, %v2021_v63  ;;  %v2091_v61 = vsub.f32 %v7518_v34, %v2021_v63 }
 0x487   : > { %6273 = vpow2.f32 %v2202_v20 }
 0x488   : > { %6275 = vrcp.f32 %v2240_v36  ;;  %v2204_v33 = vmul.f32 1.442695, %v2090_v27  ;;  %v2206_v4 = vmul.f32 1.442695, %v2091_v61  ;;  %v6268_v35 = vpop.eup %6267 }
 0x489   : > { %v2243_v44 = vpop.xlane.xlu1 %2242  ;;  %v2024_v53 = vpop.xlane.xlu0 %2023  ;;  %v2360_v9 = vmul.f32 %v6268_v35, %v7498_v58  ;;  %v2361_v20 = vmul.f32 %v6268_v35, %v7500_v5 }
 0x48a   : > { %6277 = vpow2.f32 %v2204_v33  ;;  %v2092_v32 = vsub.f32 %v7529_v38, %v2024_v53  ;;  %v2093_v45 = vsub.f32 %v7532_v49, %v2024_v53 }
 0x48b   : > { %6279 = vpow2.f32 %v2206_v4 }
 0x48c   : > { %v6270_v18 = vpop.eup %6269  ;;  %6281 = vrcp.f32 %v2243_v44  ;;  %v2208_v7 = vmul.f32 1.442695, %v2092_v32  ;;  %v2210_v15 = vmul.f32 1.442695, %v2093_v45 }
 0x48d   : > { %v2362_v34 = vmul.f32 %v6270_v18, %v7510_v57  ;;  %v2246_v63 = vpop.xlane.xlu0 %2245  ;;  %v2027_v27 = vpop.xlane.xlu1 %2026  ;;  %v2363_v3 = vmul.f32 %v6270_v18, %v7514_v21 }
 0x48e   : > { %6283 = vpow2.f32 %v2208_v7  ;;  %v2094_v38 = vsub.f32 %v7547_v56, %v2027_v27  ;;  %v2095_v49 = vsub.f32 %v7550_v16, %v2027_v27 }
 0x48f   : > { %6285 = vpow2.f32 %v2210_v15  ;;  %v2425_v53 = vpack.c.bf16 %v2363_v3, %v2361_v20  ;;  %v2424_v44 = vpack.c.bf16 %v2362_v34, %v2360_v9 }
 0x490   : > { %v7763_v36 = vpop.eup %6271  ;;  %6287 = vrcp.f32 %v2246_v63  ;;  %v2212_v58 = vmul.f32 1.442695, %v2094_v38  ;;  %v2214_v61 = vmul.f32 1.442695, %v2095_v49 }
 0x491   : > { %v7765_v57 = vpop.eup %6273  ;;  %2504 = vmatprep.mubr.bf16.mxu1 %v2425_v53  ;;  %v2249_v33 = vpop.xlane.xlu1 %2248 }
 0x492   : > { %v2030_v5 = vpop.xlane.xlu0 %2029  ;;  %v6276_v4 = vpop.eup %6275  ;;  %6289 = vpow2.f32 %v2212_v58  ;;  %2505 = vmatmul.mubr.bf16.vlgmr.msra.gmra.mrb[64].mxu1 %v2424_v44  ;;  %v2304_v16 = vadd.f32 %v7765_v57, %v7763_v36 }
 0x493   : > { %v2096_v21 = vsub.f32 %v7561_v47, %v2030_v5  ;;  %v2097_v56 = vsub.f32 %v7564_v29, %v2030_v5  ;;  %6291 = vpow2.f32 %v2214_v61  ;;  %v2365_v9 = vmul.f32 %v6276_v4, %v7526_v37 }
 0x494   : > { %v7771_v35 = vpop.eup %6277  ;;  %6293 = vrcp.f32 %v2249_v33  ;;  %2305 = vadd.xlane.f32.xlu0 %v2304_v16  ;;  %v2364_v20 = vmul.f32 %v6276_v4, %v7524_v1 }
 0x495   : > { %v2216_v32 = vmul.f32 1.442695, %v2096_v21  ;;  %v2218_v45 = vmul.f32 1.442695, %v2097_v56  ;;  %v7773_v18 = vpop.eup %6279  ;;  %v2033_v15 = vpop.xlane.xlu1 %2032 }
 0x496   : > { %v2252_v7 = vpop.xlane.xlu0 %2251  ;;  %v6282_v47 = vpop.eup %6281  ;;  %v2098_v29 = vsub.f32 %v7579_v48, %v2033_v15  ;;  %v2099_v34 = vsub.f32 %v7582_v50, %v2033_v15  ;;  %v2307_v63 = vadd.f32 %v7773_v18, %v7771_v35 }
 0x497   : > { %6295 = vpow2.f32 %v2216_v32  ;;  %v2367_v27 = vmul.f32 %v6282_v47, %v7544_v39  ;;  %v2366_v3 = vmul.f32 %v6282_v47, %v7540_v42 }
 0x498   : > { %6297 = vpow2.f32 %v2218_v45  ;;  %v7783_v38 = vpop.eup %6283  ;;  %v2220_v49 = vmul.f32 1.442695, %v2098_v29  ;;  %v2222_v37 = vmul.f32 1.442695, %v2099_v34  ;;  %2308 = vadd.xlane.f32.xlu1 %v2307_v63 }
 0x499   : > { %v7785_v53 = vpop.eup %6285  ;;  %6299 = vrcp.f32 %v2252_v7  ;;  %v2427_v48 = vpack.c.bf16 %v2367_v27, %v2365_v9  ;;  %v2255_v50 = vpop.xlane.xlu1 %2254  ;;  %v2426_v58 = vpack.c.bf16 %v2366_v3, %v2364_v20 }
 0x49a   : > { %v2036_v44 = vpop.xlane.xlu0 %2035  ;;  %v6288_v61 = vpop.eup %6287  ;;  %6301 = vpow2.f32 %v2220_v49  ;;  %v2310_v42 = vadd.f32 %v7785_v53, %v7783_v38 }
 0x49b   : > { %v2100_v39 = vsub.f32 %v7593_v23, %v2036_v44  ;;  %v2101_v1 = vsub.f32 %v7596_v55, %v2036_v44  ;;  %6303 = vpow2.f32 %v2222_v37  ;;  %2512 = vmatprep.mubr.bf16.mxu1 %v2427_v48  ;;  %v2369_v16 = vmul.f32 %v6288_v61, %v7558_v52 }
 0x49c   : > { %v7791_v33 = vpop.eup %6289  ;;  %6305 = vrcp.f32 %v2255_v50  ;;  %2513 = vmatmul.mubr.bf16.gmra.mrb[68].mxu1 %v2426_v58  ;;  %2311 = vadd.xlane.f32.xlu0 %v2310_v42  ;;  %v2368_v9 = vmul.f32 %v6288_v61, %v7556_v30 }
 0x49d   : > { %v2224_v5 = vmul.f32 1.442695, %v2100_v39  ;;  %v2226_v4 = vmul.f32 1.442695, %v2101_v1  ;;  %v7793_v21 = vpop.eup %6291  ;;  %v2039_v56 = vpop.xlane.xlu1 %2038 }
 0x49e   : > { %v6294_v23 = vpop.eup %6293  ;;  %v2258_v55 = vpop.xlane.xlu0 %2257  ;;  %v2102_v32 = vsub.f32 %v7611_v26, %v2039_v56  ;;  %v2103_v45 = vsub.f32 %v7614_v46, %v2039_v56  ;;  %v2313_v7 = vadd.f32 %v7793_v21, %v7791_v33 }
 0x49f   : > { %6307 = vpow2.f32 %v2224_v5  ;;  %v2371_v15 = vmul.f32 %v6294_v23, %v7574_v13  ;;  %v2370_v47 = vmul.f32 %v6294_v23, %v7566_v8 }
 0x4a0   : > { %6309 = vpow2.f32 %v2226_v4  ;;  %v2228_v52 = vmul.f32 1.442695, %v2102_v32  ;;  %v2230_v34 = vmul.f32 1.442695, %v2103_v45  ;;  %2314 = vadd.xlane.f32.xlu1 %v2313_v7 }
 0x4a1   : > { %v7803_v29 = vpop.eup %6295  ;;  %6311 = vrcp.f32 %v2258_v55  ;;  %v2429_v26 = vpack.c.bf16 %v2371_v15, %v2369_v16  ;;  %v2261_v46 = vpop.xlane.xlu1 %2260  ;;  %v2428_v27 = vpack.c.bf16 %v2370_v47, %v2368_v9 }
 0x4a2   : > { %v7805_v63 = vpop.eup %6297  ;;  %6313 = vpow2.f32 %v2228_v52 }
 0x4a3   : > { %v2316_v20 = vadd.f32 %v7805_v63, %v7803_v29  ;;  %v6300_v13 = vpop.eup %6299  ;;  %6315 = vpow2.f32 %v2230_v34  ;;  %2520 = vmatprep.mubr.bf16.mxu1 %v2429_v26 }
 0x4a4   : > { %v7809_v30 = vpop.eup %6301  ;;  %6317 = vrcp.f32 %v2261_v46  ;;  %2521 = vmatmul.mubr.bf16.gmra.mrb[72].mxu1 %v2428_v27  ;;  %v2373_v48 = vmul.f32 %v6300_v13, %v7590_v59  ;;  %v2372_v44 = vmul.f32 %v6300_v13, %v7588_v0  ;;  %v6102_v59 = vld [vmem:[%s9723_s29 + $0x18] sm:$0xff]  }
 0x4a5   : > { %2317 = vadd.xlane.f32.xlu0 %v2316_v20  ;;  %v7811_v8 = vpop.eup %6303  ;;  %v2264_v3 = vpop.xlane.xlu0 %2263  ;;  %5850 = vmatprep.subr.bf16.mxu0 %v6102_v59 }
 0x4a6   : > { %v6306_v49 = vpop.eup %6305  ;;  %v2319_v37 = vadd.f32 %v7811_v8, %v7809_v30  ;;  %6319 = vrcp.f32 %v2264_v3  ;;  %5851 = vmatpush3.bf16.msra.mxu0 %v6102_v59  ;;  %v6103_v3 = vld [vmem:[%s9723_s29 + $0x20] sm:$0xff]   ;;  %v9725_v59 = vld [vmem:[#allocation48_spill] sm:$0xff] }
 0x4a7   : > { %v2375_v50 = vmul.f32 %v6306_v49, %v7606_v62  ;;  %v2374_v58 = vmul.f32 %v6306_v49, %v7598_v31  ;;  %5852 = vmatprep.subr.bf16.mxu0 %v6103_v3 }
 0x4a8   : > { %2320 = vadd.xlane.f32.xlu1 %v2319_v37  ;;  %v2267_v39 = vpop.xlane.xlu1 %2266 }
 0x4a9   : > { %v7819_v61 = vpop.eup %6307  ;;  %6321 = vrcp.f32 %v2267_v39  ;;  %v2431_v42 = vpack.c.bf16 %v2375_v50, %v2373_v48  ;;  %v2430_v5 = vpack.c.bf16 %v2374_v58, %v2372_v44 }
 0x4aa   : > { %v7821_v1 = vpop.eup %6309  ;;  %5853 = vmatpush3.bf16.msra.mxu0 %v6103_v3 }
 0x4ab   : > { %v2322_v4 = vadd.f32 %v7821_v1, %v7819_v61  ;;  %v6312_v62 = vpop.eup %6311  ;;  %2528 = vmatprep.mubr.bf16.mxu1 %v2431_v42  ;;  %v9724_v42 = vld [vmem:[#allocation36_spill] sm:$0xff] }
 0x4ac   : > { %v7828_v0 = vpop.eup %6313  ;;  %2529 = vmatmul.mubr.bf16.gmra.mrb[76].mxu1 %v2430_v5  ;;  %v2377_v55 = vmul.f32 %v6312_v62, %v7622_v25  ;;  %v2376_v45 = vmul.f32 %v6312_v62, %v7620_v51 }
 0x4ad   : > { %2323 = vadd.xlane.f32.xlu0 %v2322_v4  ;;  %v7830_v31 = vpop.eup %6315  ;;  %v2270_v56 = vpop.xlane.xlu0 %2269 }
 0x4ae   : > { %v6318_v16 = vpop.eup %6317  ;;  %v2325_v23 = vadd.f32 %v7830_v31, %v7828_v0  ;;  %6323 = vrcp.f32 %v2270_v56  ;;  %v9726_v56 = vld [vmem:[#allocation35_spill] sm:$0xff] }
 0x4af   : > { %v2379_v32 = vmul.f32 %v6318_v16, %v7632_v11  ;;  %v2378_v7 = vmul.f32 %v6318_v16, %v7624_v54 }
 0x4b0   : > { %2326 = vadd.xlane.f32.xlu1 %v2325_v23  ;;  %v2273_v15 = vpop.xlane.xlu1 %2272  ;;  %v6320_v9 = vpop.eup %6319 }
 0x4b1   : > { %6325 = vrcp.f32 %v2273_v15  ;;  %v2433_v47 = vpack.c.bf16 %v2379_v32, %v2377_v55  ;;  %v2432_v52 = vpack.c.bf16 %v2378_v7, %v2376_v45  ;;  %v2381_v26 = vmul.f32 %v6320_v9, %v7640_v6  ;;  %v9727_v32 = vld [vmem:[#allocation38_spill] sm:$0xff]  ;;  %v9728_v7 = vld [vmem:[#allocation40_spill] sm:$0xff] }
 0x4b2   : > { %v2380_v54 = vmul.f32 %v6320_v9, %v7638_v41 }
 0x4b3   : > { %v6322_v34 = vpop.eup %6321  ;;  %2536 = vmatprep.mubr.bf16.mxu1 %v2433_v47 }
 0x4b4   : > { %2537 = vmatmul.mubr.bf16.gmra.mrb[80].mxu1 %v2432_v52  ;;  %v2383_v25 = vmul.f32 %v6322_v34, %v7648_v17  ;;  %v2382_v11 = vmul.f32 %v6322_v34, %v7642_v40  ;;  %v9729_v52 = vld [vmem:[#allocation39_spill] sm:$0xff] }
 0x4b5   : > { %v2276_v46 = vpop.xlane.xlu0 %2275 }
 0x4b6   : > { %v2435_v27 = vpack.c.bf16 %v2383_v25, %v2381_v26  ;;  %6327 = vrcp.f32 %v2276_v46  ;;  %v2434_v13 = vpack.c.bf16 %v2382_v11, %v2380_v54  ;;  %v6105_v26 = vld [vmem:[%s9723_s29 + $0x30] sm:$0xff]   ;;  %v9730_v46 = vld [vmem:[#allocation37_spill] sm:$0xff] }
 0x4b8   : > { %2544 = vmatprep.mubr.bf16.mxu1 %v2435_v27  ;;  %v2279_v51 = vpop.xlane.xlu1 %2278  ;;  %v6324_v20 = vpop.eup %6323 }
 0x4b9   : > { %6329 = vrcp.f32 %v2279_v51  ;;  %v2385_v6 = vmul.f32 %v6324_v20, %v7656_v12  ;;  %v2384_v50 = vmul.f32 %v6324_v20, %v7654_v14 }
 0x4bb   : > { %v6326_v49 = vpop.eup %6325 }
 0x4bc   : > { %2545 = vmatmul.mubr.bf16.gmra.mrb[84].mxu1 %v2434_v13  ;;  %v2387_v17 = vmul.f32 %v6326_v49, %v7664_v2  ;;  %v2386_v48 = vmul.f32 %v6326_v49, %v7658_v10  ;;  %v6104_v10 = vld [vmem:[%s9723_s29 + $0x28] sm:$0xff]  }
 0x4bd   : > { %v2282_v40 = vpop.xlane.xlu0 %2281  ;;  %5854 = vmatprep.subr.bf16.mxu0 %v6104_v10 }
 0x4be   : > { %v2437_v37 = vpack.c.bf16 %v2387_v17, %v2385_v6  ;;  %6331 = vrcp.f32 %v2282_v40  ;;  %v2436_v58 = vpack.c.bf16 %v2386_v48, %v2384_v50  ;;  %5855 = vmatpush3.bf16.msra.mxu0 %v6104_v10 }
 0x4bf   : > { %5856 = vmatprep.subr.bf16.mxu0 %v6105_v26 }
 0x4c0   : > { %2552 = vmatprep.mubr.bf16.mxu1 %v2437_v37  ;;  %v2285_v41 = vpop.xlane.xlu1 %2284  ;;  %v6328_v44 = vpop.eup %6327 }
 0x4c1   : > { %6333 = vrcp.f32 %v2285_v41  ;;  %v2389_v12 = vmul.f32 %v6328_v44, %v7672_v28  ;;  %v2388_v16 = vmul.f32 %v6328_v44, %v9726_v56  ;;  %v9731_v44 = vld [vmem:[#allocation43_spill] sm:$0xff]  ;;  %v9737_v56 = vld [vmem:[#allocation44_spill] sm:$0xff] }
 0x4c2   : > { %5857 = vmatpush3.bf16.msra.mxu0 %v6105_v26 }
 0x4c3   : > { %v6330_v39 = vpop.eup %6329 }
 0x4c4   : > { %2553 = vmatmul.mubr.bf16.gmra.mrb[88].mxu1 %v2436_v58  ;;  %v2391_v2 = vmul.f32 %v6330_v39, %v9724_v42  ;;  %v2390_v62 = vmul.f32 %v6330_v39, %v9725_v59  ;;  %v9733_v42 = vld [vmem:[#allocation41_spill] sm:$0xff] }
 0x4c5   : > { %v2288_v5 = vpop.xlane.xlu0 %2287 }
 0x4c6   : > { %v2439_v4 = vpack.c.bf16 %v2391_v2, %v2389_v12  ;;  %6335 = vrcp.f32 %v2288_v5  ;;  %v2438_v28 = vpack.c.bf16 %v2390_v62, %v2388_v16  ;;  %v9735_v62 = vld [vmem:[#allocation47_spill] sm:$0xff] }
 0x4c8   : > { %2560 = vmatprep.mubr.bf16.mxu1 %v2439_v4  ;;  %v2291_v14 = vpop.xlane.xlu1 %2290  ;;  %v6332_v23 = vpop.eup %6331  ;;  %v9734_v4 = vld [vmem:[#allocation45_spill] sm:$0xff] }
 0x4c9   : > { %6337 = vrcp.f32 %v2291_v14  ;;  %v2393_v45 = vmul.f32 %v6332_v23, %v9727_v32  ;;  %v2392_v27 = vmul.f32 %v6332_v23, %v9730_v46  ;;  %v9736_v14 = vld [vmem:[#allocation46_spill] sm:$0xff] }
 0x4cb   : > { %v6334_v55 = vpop.eup %6333 }
 0x4cc   : > { %2561 = vmatmul.mubr.bf16.gmra.mrb[92].mxu1 %v2438_v28  ;;  %v2395_v15 = vmul.f32 %v6334_v55, %v9728_v7  ;;  %v2394_v34 = vmul.f32 %v6334_v55, %v9729_v52  ;;  %v6106_v28 = vld [vmem:[%s9723_s29 + $0x38] sm:$0xff]  }
 0x4cd   : > { %v2294_v9 = vpop.xlane.xlu0 %2293  ;;  %5858 = vmatprep.subr.bf16.mxu0 %v6106_v28 }
 0x4ce   : > { %6339 = vrcp.f32 %v2294_v9  ;;  %v2441_v47 = vpack.c.bf16 %v2395_v15, %v2393_v45  ;;  %v2440_v51 = vpack.c.bf16 %v2394_v34, %v2392_v27  ;;  %5859 = vmatpush3.bf16.msra.mxu0 %v6106_v28 }
 0x4cf   : > { %v2297_v25 = vpop.xlane.xlu1 %2296 }
 0x4d0   : > { %2568 = vmatprep.mubr.bf16.mxu1 %v2441_v47  ;;  %6341 = vrcp.f32 %v2297_v25  ;;  %v6336_v11 = vpop.eup %6335 }
 0x4d1   : > { %v2397_v20 = vmul.f32 %v6336_v11, %v7704_v60  ;;  %v2396_v37 = vmul.f32 %v6336_v11, %v7702_v19 }
 0x4d3   : > { %v6338_v54 = vpop.eup %6337 }
 0x4d4   : > { %2569 = vmatmul.mubr.bf16.gmra.mrb[96].mxu1 %v2440_v51  ;;  %v2399_v13 = vmul.f32 %v6338_v54, %v7712_v24  ;;  %v2398_v6 = vmul.f32 %v6338_v54, %v7706_v43  ;;  %v9732_v24 = vld [vmem:[#allocation42_spill] sm:$0xff] }
 0x4d5   : > { %v2300_v3 = vpop.xlane.xlu0 %2299 }
 0x4d6   : > { %6343 = vrcp.f32 %v2300_v3  ;;  %v2443_v49 = vpack.c.bf16 %v2399_v13, %v2397_v20  ;;  %v2442_v41 = vpack.c.bf16 %v2398_v6, %v2396_v37 }
 0x4d7   : > { %v2303_v17 = vpop.xlane.xlu1 %2302 }
 0x4d8   : > { %v6340_v40 = vpop.eup %6339  ;;  %2576 = vmatprep.mubr.bf16.mxu1 %v2443_v49  ;;  %6345 = vrcp.f32 %v2303_v17 }
 0x4d9   : > { %v2401_v50 = vmul.f32 %v6340_v40, %v7720_v22  ;;  %v2400_v43 = vmul.f32 %v6340_v40, %v9733_v42 }
 0x4da   : > { %v6342_v48 = vpop.eup %6341 }
 0x4db   : > { %v2403_v58 = vmul.f32 %v6342_v48, %v9731_v44  ;;  %v2402_v39 = vmul.f32 %v6342_v48, %v9732_v24 }
 0x4dc   : > { %2577 = vmatmul.mubr.bf16.gmra.mrb[100].mxu1 %v2442_v41 }
 0x4dd   : > { %v2445_v60 = vpack.c.bf16 %v2403_v58, %v2401_v50  ;;  %v2444_v5 = vpack.c.bf16 %v2402_v39, %v2400_v43 }
 0x4df   : > { %2584 = vmatprep.mubr.bf16.mxu1 %v2445_v60 }
 0x4e0   : > { %v6344_v12 = vpop.eup %6343 }
 0x4e1   : > { %v2405_v59 = vmul.f32 %v6344_v12, %v9734_v4  ;;  %v2404_v16 = vmul.f32 %v6344_v12, %v9737_v56 }
 0x4e2   : > { %v6346_v2 = vpop.eup %6345 }
 0x4e3   : > { %v2407_v19 = vmul.f32 %v6346_v2, %v9735_v62  ;;  %v2406_v22 = vmul.f32 %v6346_v2, %v9736_v14 }
 0x4e4   : > { %2585 = vmatmul.mubr.bf16.gmra.mrb[104].mxu1 %v2444_v5 }
 0x4e5   : > { %v2447_v10 = vpack.c.bf16 %v2407_v19, %v2405_v59  ;;  %v2446_v23 = vpack.c.bf16 %v2406_v22, %v2404_v16 }
 0x4e7   : > { %2592 = vmatprep.mubr.bf16.mxu1 %v2447_v10 }
 0x4ec   : > { %2593 = vmatmul.mubr.bf16.gmra.mrb[108].mxu1 %v2446_v23 }
 0x521   : > { %v2306_v55 = vpop.xlane.xlu0 %2305 }
 0x522   : > { %6347 = vrcp.f32 %v2306_v55 }
 0x525   : > { %v2309_v32 = vpop.xlane.xlu1 %2308 }
 0x526   : > { %6349 = vrcp.f32 %v2309_v32 }
 0x529   : > { %v2312_v45 = vpop.xlane.xlu0 %2311 }
 0x52a   : > { %6351 = vrcp.f32 %v2312_v45 }
 0x52c   : > { %v6348_v15 = vpop.eup %6347 }
 0x52d   : > { %v2315_v7 = vpop.xlane.xlu1 %2314  ;;  %v2409_v52 = vmul.f32 %v6348_v15, %v7765_v57  ;;  %v2408_v26 = vmul.f32 %v6348_v15, %v7763_v36 }
 0x52e   : > { %6353 = vrcp.f32 %v2315_v7 }
 0x530   : > { %v6350_v9 = vpop.eup %6349 }
 0x531   : > { %v2411_v34 = vmul.f32 %v6350_v9, %v7773_v18  ;;  %v2410_v25 = vmul.f32 %v6350_v9, %v7771_v35 }
 0x532   : > { %v2318_v47 = vpop.xlane.xlu0 %2317 }
 0x533   : > { %v2449_v46 = vpack.c.bf16 %v2411_v34, %v2409_v52  ;;  %v2448_v27 = vpack.c.bf16 %v2410_v25, %v2408_v26  ;;  %6355 = vrcp.f32 %v2318_v47 }
 0x534   : > { %v6352_v51 = vpop.eup %6351 }
 0x535   : > { %2600 = vmatprep.mubr.bf16.mxu1 %v2449_v46  ;;  %v2321_v11 = vpop.xlane.xlu1 %2320  ;;  %v2413_v13 = vmul.f32 %v6352_v51, %v7785_v53  ;;  %v2412_v18 = vmul.f32 %v6352_v51, %v7783_v38 }
 0x536   : > { %6357 = vrcp.f32 %v2321_v11  ;;  %2601 = vmatmul.mubr.bf16.gmra.mrb[112].mxu1 %v2448_v27 }
 0x538   : > { %v6354_v54 = vpop.eup %6353 }
 0x539   : > { %v2415_v57 = vmul.f32 %v6354_v54, %v7793_v21  ;;  %v2414_v36 = vmul.f32 %v6354_v54, %v7791_v33 }
 0x53a   : > { %v2324_v20 = vpop.xlane.xlu0 %2323 }
 0x53b   : > { %v2451_v3 = vpack.c.bf16 %v2415_v57, %v2413_v13  ;;  %v2450_v35 = vpack.c.bf16 %v2414_v36, %v2412_v18  ;;  %6359 = vrcp.f32 %v2324_v20 }
 0x53d   : > { %2608 = vmatprep.mubr.bf16.mxu1 %v2451_v3  ;;  %v2327_v49 = vpop.xlane.xlu1 %2326  ;;  %v6356_v6 = vpop.eup %6355 }
 0x53e   : > { %6361 = vrcp.f32 %v2327_v49  ;;  %2609 = vmatmul.mubr.bf16.gmra.mrb[116].mxu1 %v2450_v35  ;;  %v2417_v40 = vmul.f32 %v6356_v6, %v7805_v63  ;;  %v2416_v53 = vmul.f32 %v6356_v6, %v7803_v29 }
 0x540   : > { %v6358_v17 = vpop.eup %6357 }
 0x541   : > { %v2419_v37 = vmul.f32 %v6358_v17, %v7811_v8  ;;  %v2418_v21 = vmul.f32 %v6358_v17, %v7809_v30 }
 0x543   : > { %v2453_v38 = vpack.c.bf16 %v2419_v37, %v2417_v40  ;;  %v2452_v48 = vpack.c.bf16 %v2418_v21, %v2416_v53 }
 0x545   : > { %2616 = vmatprep.mubr.bf16.mxu1 %v2453_v38  ;;  %v6360_v33 = vpop.eup %6359 }
 0x546   : > { %2617 = vmatmul.mubr.bf16.gmra.mrb[120].mxu1 %v2452_v48  ;;  %v2421_v50 = vmul.f32 %v6360_v33, %v7821_v1  ;;  %v2420_v58 = vmul.f32 %v6360_v33, %v7819_v61 }
 0x548   : > { %v6362_v41 = vpop.eup %6361 }
 0x549   : > { %v2423_v44 = vmul.f32 %v6362_v41, %v7830_v31  ;;  %v2422_v63 = vmul.f32 %v6362_v41, %v7828_v0 }
 0x54b   : > { %v2455_v60 = vpack.c.bf16 %v2423_v44, %v2421_v50  ;;  %v2454_v8 = vpack.c.bf16 %v2422_v63, %v2420_v58 }
 0x54d   : > { %2624 = vmatprep.mubr.bf16.mxu1 %v2455_v60 }
 0x54e   : > { %2625 = vmatmul.mubr.bf16.gmra.mrb[124].mxu1 %v2454_v8 }
 0x565   : > { %v5513_v29 = vpop.f32.mrb[64].mxu1 }
 0x566   : > { %v5514_v30 = vpop.f32.mrb[65].mxu1 }
 0x567   : > { %v5515_v24 = vadd.f32 %v5514_v30, %v5513_v29  ;;  %v5516_v39 = vpop.f32.mrb[66].mxu1 }
 0x568   : > { %v5517_v12 = vpop.f32.mrb[67].mxu1 }
 0x569   : > { %v5518_v42 = vadd.f32 %v5517_v12, %v5516_v39 }
 0x56b   : > { %v2633_v43 = vpack.c.bf16 %v5518_v42, %v5515_v24 }
 0x56d   : > { %5860 = vmatprep.mubr.bf16.mxu0 %v2633_v43 }
 0x56f   : > { %v5519_v2 = vpop.f32.mrb[68].mxu1 }
 0x570   : > { %v5520_v1 = vpop.f32.mrb[69].mxu1 }
 0x571   : > { %v5521_v5 = vadd.f32 %v5520_v1, %v5519_v2  ;;  %v5522_v31 = vpop.f32.mrb[70].mxu1 }
 0x572   : > { %v5523_v4 = vpop.f32.mrb[71].mxu1 }
 0x573   : > { %v5524_v61 = vadd.f32 %v5523_v4, %v5522_v31 }
 0x575   : > { %v2634_v59 = vpack.c.bf16 %v5524_v61, %v5521_v5 }
 0x577   : > { %v5525_v0 = vpop.f32.mrb[72].mxu1  ;;  %5861 = vmatmul.mubr.bf16.vlgmr.msra.gmra.mrb[128].mxu0 %v2634_v59 }
 0x578   : > { %v5526_v62 = vpop.f32.mrb[73].mxu1 }
 0x579   : > { %v5527_v19 = vadd.f32 %v5526_v62, %v5525_v0  ;;  %v5528_v10 = vpop.f32.mrb[74].mxu1 }
 0x57a   : > { %v5529_v14 = vpop.f32.mrb[75].mxu1 }
 0x57b   : > { %v5530_v22 = vadd.f32 %v5529_v14, %v5528_v10 }
 0x57d   : > { %v2635_v56 = vpack.c.bf16 %v5530_v22, %v5527_v19 }
 0x57f   : > { %v5531_v16 = vpop.f32.mrb[76].mxu1  ;;  %5864 = vmatprep.mubr.bf16.mxu0 %v2635_v56 }
 0x580   : > { %v5532_v23 = vpop.f32.mrb[77].mxu1 }
 0x581   : > { %v5533_v28 = vadd.f32 %v5532_v23, %v5531_v16  ;;  %v5534_v55 = vpop.f32.mrb[78].mxu1 }
 0x582   : > { %v5535_v32 = vpop.f32.mrb[79].mxu1 }
 0x583   : > { %v5536_v45 = vadd.f32 %v5535_v32, %v5534_v55 }
 0x585   : > { %v2636_v7 = vpack.c.bf16 %v5536_v45, %v5533_v28 }
 0x587   : > { %v5537_v15 = vpop.f32.mrb[80].mxu1  ;;  %5865 = vmatmul.mubr.bf16.gmra.mrb[132].mxu0 %v2636_v7 }
 0x588   : > { %v5538_v9 = vpop.f32.mrb[81].mxu1 }
 0x589   : > { %v5539_v47 = vadd.f32 %v5538_v9, %v5537_v15  ;;  %v5540_v52 = vpop.f32.mrb[82].mxu1 }
 0x58a   : > { %v5541_v34 = vpop.f32.mrb[83].mxu1 }
 0x58b   : > { %v5542_v26 = vadd.f32 %v5541_v34, %v5540_v52 }
 0x58d   : > { %v2637_v25 = vpack.c.bf16 %v5542_v26, %v5539_v47 }
 0x58f   : > { %v5543_v46 = vpop.f32.mrb[84].mxu1  ;;  %5868 = vmatprep.mubr.bf16.mxu0 %v2637_v25 }
 0x590   : > { %v5544_v27 = vpop.f32.mrb[85].mxu1 }
 0x591   : > { %v5545_v11 = vadd.f32 %v5544_v27, %v5543_v46  ;;  %v5546_v51 = vpop.f32.mrb[86].mxu1 }
 0x592   : > { %v5547_v54 = vpop.f32.mrb[87].mxu1 }
 0x593   : > { %v5548_v20 = vadd.f32 %v5547_v54, %v5546_v51 }
 0x595   : > { %v2638_v13 = vpack.c.bf16 %v5548_v20, %v5545_v11 }
 0x597   : > { %v5549_v57 = vpop.f32.mrb[88].mxu1  ;;  %5869 = vmatmul.mubr.bf16.gmra.mrb[136].mxu0 %v2638_v13 }
 0x598   : > { %v5550_v18 = vpop.f32.mrb[89].mxu1 }
 0x599   : > { %v5551_v36 = vadd.f32 %v5550_v18, %v5549_v57  ;;  %v5552_v3 = vpop.f32.mrb[90].mxu1 }
 0x59a   : > { %v5553_v35 = vpop.f32.mrb[91].mxu1 }
 0x59b   : > { %v5554_v49 = vadd.f32 %v5553_v35, %v5552_v3 }
 0x59d   : > { %v2639_v6 = vpack.c.bf16 %v5554_v49, %v5551_v36 }
 0x59f   : > { %v5555_v17 = vpop.f32.mrb[92].mxu1  ;;  %5872 = vmatprep.mubr.bf16.mxu0 %v2639_v6  ;;  %v7897_v6 = vld [vmem:[%s9738_s7] ss:$0 sm:$0xff]  ;;  %s5286_s7 = sshll.u32 %s9817_s3, 3 }
 0x5a0   : > { %v5556_v40 = vpop.f32.mrb[93].mxu1  ;;  %s789_s0 = scalar_lea.vmem %s9516_s26, %s5286_s7 }
 0x5a1   : > { %v5557_v37 = vadd.f32 %v5556_v40, %v5555_v17  ;;  %v5558_v53 = vpop.f32.mrb[94].mxu1 }
 0x5a2   : > { %v5559_v21 = vpop.f32.mrb[95].mxu1 }
 0x5a3   : > { %v5560_v38 = vadd.f32 %v5559_v21, %v5558_v53 }
 0x5a5   : > { %v2640_v48 = vpack.c.bf16 %v5560_v38, %v5557_v37 }
 0x5a7   : > { %v5561_v33 = vpop.f32.mrb[96].mxu1  ;;  %5873 = vmatmul.mubr.bf16.gmra.mrb[140].mxu0 %v2640_v48 }
 0x5a8   : > { %v5562_v41 = vpop.f32.mrb[97].mxu1 }
 0x5a9   : > { %v5563_v50 = vadd.f32 %v5562_v41, %v5561_v33  ;;  %v5564_v44 = vpop.f32.mrb[98].mxu1  ;;  %v9739_v33 = vld [vmem:[#allocation2_spill] sm:$0xff] }
 0x5aa   : > { %v5565_v58 = vpop.f32.mrb[99].mxu1  ;;  %v9740_v41 = vmax.f32 %v9739_v33, 0.0 }
 0x5ab   : > { %v5566_v63 = vadd.f32 %v5565_v58, %v5564_v44  ;;  %v9741_v58 = vld [vmem:[#allocation5_spill] sm:$0xff] }
 0x5ad   : > { %v2641_v60 = vpack.c.bf16 %v5566_v63, %v5563_v50  ;;  %v9742_v63 = vmax.f32 %v9741_v58, 0.0 }
 0x5af   : > { %v5567_v8 = vpop.f32.mrb[100].mxu1  ;;  %5876 = vmatprep.mubr.bf16.mxu0 %v2641_v60 }
 0x5b0   : > { %v5568_v29 = vpop.f32.mrb[101].mxu1 }
 0x5b1   : > { %v5569_v30 = vadd.f32 %v5568_v29, %v5567_v8  ;;  %v5570_v24 = vpop.f32.mrb[102].mxu1  ;;  %v9743_v8 = vld [vmem:[#allocation3_spill] sm:$0xff] }
 0x5b2   : > { %v5571_v39 = vpop.f32.mrb[103].mxu1  ;;  %v9744_v29 = vmax.f32 %v9743_v8, 0.0 }
 0x5b3   : > { %v5572_v12 = vadd.f32 %v5571_v39, %v5570_v24  ;;  %v9745_v24 = vld [vmem:[#allocation4_spill] sm:$0xff] }
 0x5b4   : > { %v9746_v39 = vmax.f32 %v9745_v24, 0.0  ;;  %v9769_v24 = vld [vmem:[#allocation16_spill] sm:$0xff] }
 0x5b5   : > { %v2642_v42 = vpack.c.bf16 %v5572_v12, %v5569_v30 }
 0x5b7   : > { %v5573_v43 = vpop.f32.mrb[104].mxu1  ;;  %5877 = vmatmul.mubr.bf16.gmra.mrb[144].mxu0 %v2642_v42 }
 0x5b8   : > { %v5574_v2 = vpop.f32.mrb[105].mxu1 }
 0x5b9   : > { %v5575_v1 = vadd.f32 %v5574_v2, %v5573_v43  ;;  %v5576_v5 = vpop.f32.mrb[106].mxu1 }
 0x5ba   : > { %v5577_v31 = vpop.f32.mrb[107].mxu1 }
 0x5bb   : > { %v5578_v4 = vadd.f32 %v5577_v31, %v5576_v5 }
 0x5bd   : > { %v2643_v61 = vpack.c.bf16 %v5578_v4, %v5575_v1 }
 0x5bf   : > { %v5579_v59 = vpop.f32.mrb[108].mxu1  ;;  %5880 = vmatprep.mubr.bf16.mxu0 %v2643_v61  ;;  %v9747_v61 = vld [vmem:[#allocation7_spill] sm:$0xff] }
 0x5c0   : > { %v5580_v0 = vpop.f32.mrb[109].mxu1 }
 0x5c1   : > { %v5581_v62 = vadd.f32 %v5580_v0, %v5579_v59  ;;  %v5582_v19 = vpop.f32.mrb[110].mxu1  ;;  %v9748_v59 = vmax.f32 %v9747_v61, 0.0 }
 0x5c2   : > { %v5583_v10 = vpop.f32.mrb[111].mxu1 }
 0x5c3   : > { %v5584_v14 = vadd.f32 %v5583_v10, %v5582_v19  ;;  %v9749_v19 = vld [vmem:[#allocation9_spill] sm:$0xff] }
 0x5c4   : > { %v9750_v10 = vmax.f32 %v9749_v19, 0.0 }
 0x5c5   : > { %v2644_v22 = vpack.c.bf16 %v5584_v14, %v5581_v62 }
 0x5c7   : > { %5881 = vmatmul.mubr.bf16.gmra.mrb[148].mxu0 %v2644_v22  ;;  %v9751_v22 = vld [vmem:[#allocation6_spill] sm:$0xff] }
 0x609   : > { %v5585_v56 = vpop.f32.mrb[112].mxu1 }
 0x60a   : > { %v5586_v16 = vpop.f32.mrb[113].mxu1 }
 0x60b   : > { %v5587_v23 = vadd.f32 %v5586_v16, %v5585_v56  ;;  %v5588_v28 = vpop.f32.mrb[114].mxu1  ;;  %v9752_v56 = vmax.f32 %v9751_v22, 0.0  ;;  %v9773_v22 = vld [vmem:[#allocation21_spill] sm:$0xff] }
 0x60c   : > { %v5589_v55 = vpop.f32.mrb[115].mxu1 }
 0x60d   : > { %v5590_v32 = vadd.f32 %v5589_v55, %v5588_v28 }
 0x60f   : > { %v2645_v45 = vpack.c.bf16 %v5590_v32, %v5587_v23  ;;  %v9753_v23 = vld [vmem:[#allocation8_spill] sm:$0xff] }
 0x610   : > { %v9754_v28 = vmax.f32 %v9753_v23, 0.0 }
 0x611   : > { %v5591_v7 = vpop.f32.mrb[116].mxu1  ;;  %5884 = vmatprep.mubr.bf16.mxu0 %v2645_v45 }
 0x612   : > { %v5592_v15 = vpop.f32.mrb[117].mxu1 }
 0x613   : > { %v5593_v9 = vadd.f32 %v5592_v15, %v5591_v7  ;;  %v5594_v47 = vpop.f32.mrb[118].mxu1 }
 0x614   : > { %v5595_v52 = vpop.f32.mrb[119].mxu1 }
 0x615   : > { %v5596_v34 = vadd.f32 %v5595_v52, %v5594_v47 }
 0x617   : > { %v2646_v26 = vpack.c.bf16 %v5596_v34, %v5593_v9  ;;  %v9755_v34 = vld [vmem:[#allocation11_spill] sm:$0xff] }
 0x619   : > { %v5597_v25 = vpop.f32.mrb[120].mxu1  ;;  %5885 = vmatmul.mubr.bf16.gmra.mrb[152].mxu0 %v2646_v26  ;;  %v9756_v26 = vmax.f32 %v9755_v34, 0.0 }
 0x61a   : > { %v5598_v46 = vpop.f32.mrb[121].mxu1 }
 0x61b   : > { %v5599_v27 = vadd.f32 %v5598_v46, %v5597_v25  ;;  %v5600_v11 = vpop.f32.mrb[122].mxu1 }
 0x61c   : > { %v5601_v51 = vpop.f32.mrb[123].mxu1 }
 0x61d   : > { %v5602_v54 = vadd.f32 %v5601_v51, %v5600_v11 }
 0x61f   : > { %v2647_v20 = vpack.c.bf16 %v5602_v54, %v5599_v27  ;;  %v9757_v27 = vld [vmem:[#allocation13_spill] sm:$0xff]  ;;  %v9759_v54 = vld [vmem:[#allocation10_spill] sm:$0xff] }
 0x620   : > { %v9758_v11 = vmax.f32 %v9757_v27, 0.0 }
 0x621   : > { %v5603_v13 = vpop.f32.mrb[124].mxu1  ;;  %5888 = vmatprep.mubr.bf16.mxu0 %v2647_v20  ;;  %v9760_v20 = vmax.f32 %v9759_v54, 0.0 }
 0x622   : > { %v5604_v57 = vpop.f32.mrb[125].mxu1 }
 0x623   : > { %v5605_v18 = vadd.f32 %v5604_v57, %v5603_v13  ;;  %v5606_v36 = vpop.f32.mrb[126].mxu1  ;;  %v9761_v57 = vld [vmem:[#allocation12_spill] sm:$0xff] }
 0x624   : > { %v5607_v3 = vpop.f32.mrb[127].mxu1 }
 0x625   : > { %v5608_v35 = vadd.f32 %v5607_v3, %v5606_v36 }
 0x627   : > { %v2648_v49 = vpack.c.bf16 %v5608_v35, %v5605_v18  ;;  %v9762_v18 = vmax.f32 %v9761_v57, 0.0 }
 0x629   : > { %5889 = vmatmul.mubr.bf16.gmra.mrb[156].mxu0 %v2648_v49 }
 0x64a   : > { %v5862_v17 = vpop.f32.mrb[128].mxu0 }
 0x64b   : > { %v2754_v40 = vpop.f32.mrb[129].mxu0  ;;  %v2763_v38 = vadd.f32 %v5862_v17, %v7897_v6 }
 0x64c   : > { %v2755_v37 = vadd.f32 %v7897_v6, %v2754_v40  ;;  %v5863_v53 = vpop.f32.mrb[130].mxu0 }
 0x64d   : > { %v2757_v21 = vpop.f32.mrb[131].mxu0  ;;  %v2766_v44 = vadd.f32 %v5863_v53, %v7897_v6  ;;  %v7915_v30 = vadd.f32 %v2763_v38, %v9744_v29 }
 0x64e   : > { %v2758_v48 = vadd.f32 %v7897_v6, %v2757_v21  ;;  %v7904_v50 = vadd.f32 %v2755_v37, %v9740_v41  ;;  %v9763_v21 = vld [vmem:[#allocation15_spill] sm:$0xff]  ;;  %v9765_v41 = vld [vmem:[#allocation17_spill] sm:$0xff] }
 0x64f   : > { %v7920_v12 = vadd.f32 %v2766_v44, %v9746_v39  ;;  %v9764_v38 = vmax.f32 %v9763_v21, 0.0  ;;  %v9766_v44 = vmax.f32 %v9765_v41, 0.0  ;;  %v9770_v39 = vmax.f32 %v9769_v24, 0.0  ;;  %v9786_v21 = vld [vmem:[#allocation25_spill] sm:$0xff]  ;;  %v6108_v41 = vld [vmem:[%s9779_s4 + $0x8] sm:$0xff]  }
 0x650   : > { %2913 = vadd.xlane.f32.xlu0 %v7904_v50  ;;  %v7910_v60 = vadd.f32 %v2758_v48, %v9742_v63  ;;  %v9767_v63 = vld [vmem:[#allocation14_spill] sm:$0xff]  ;;  %v6112_v24 = vld [vmem:[%s9779_s4 + $0x28] sm:$0xff]  }
 0x651   : > { %v9768_v8 = vmax.f32 %v9767_v63, 0.0  ;;  %v6110_v63 = vld [vmem:[%s9779_s4 + $0x18] sm:$0xff]  }
 0x652   : > { %2915 = vadd.xlane.f32.xlu1 %v7910_v60 }
 0x654   : > { %2917 = vadd.xlane.f32.xlu0 %v7915_v30 }
 0x656   : > { %2919 = vadd.xlane.f32.xlu1 %v7920_v12 }
 0x65a   : > { %v5866_v42 = vpop.f32.mrb[132].mxu0 }
 0x65b   : > { %v2770_v43 = vpop.f32.mrb[133].mxu0  ;;  %v2779_v31 = vadd.f32 %v5866_v42, %v7897_v6 }
 0x65c   : > { %v2771_v2 = vadd.f32 %v7897_v6, %v2770_v43  ;;  %v5867_v1 = vpop.f32.mrb[134].mxu0 }
 0x65d   : > { %v2773_v5 = vpop.f32.mrb[135].mxu0  ;;  %v2782_v62 = vadd.f32 %v5867_v1, %v7897_v6  ;;  %v7939_v16 = vadd.f32 %v2779_v31, %v9752_v56  ;;  %v9774_v56 = vmax.f32 %v9773_v22, 0.0 }
 0x65e   : > { %v2774_v4 = vadd.f32 %v7897_v6, %v2773_v5  ;;  %v7928_v0 = vadd.f32 %v2771_v2, %v9748_v59  ;;  %v9771_v59 = vld [vmem:[#allocation19_spill] sm:$0xff] }
 0x65f   : > { %v7944_v55 = vadd.f32 %v2782_v62, %v9754_v28  ;;  %v9772_v62 = vmax.f32 %v9771_v59, 0.0  ;;  %v9775_v28 = vld [vmem:[#allocation18_spill] sm:$0xff] }
 0x660   : > { %2921 = vadd.xlane.f32.xlu0 %v7928_v0  ;;  %v7934_v14 = vadd.f32 %v2774_v4, %v9750_v10 }
 0x662   : > { %2923 = vadd.xlane.f32.xlu1 %v7934_v14 }
 0x664   : > { %2925 = vadd.xlane.f32.xlu0 %v7939_v16 }
 0x666   : > { %2927 = vadd.xlane.f32.xlu1 %v7944_v55 }
 0x66a   : > { %v5870_v32 = vpop.f32.mrb[136].mxu0 }
 0x66b   : > { %v2786_v45 = vpop.f32.mrb[137].mxu0  ;;  %v2795_v47 = vadd.f32 %v5870_v32, %v7897_v6  ;;  %v9776_v32 = vmax.f32 %v9775_v28, 0.0 }
 0x66c   : > { %v2787_v7 = vadd.f32 %v7897_v6, %v2786_v45  ;;  %v5871_v15 = vpop.f32.mrb[138].mxu0 }
 0x66d   : > { %v2789_v9 = vpop.f32.mrb[139].mxu0  ;;  %v2798_v46 = vadd.f32 %v5871_v15, %v7897_v6  ;;  %v7963_v13 = vadd.f32 %v2795_v47, %v9760_v20  ;;  %v6107_v47 = vld [vmem:[%s9779_s4] sm:$0xff]  }
 0x66e   : > { %v2790_v52 = vadd.f32 %v7897_v6, %v2789_v9  ;;  %v7952_v25 = vadd.f32 %v2787_v7, %v9756_v26  ;;  %v9777_v7 = vld [vmem:[#allocation20_spill] sm:$0xff]  ;;  %5892 = vmatprep.subr.bf16.mxu1 %v6107_v47  ;;  %v9780_v20 = vld [vmem:[#allocation22_spill] sm:$0xff] }
 0x66f   : > { %v7968_v36 = vadd.f32 %v2798_v46, %v9762_v18  ;;  %v9778_v15 = vmax.f32 %v9777_v7, 0.0  ;;  %5893 = vmatpush3.bf16.msra.mxu1 %v6107_v47  ;;  %v9781_v57 = vmax.f32 %v9780_v20, 0.0 }
 0x670   : > { %2929 = vadd.xlane.f32.xlu0 %v7952_v25  ;;  %v7958_v51 = vadd.f32 %v2790_v52, %v9758_v11  ;;  %5894 = vmatprep.subr.bf16.mxu1 %v6108_v41 }
 0x672   : > { %2931 = vadd.xlane.f32.xlu1 %v7958_v51 }
 0x673   : > { %5895 = vmatpush3.bf16.msra.mxu1 %v6108_v41 }
 0x674   : > { %2933 = vadd.xlane.f32.xlu0 %v7963_v13 }
 0x676   : > { %2935 = vadd.xlane.f32.xlu1 %v7968_v36 }
 0x67a   : > { %v5874_v3 = vpop.f32.mrb[140].mxu0 }
 0x67b   : > { %v2802_v35 = vpop.f32.mrb[141].mxu0  ;;  %v2811_v37 = vadd.f32 %v5874_v3, %v7897_v6 }
 0x67c   : > { %v2803_v49 = vadd.f32 %v7897_v6, %v2802_v35  ;;  %v5875_v17 = vpop.f32.mrb[142].mxu0  ;;  %v9782_v35 = vld [vmem:[#allocation24_spill] sm:$0xff] }
 0x67d   : > { %v2805_v40 = vpop.f32.mrb[143].mxu0  ;;  %v2814_v33 = vadd.f32 %v5875_v17, %v7897_v6  ;;  %v7987_v29 = vadd.f32 %v2811_v37, %v9768_v8  ;;  %v6111_v8 = vld [vmem:[%s9779_s4 + $0x20] sm:$0xff]  }
 0x67e   : > { %v2806_v53 = vadd.f32 %v7897_v6, %v2805_v40  ;;  %v7976_v48 = vadd.f32 %v2803_v49, %v9764_v38  ;;  %v9783_v49 = vmax.f32 %v9782_v35, 0.0  ;;  %v9784_v40 = vld [vmem:[#allocation23_spill] sm:$0xff]  ;;  %v9787_v38 = vmax.f32 %v9786_v21, 0.0 }
 0x67f   : > { %v7992_v42 = vadd.f32 %v2814_v33, %v9770_v39  ;;  %v9785_v37 = vmax.f32 %v9784_v40, 0.0  ;;  %v9788_v39 = vlaneseq  ;;  %v9789_v21 = vld [vmem:[#allocation27_spill] sm:$0xff] }
 0x680   : > { %2937 = vadd.xlane.f32.xlu0 %v7976_v48  ;;  %v7982_v58 = vadd.f32 %v2806_v53, %v9766_v44  ;;  %v6109_v44 = vld [vmem:[%s9779_s4 + $0x10] sm:$0xff]  }
 0x681   : > { %5896 = vmatprep.subr.bf16.mxu1 %v6109_v44 }
 0x682   : > { %2939 = vadd.xlane.f32.xlu1 %v7982_v58  ;;  %5897 = vmatpush3.bf16.msra.mxu1 %v6109_v44 }
 0x683   : > { %5898 = vmatprep.subr.bf16.mxu1 %v6110_v63 }
 0x684   : > { %2941 = vadd.xlane.f32.xlu0 %v7987_v29 }
 0x686   : > { %2943 = vadd.xlane.f32.xlu1 %v7992_v42  ;;  %5899 = vmatpush3.bf16.msra.mxu1 %v6110_v63 }
 0x687   : > { %5900 = vmatprep.subr.bf16.mxu1 %v6111_v8 }
 0x68a   : > { %v5878_v43 = vpop.f32.mrb[144].mxu0  ;;  %5901 = vmatpush3.bf16.msra.mxu1 %v6111_v8 }
 0x68b   : > { %v2818_v2 = vpop.f32.mrb[145].mxu0  ;;  %v2827_v4 = vadd.f32 %v5878_v43, %v7897_v6  ;;  %5902 = vmatprep.subr.bf16.mxu1 %v6112_v24  ;;  %v8062_v43 = vand.u32 127, %v9788_v39  ;;  %v9791_v39 = vld [vmem:[#allocation29_spill] sm:$0xff] }
 0x68c   : > { %v2819_v1 = vadd.f32 %v7897_v6, %v2818_v2  ;;  %v5879_v5 = vpop.f32.mrb[146].mxu0 }
 0x68d   : > { %v2821_v31 = vpop.f32.mrb[147].mxu0  ;;  %v2830_v10 = vadd.f32 %v5879_v5, %v7897_v6  ;;  %v8011_v45 = vadd.f32 %v2827_v4, %v9776_v32  ;;  %vm793_vm0 = vcmp.lt.s32.totalorder %v8062_v43, 32  ;;  %v9619_v5 = vmov 0.0  }
 0x68e   : > { %v2822_v61 = vadd.f32 %v7897_v6, %v2821_v31  ;;  %v8000_v19 = vadd.f32 %v2819_v1, %v9772_v62  ;;  %5903 = vmatpush3.bf16.msra.mxu1 %v6112_v24  ;;  %v8066_v31 = vsel %vm793_vm0, 1.0, %v9619_v5  ;;  %vm5213_vm2 = vcmp.ge.s32.totalorder %v8062_v43, 16 }
 0x68f   : > { %v8016_v9 = vadd.f32 %v2830_v10, %v9778_v15  ;;  %vm5214_vm3 = vcmp.lt.s32.totalorder %v8062_v43, 20 }
 0x690   : > { %2945 = vadd.xlane.f32.xlu0 %v8000_v19  ;;  %v8006_v23 = vadd.f32 %v2822_v61, %v9774_v56  ;;  %vm5215_vm4 = vmand %vm5213_vm2, %vm5214_vm3 }
 0x692   : > { %2947 = vadd.xlane.f32.xlu1 %v8006_v23 }
 0x694   : > { %2949 = vadd.xlane.f32.xlu0 %v8011_v45 }
 0x696   : > { %2951 = vadd.xlane.f32.xlu1 %v8016_v9 }
 0x69a   : > { %v5882_v52 = vpop.f32.mrb[148].mxu0 }
 0x69b   : > { %v2843_v34 = vadd.f32 %v5882_v52, %v7897_v6  ;;  %v2834_v26 = vpop.f32.mrb[149].mxu0 }
 0x69c   : > { %v5883_v46 = vpop.f32.mrb[150].mxu0  ;;  %v2835_v27 = vadd.f32 %v7897_v6, %v2834_v26 }
 0x69d   : > { %v2846_v11 = vadd.f32 %v5883_v46, %v7897_v6  ;;  %v2837_v54 = vpop.f32.mrb[151].mxu0  ;;  %v8027_v18 = vadd.f32 %v2843_v34, %v9781_v57 }
 0x69e   : > { %v2838_v3 = vadd.f32 %v7897_v6, %v2837_v54  ;;  %v8038_v53 = vadd.f32 %v2835_v27, %v9785_v37 }
 0x69f   : > { %2957 = vadd.xlane.f32.xlu0 %v8027_v18  ;;  %v8033_v17 = vadd.f32 %v2846_v11, %v9783_v49 }
 0x6a0   : > { %v8043_v33 = vadd.f32 %v2838_v3, %v9787_v38  ;;  %v9790_v38 = vmax.f32 %v9789_v21, 0.0 }
 0x6a1   : > { %2959 = vadd.xlane.f32.xlu1 %v8033_v17 }
 0x6a3   : > { %2953 = vadd.xlane.f32.xlu0 %v8038_v53 }
 0x6a5   : > { %2955 = vadd.xlane.f32.xlu1 %v8043_v33 }
 0x6dd   : > { %v2914_v2 = vpop.xlane.xlu0 %2913 }
 0x6de   : > { %v2977_v1 = vmul.f32 0.03125, %v2914_v2  ;;  %v9792_v2 = vmax.f32 %v9791_v39, 0.0 }
 0x6df   : > { %v2916_v4 = vpop.xlane.xlu1 %2915 }
 0x6e0   : > { %v3009_v61 = vsub.f32 %v7904_v50, %v2977_v1  ;;  %v2978_v59 = vmul.f32 0.03125, %v2916_v4 }
 0x6e1   : > { %v2918_v62 = vpop.xlane.xlu0 %2917 }
 0x6e2   : > { %v3010_v10 = vsub.f32 %v7910_v60, %v2978_v59  ;;  %v2979_v22 = vmul.f32 0.03125, %v2918_v62  ;;  %v8071_v56 = vmul.f32 %v8066_v31, %v3009_v61  ;;  %v9793_v59 = vld [vmem:[#allocation26_spill] sm:$0xff] }
 0x6e3   : > { %v2920_v28 = vpop.xlane.xlu1 %2919  ;;  %v9794_v62 = vmax.f32 %v9793_v59, 0.0 }
 0x6e4   : > { %v3011_v32 = vsub.f32 %v7915_v30, %v2979_v22  ;;  %v2980_v7 = vmul.f32 0.03125, %v2920_v28  ;;  %v3073_v15 = vmul.f32 %v8071_v56, %v8071_v56  ;;  %v8077_v47 = vmul.f32 %v8066_v31, %v3010_v10  ;;  %v9795_v28 = vld [vmem:[#allocation28_spill] sm:$0xff] }
 0x6e6   : > { %v3012_v50 = vsub.f32 %v7920_v12, %v2980_v7  ;;  %3105 = vadd.xlane.f32.xlu0 %v3073_v15  ;;  %v3074_v60 = vmul.f32 %v8077_v47, %v8077_v47  ;;  %v8083_v52 = vmul.f32 %v8066_v31, %v3011_v32  ;;  %v9796_v32 = vmax.f32 %v9795_v28, 0.0 }
 0x6e8   : > { %3107 = vadd.xlane.f32.xlu1 %v3074_v60  ;;  %v3075_v30 = vmul.f32 %v8083_v52, %v8083_v52  ;;  %v8088_v34 = vmul.f32 %v8066_v31, %v3012_v50 }
 0x6ea   : > { %3109 = vadd.xlane.f32.xlu0 %v3075_v30  ;;  %v3076_v26 = vmul.f32 %v8088_v34, %v8088_v34  ;;  %v6113_v30 = vld [vmem:[%s9779_s4 + $0x30] sm:$0xff]  }
 0x6eb   : > { %5904 = vmatprep.subr.bf16.mxu1 %v6113_v30 }
 0x6ec   : > { %3111 = vadd.xlane.f32.xlu1 %v3076_v26  ;;  %v5886_v12 = vpop.f32.mrb[152].mxu0  ;;  %5905 = vmatpush3.bf16.msra.mxu1 %v6113_v30 }
 0x6ed   : > { %v2922_v46 = vpop.xlane.xlu0 %2921  ;;  %v2850_v27 = vpop.f32.mrb[153].mxu0  ;;  %v2859_v57 = vadd.f32 %v5886_v12, %v7897_v6 }
 0x6ee   : > { %v2981_v11 = vmul.f32 0.03125, %v2922_v46  ;;  %v2851_v54 = vadd.f32 %v7897_v6, %v2850_v27  ;;  %v5887_v20 = vpop.f32.mrb[154].mxu0 }
 0x6ef   : > { %v2924_v3 = vpop.xlane.xlu1 %2923  ;;  %v2853_v35 = vpop.f32.mrb[155].mxu0  ;;  %v2862_v63 = vadd.f32 %v5887_v20, %v7897_v6  ;;  %v8111_v10 = vadd.f32 %v2859_v57, %v9794_v62  ;;  %v9801_v62 = vld [vmem:[#allocation30_spill] sm:$0xff] }
 0x6f0   : > { %v3013_v49 = vsub.f32 %v7928_v0, %v2981_v11  ;;  %v2982_v40 = vmul.f32 0.03125, %v2924_v3  ;;  %v2854_v37 = vadd.f32 %v7897_v6, %v2853_v35  ;;  %v8098_v41 = vadd.f32 %v2851_v54, %v9790_v38 }
 0x6f1   : > { %v2926_v44 = vpop.xlane.xlu0 %2925  ;;  %v8120_v7 = vadd.f32 %v2862_v63, %v9796_v32 }
 0x6f2   : > { %v3014_v8 = vsub.f32 %v7934_v14, %v2982_v40  ;;  %v2983_v24 = vmul.f32 0.03125, %v2926_v44  ;;  %2961 = vadd.xlane.f32.xlu0 %v8098_v41  ;;  %v8105_v1 = vadd.f32 %v2854_v37, %v9792_v2  ;;  %v8114_v22 = vmul.f32 %v8066_v31, %v3013_v49  ;;  %v9797_v37 = vld [vmem:[#allocation31_spill] sm:$0xff]  ;;  %v9799_v2 = vld [vmem:[#allocation33_spill] sm:$0xff] }
 0x6f3   : > { %v2928_v0 = vpop.xlane.xlu1 %2927  ;;  %v9798_v21 = vmax.f32 %v9797_v37, 0.0 }
 0x6f4   : > { %v3015_v4 = vsub.f32 %v7939_v16, %v2983_v24  ;;  %v2984_v61 = vmul.f32 0.03125, %v2928_v0  ;;  %2963 = vadd.xlane.f32.xlu1 %v8105_v1  ;;  %v8123_v16 = vmul.f32 %v8066_v31, %v3014_v8  ;;  %v3077_v50 = vmul.f32 %v8114_v22, %v8114_v22 }
 0x6f5   : > { %v9800_v0 = vmax.f32 %v9799_v2, 0.0 }
 0x6f6   : > { %v3016_v14 = vsub.f32 %v7944_v55, %v2984_v61  ;;  %2965 = vadd.xlane.f32.xlu0 %v8111_v10  ;;  %v8126_v15 = vmul.f32 %v8066_v31, %v3015_v4  ;;  %v3078_v55 = vmul.f32 %v8123_v16, %v8123_v16 }
 0x6f8   : > { %2967 = vadd.xlane.f32.xlu1 %v8120_v7  ;;  %v8132_v60 = vmul.f32 %v8066_v31, %v3016_v14  ;;  %v3079_v12 = vmul.f32 %v8126_v15, %v8126_v15  ;;  %v9802_v14 = vmax.f32 %v9801_v62, 0.0 }
 0x6fa   : > { %3113 = vadd.xlane.f32.xlu0 %v3077_v50  ;;  %v3080_v57 = vmul.f32 %v8132_v60, %v8132_v60 }
 0x6fc   : > { %v5890_v26 = vpop.f32.mrb[156].mxu0  ;;  %3115 = vadd.xlane.f32.xlu1 %v3078_v55 }
 0x6fd   : > { %v2930_v46 = vpop.xlane.xlu0 %2929  ;;  %v2866_v27 = vpop.f32.mrb[157].mxu0  ;;  %v2875_v3 = vadd.f32 %v5890_v26, %v7897_v6 }
 0x6fe   : > { %v2985_v11 = vmul.f32 0.03125, %v2930_v46  ;;  %v2867_v54 = vadd.f32 %v7897_v6, %v2866_v27  ;;  %3117 = vadd.xlane.f32.xlu0 %v3079_v12  ;;  %v5891_v20 = vpop.f32.mrb[158].mxu0 }
 0x6ff   : > { %v2932_v35 = vpop.xlane.xlu1 %2931  ;;  %v2869_v49 = vpop.f32.mrb[159].mxu0  ;;  %v2878_v24 = vadd.f32 %v5891_v20, %v7897_v6  ;;  %v8163_v28 = vadd.f32 %v2875_v3, %v9802_v14 }
 0x700   : > { %v3017_v40 = vsub.f32 %v7952_v25, %v2985_v11  ;;  %v8148_v38 = vadd.f32 %v2867_v54, %v9798_v21  ;;  %v2986_v44 = vmul.f32 0.03125, %v2932_v35  ;;  %v2870_v63 = vadd.f32 %v7897_v6, %v2869_v49  ;;  %3119 = vadd.xlane.f32.xlu1 %v3080_v57 }
 0x701   : > { %v2934_v8 = vpop.xlane.xlu0 %2933 }
 0x702   : > { %v3018_v39 = vsub.f32 %v7958_v51, %v2986_v44  ;;  %v8155_v4 = vadd.f32 %v2870_v63, %v9800_v0  ;;  %v2987_v61 = vmul.f32 0.03125, %v2934_v8  ;;  %2969 = vadd.xlane.f32.xlu0 %v8148_v38  ;;  %v8159_v59 = vmul.f32 %v8066_v31, %v3017_v40  ;;  %v9803_v51 = vld [vmem:[#allocation32_spill] sm:$0xff] }
 0x703   : > { %v2936_v25 = vpop.xlane.xlu1 %2935  ;;  %v9804_v50 = vmax.f32 %v9803_v51, 0.0 }
 0x704   : > { %v3019_v32 = vsub.f32 %v7963_v13, %v2987_v61  ;;  %v2988_v6 = vmul.f32 0.03125, %v2936_v25  ;;  %2971 = vadd.xlane.f32.xlu1 %v8155_v4  ;;  %v8172_v30 = vmul.f32 %v8066_v31, %v3018_v39  ;;  %v3081_v13 = vmul.f32 %v8159_v59, %v8159_v59 }
 0x705   : > { %v8169_v55 = vadd.f32 %v2878_v24, %v9804_v50 }
 0x706   : > { %v3020_v26 = vsub.f32 %v7968_v36, %v2988_v6  ;;  %2973 = vadd.xlane.f32.xlu0 %v8163_v28  ;;  %v8177_v12 = vmul.f32 %v8066_v31, %v3019_v32  ;;  %v3082_v27 = vmul.f32 %v8172_v30, %v8172_v30  ;;  %v6114_v36 = vld [vmem:[%s9779_s4 + $0x38] sm:$0xff]  }
 0x707   : > { %5906 = vmatprep.subr.bf16.mxu1 %v6114_v36 }
 0x708   : > { %2975 = vadd.xlane.f32.xlu1 %v8169_v55  ;;  %v8183_v46 = vmul.f32 %v8066_v31, %v3020_v26  ;;  %v3083_v11 = vmul.f32 %v8177_v12, %v8177_v12  ;;  %5907 = vmatpush3.bf16.msra.mxu1 %v6114_v36 }
 0x709   : > { %5988 = vmatprep.subr.bf16.mxu1 %v9619_v5 }
 0x70a   : > { %3121 = vadd.xlane.f32.xlu0 %v3081_v13  ;;  %v3084_v57 = vmul.f32 %v8183_v46, %v8183_v46 }
 0x70c   : > { %3123 = vadd.xlane.f32.xlu1 %v3082_v27 }
 0x70d   : > { %v2938_v54 = vpop.xlane.xlu0 %2937 }
 0x70e   : > { %v2989_v20 = vmul.f32 0.03125, %v2938_v54  ;;  %3125 = vadd.xlane.f32.xlu0 %v3083_v11 }
 0x70f   : > { %v2940_v3 = vpop.xlane.xlu1 %2939 }
 0x710   : > { %v3021_v35 = vsub.f32 %v7976_v48, %v2989_v20  ;;  %v2990_v49 = vmul.f32 0.03125, %v2940_v3  ;;  %3127 = vadd.xlane.f32.xlu1 %v3084_v57 }
 0x711   : > { %v2942_v40 = vpop.xlane.xlu0 %2941 }
 0x712   : > { %v8197_v37 = vmul.f32 %v8066_v31, %v3021_v35  ;;  %v3022_v21 = vsub.f32 %v7982_v58, %v2990_v49  ;;  %v2991_v44 = vmul.f32 0.03125, %v2942_v40 }
 0x713   : > { %v2944_v63 = vpop.xlane.xlu1 %2943 }
 0x714   : > { %v8201_v8 = vmul.f32 %v8066_v31, %v3022_v21  ;;  %v3023_v24 = vsub.f32 %v7987_v29, %v2991_v44  ;;  %v2992_v39 = vmul.f32 0.03125, %v2944_v63  ;;  %v3085_v2 = vmul.f32 %v8197_v37, %v8197_v37 }
 0x716   : > { %v8207_v48 = vmul.f32 %v8066_v31, %v3023_v24  ;;  %v3024_v0 = vsub.f32 %v7992_v42, %v2992_v39  ;;  %3129 = vadd.xlane.f32.xlu0 %v3085_v2  ;;  %v3086_v58 = vmul.f32 %v8201_v8, %v8201_v8 }
 0x718   : > { %v8213_v61 = vmul.f32 %v8066_v31, %v3024_v0  ;;  %3131 = vadd.xlane.f32.xlu1 %v3086_v58  ;;  %v3087_v29 = vmul.f32 %v8207_v48, %v8207_v48 }
 0x71a   : > { %3133 = vadd.xlane.f32.xlu0 %v3087_v29  ;;  %v3088_v25 = vmul.f32 %v8213_v61, %v8213_v61 }
 0x71c   : > { %3135 = vadd.xlane.f32.xlu1 %v3088_v25 }
 0x71d   : > { %v2946_v62 = vpop.xlane.xlu0 %2945 }
 0x71e   : > { %v2993_v14 = vmul.f32 0.03125, %v2946_v62 }
 0x71f   : > { %v2948_v32 = vpop.xlane.xlu1 %2947 }
 0x720   : > { %v3025_v42 = vsub.f32 %v8000_v19, %v2993_v14  ;;  %v2994_v6 = vmul.f32 0.03125, %v2948_v32 }
 0x721   : > { %v2950_v51 = vpop.xlane.xlu0 %2949 }
 0x722   : > { %v8221_v50 = vmul.f32 %v8066_v31, %v3025_v42  ;;  %v3026_v26 = vsub.f32 %v8006_v23, %v2994_v6  ;;  %v2995_v13 = vmul.f32 0.03125, %v2950_v51 }
 0x723   : > { %v2952_v27 = vpop.xlane.xlu1 %2951 }
 0x724   : > { %v8225_v36 = vmul.f32 %v8066_v31, %v3026_v26  ;;  %v3027_v11 = vsub.f32 %v8011_v45, %v2995_v13  ;;  %v2996_v54 = vmul.f32 0.03125, %v2952_v27  ;;  %v3089_v20 = vmul.f32 %v8221_v50, %v8221_v50 }
 0x726   : > { %v8231_v19 = vmul.f32 %v8066_v31, %v3027_v11  ;;  %v3028_v57 = vsub.f32 %v8016_v9, %v2996_v54  ;;  %3137 = vadd.xlane.f32.xlu0 %v3089_v20  ;;  %v3090_v23 = vmul.f32 %v8225_v36, %v8225_v36 }
 0x728   : > { %v8237_v3 = vmul.f32 %v8066_v31, %v3028_v57  ;;  %3139 = vadd.xlane.f32.xlu1 %v3090_v23  ;;  %v3091_v45 = vmul.f32 %v8231_v19, %v8231_v19 }
 0x72a   : > { %3141 = vadd.xlane.f32.xlu0 %v3091_v45  ;;  %v3092_v35 = vmul.f32 %v8237_v3, %v8237_v3 }
 0x72c   : > { %v2958_v49 = vpop.xlane.xlu0 %2957  ;;  %3143 = vadd.xlane.f32.xlu1 %v3092_v35 }
 0x72d   : > { %v2999_v21 = vmul.f32 0.03125, %v2958_v49 }
 0x72e   : > { %v2960_v40 = vpop.xlane.xlu1 %2959 }
 0x72f   : > { %v3000_v44 = vmul.f32 0.03125, %v2960_v40  ;;  %v3031_v39 = vsub.f32 %v8027_v18, %v2999_v21 }
 0x730   : > { %v2954_v9 = vpop.xlane.xlu0 %2953 }
 0x731   : > { %v2997_v63 = vmul.f32 0.03125, %v2954_v9  ;;  %v3032_v58 = vsub.f32 %v8033_v17, %v3000_v44  ;;  %v8251_v62 = vmul.f32 %v8066_v31, %v3031_v39  ;;  %v8270_v9 = vld [vmem:[%s9805_s28] ss:$0 sm:$0xff] }
 0x732   : > { %v2956_v24 = vpop.xlane.xlu1 %2955 }
 0x733   : > { %v3029_v2 = vsub.f32 %v8038_v53, %v2997_v63  ;;  %v2998_v0 = vmul.f32 0.03125, %v2956_v24  ;;  %v8259_v18 = vmul.f32 %v8066_v31, %v3032_v58  ;;  %v3095_v53 = vmul.f32 %v8251_v62, %v8251_v62 }
 0x735   : > { %v8247_v29 = vmul.f32 %v8066_v31, %v3029_v2  ;;  %v3030_v25 = vsub.f32 %v8043_v33, %v2998_v0  ;;  %v3096_v33 = vmul.f32 %v8259_v18, %v8259_v18 }
 0x737   : > { %v8254_v14 = vmul.f32 %v8066_v31, %v3030_v25  ;;  %v3093_v32 = vmul.f32 %v8247_v29, %v8247_v29 }
 0x739   : > { %3145 = vadd.xlane.f32.xlu0 %v3093_v32  ;;  %v3094_v17 = vmul.f32 %v8254_v14, %v8254_v14 }
 0x73b   : > { %3147 = vadd.xlane.f32.xlu1 %v3094_v17 }
 0x73d   : > { %3149 = vadd.xlane.f32.xlu0 %v3095_v53 }
 0x73f   : > { %3151 = vadd.xlane.f32.xlu1 %v3096_v33 }
 0x773   : > { %v3106_v42 = vpop.xlane.xlu0 %3105 }
 0x774   : > { %v3169_v6 = vmul.f32 0.03125, %v3106_v42 }
 0x775   : > { %v3108_v51 = vpop.xlane.xlu1 %3107 }
 0x776   : > { %v3201_v26 = vadd.f32 1e-05, %v3169_v6  ;;  %v3170_v13 = vmul.f32 0.03125, %v3108_v51 }
 0x777   : > { %v3110_v27 = vpop.xlane.xlu0 %3109 }
 0x778   : > { %6363 = vrsqrt.f32 %v3201_v26  ;;  %v3202_v11 = vadd.f32 1e-05, %v3170_v13  ;;  %v3171_v54 = vmul.f32 0.03125, %v3110_v27 }
 0x779   : > { %v3112_v20 = vpop.xlane.xlu1 %3111 }
 0x77a   : > { %6365 = vrsqrt.f32 %v3202_v11  ;;  %v3203_v57 = vadd.f32 1e-05, %v3171_v54  ;;  %v3172_v23 = vmul.f32 0.03125, %v3112_v20 }
 0x77c   : > { %6367 = vrsqrt.f32 %v3203_v57  ;;  %v3204_v45 = vadd.f32 1e-05, %v3172_v23 }
 0x77e   : > { %6369 = vrsqrt.f32 %v3204_v45 }
 0x77f   : > { %v2962_v35 = vpop.xlane.xlu0 %2961 }
 0x780   : > { %v3001_v49 = vmul.f32 0.03125, %v2962_v35 }
 0x781   : > { %v2964_v40 = vpop.xlane.xlu1 %2963 }
 0x782   : > { %v6364_v21 = vpop.eup %6363  ;;  %v3033_v44 = vsub.f32 %v8098_v41, %v3001_v49  ;;  %v3002_v63 = vmul.f32 0.03125, %v2964_v40 }
 0x783   : > { %v2966_v24 = vpop.xlane.xlu0 %2965  ;;  %v3265_v39 = vmul.f32 %v6364_v21, %v8071_v56 }
 0x784   : > { %v6366_v2 = vpop.eup %6365  ;;  %v8275_v0 = vmul.f32 %v8066_v31, %v3033_v44  ;;  %v3034_v58 = vsub.f32 %v8105_v1, %v3002_v63  ;;  %v3003_v25 = vmul.f32 0.03125, %v2966_v24  ;;  %v8289_v1 = vld [vmem:[%s9806_s9] ss:$0 sm:$0xff] }
 0x785   : > { %v2968_v32 = vpop.xlane.xlu1 %2967  ;;  %v3266_v17 = vmul.f32 %v6366_v2, %v8077_v47  ;;  %v3304_v53 = vmul.f32 %v8270_v9, %v3265_v39 }
 0x786   : > { %v6368_v33 = vpop.eup %6367  ;;  %v8281_v42 = vmul.f32 %v8066_v31, %v3034_v58  ;;  %v3035_v41 = vsub.f32 %v8111_v10, %v3003_v25  ;;  %v3004_v6 = vmul.f32 0.03125, %v2968_v32  ;;  %v3097_v56 = vmul.f32 %v8275_v0, %v8275_v0 }
 0x787   : > { %v3267_v51 = vmul.f32 %v6368_v33, %v8083_v52  ;;  %v3114_v47 = vpop.xlane.xlu0 %3113  ;;  %v3305_v26 = vmul.f32 %v8270_v9, %v3266_v17  ;;  %v8302_v52 = vadd.f32 %v8289_v1, %v3304_v53 }
 0x788   : > { %v6370_v13 = vpop.eup %6369  ;;  %v8294_v27 = vmul.f32 %v8066_v31, %v3035_v41  ;;  %v3036_v10 = vsub.f32 %v8120_v7, %v3004_v6  ;;  %v3173_v11 = vmul.f32 0.03125, %v3114_v47  ;;  %3153 = vadd.xlane.f32.xlu0 %v3097_v56  ;;  %v3098_v54 = vmul.f32 %v8281_v42, %v8281_v42 }
 0x789   : > { %v3306_v20 = vmul.f32 %v8270_v9, %v3267_v51  ;;  %v3268_v57 = vmul.f32 %v6370_v13, %v8088_v34  ;;  %v3116_v23 = vpop.xlane.xlu1 %3115  ;;  %v8305_v45 = vadd.f32 %v8289_v1, %v3305_v26 }
 0x78a   : > { %v8308_v35 = vmul.f32 %v8066_v31, %v3036_v10  ;;  %v3205_v7 = vadd.f32 1e-05, %v3173_v11  ;;  %v3174_v49 = vmul.f32 0.03125, %v3116_v23  ;;  %3155 = vadd.xlane.f32.xlu1 %v3098_v54  ;;  %v3099_v40 = vmul.f32 %v8294_v27, %v8294_v27 }
 0x78b   : > { %v3307_v21 = vmul.f32 %v8270_v9, %v3268_v57  ;;  %v3118_v44 = vpop.xlane.xlu0 %3117  ;;  %v3375_v34 = vpack.c.bf16 %v8305_v45, %v8302_v52  ;;  %v8318_v58 = vadd.f32 %v8289_v1, %v3306_v20 }
 0x78c   : > { %6371 = vrsqrt.f32 %v3205_v7  ;;  %v3206_v63 = vadd.f32 1e-05, %v3174_v49  ;;  %v3175_v24 = vmul.f32 0.03125, %v3118_v44  ;;  %3157 = vadd.xlane.f32.xlu0 %v3099_v40  ;;  %v3100_v39 = vmul.f32 %v8308_v35, %v8308_v35 }
 0x78d   : > { %5908 = vmatprep.mubr.bf16.mxu1 %v3375_v34  ;;  %v3120_v2 = vpop.xlane.xlu1 %3119  ;;  %v8321_v25 = vadd.f32 %v8289_v1, %v3307_v21 }
 0x78e   : > { %6373 = vrsqrt.f32 %v3206_v63  ;;  %v3207_v32 = vadd.f32 1e-05, %v3175_v24  ;;  %v3176_v17 = vmul.f32 0.03125, %v3120_v2  ;;  %3159 = vadd.xlane.f32.xlu1 %v3100_v39 }
 0x78f   : > { %v2970_v53 = vpop.xlane.xlu0 %2969  ;;  %v3376_v33 = vpack.c.bf16 %v8321_v25, %v8318_v58 }
 0x790   : > { %6375 = vrsqrt.f32 %v3207_v32  ;;  %v3208_v41 = vadd.f32 1e-05, %v3176_v17  ;;  %v3005_v6 = vmul.f32 0.03125, %v2970_v53 }
 0x791   : > { %5909 = vmatmul.mubr.bf16.vlgmr.msra.gmra.mrb[128].mxu1 %v3376_v33  ;;  %v2972_v56 = vpop.xlane.xlu1 %2971 }
 0x792   : > { %6377 = vrsqrt.f32 %v3208_v41  ;;  %v3037_v51 = vsub.f32 %v8148_v38, %v3005_v6  ;;  %v3006_v47 = vmul.f32 0.03125, %v2972_v56 }
 0x793   : > { %v2974_v26 = vpop.xlane.xlu0 %2973 }
 0x794   : > { %v8327_v13 = vmul.f32 %v8066_v31, %v3037_v51  ;;  %v3038_v10 = vsub.f32 %v8155_v4, %v3006_v47  ;;  %v3007_v11 = vmul.f32 0.03125, %v2974_v26 }
 0x795   : > { %v2976_v54 = vpop.xlane.xlu1 %2975 }
 0x796   : > { %v6372_v20 = vpop.eup %6371  ;;  %v8331_v57 = vmul.f32 %v8066_v31, %v3038_v10  ;;  %v3039_v23 = vsub.f32 %v8163_v28, %v3007_v11  ;;  %v3008_v7 = vmul.f32 0.03125, %v2976_v54  ;;  %v3101_v49 = vmul.f32 %v8327_v13, %v8327_v13 }
 0x797   : > { %v3122_v38 = vpop.xlane.xlu0 %3121  ;;  %v3269_v40 = vmul.f32 %v6372_v20, %v8114_v22 }
 0x798   : > { %v6374_v21 = vpop.eup %6373  ;;  %v8338_v44 = vmul.f32 %v8066_v31, %v3039_v23  ;;  %v3040_v4 = vsub.f32 %v8169_v55, %v3008_v7  ;;  %v3177_v34 = vmul.f32 0.03125, %v3122_v38  ;;  %3161 = vadd.xlane.f32.xlu0 %v3101_v49  ;;  %v3102_v63 = vmul.f32 %v8331_v57, %v8331_v57 }
 0x799   : > { %v3124_v24 = vpop.xlane.xlu1 %3123  ;;  %v3270_v28 = vmul.f32 %v6374_v21, %v8123_v16  ;;  %v3308_v39 = vmul.f32 %v8270_v9, %v3269_v40 }
 0x79a   : > { %v6376_v2 = vpop.eup %6375  ;;  %v8346_v32 = vmul.f32 %v8066_v31, %v3040_v4  ;;  %v3209_v22 = vadd.f32 1e-05, %v3177_v34  ;;  %v3178_v17 = vmul.f32 0.03125, %v3124_v24  ;;  %3163 = vadd.xlane.f32.xlu1 %v3102_v63  ;;  %v3103_v55 = vmul.f32 %v8338_v44, %v8338_v44 }
 0x79b   : > { %v3126_v53 = vpop.xlane.xlu0 %3125  ;;  %v3309_v33 = vmul.f32 %v8270_v9, %v3270_v28  ;;  %v3271_v41 = vmul.f32 %v6376_v2, %v8126_v15  ;;  %v8355_v26 = vadd.f32 %v8289_v1, %v3308_v39 }
 0x79c   : > { %v6378_v6 = vpop.eup %6377  ;;  %6379 = vrsqrt.f32 %v3209_v22  ;;  %v3210_v16 = vadd.f32 1e-05, %v3178_v17  ;;  %v3179_v56 = vmul.f32 0.03125, %v3126_v53  ;;  %3165 = vadd.xlane.f32.xlu0 %v3103_v55  ;;  %v3104_v51 = vmul.f32 %v8346_v32, %v8346_v32 }
 0x79d   : > { %v3128_v47 = vpop.xlane.xlu1 %3127  ;;  %v8358_v10 = vadd.f32 %v8289_v1, %v3309_v33  ;;  %v3272_v11 = vmul.f32 %v6378_v6, %v8132_v60  ;;  %v3310_v54 = vmul.f32 %v8270_v9, %v3271_v41 }
 0x79e   : > { %6381 = vrsqrt.f32 %v3210_v16  ;;  %v3211_v15 = vadd.f32 1e-05, %v3179_v56  ;;  %v3180_v20 = vmul.f32 0.03125, %v3128_v47  ;;  %3167 = vadd.xlane.f32.xlu1 %v3104_v51 }
 0x79f   : > { %v3377_v23 = vpack.c.bf16 %v8358_v10, %v8355_v26  ;;  %v3311_v7 = vmul.f32 %v8270_v9, %v3272_v11  ;;  %v8366_v38 = vadd.f32 %v8289_v1, %v3310_v54 }
 0x7a0   : > { %6383 = vrsqrt.f32 %v3211_v15  ;;  %v3212_v49 = vadd.f32 1e-05, %v3180_v20 }
 0x7a1   : > { %5912 = vmatprep.mubr.bf16.mxu1 %v3377_v23  ;;  %v8369_v40 = vadd.f32 %v8289_v1, %v3311_v7 }
 0x7a2   : > { %6385 = vrsqrt.f32 %v3212_v49 }
 0x7a3   : > { %v3130_v60 = vpop.xlane.xlu0 %3129  ;;  %v3378_v21 = vpack.c.bf16 %v8369_v40, %v8366_v38 }
 0x7a4   : > { %v3181_v4 = vmul.f32 0.03125, %v3130_v60 }
 0x7a5   : > { %v3132_v34 = vpop.xlane.xlu1 %3131  ;;  %5913 = vmatmul.mubr.bf16.gmra.mrb[132].mxu1 %v3378_v21 }
 0x7a6   : > { %v6380_v63 = vpop.eup %6379  ;;  %v3213_v24 = vadd.f32 1e-05, %v3181_v4  ;;  %v3182_v28 = vmul.f32 0.03125, %v3132_v34  ;;  %v6115_v34 = vld [vmem:[%s9501_s11] sm:$0xff]  }
 0x7a7   : > { %v3134_v39 = vpop.xlane.xlu0 %3133  ;;  %v3273_v2 = vmul.f32 %v6380_v63, %v8159_v59  ;;  %v6116_v63 = vld [vmem:[%s9501_s11 + $0x8] sm:$0xff]   ;;  %5940 = vmatprep.subr.bf16.mxu0 %v6115_v34 }
 0x7a8   : > { %v6382_v22 = vpop.eup %6381  ;;  %6387 = vrsqrt.f32 %v3213_v24  ;;  %v3214_v17 = vadd.f32 1e-05, %v3182_v28  ;;  %v3183_v55 = vmul.f32 0.03125, %v3134_v39  ;;  %5941 = vmatpush3.bf16.msra.mxu0 %v6115_v34  ;;  %v6117_v34 = vld [vmem:[%s9501_s11 + $0x10] sm:$0xff]  }
 0x7a9   : > { %v3136_v53 = vpop.xlane.xlu1 %3135  ;;  %v3274_v33 = vmul.f32 %v6382_v22, %v8172_v30  ;;  %v3312_v41 = vmul.f32 %v8270_v9, %v3273_v2  ;;  %5942 = vmatprep.subr.bf16.mxu0 %v6116_v63 }
 0x7aa   : > { %v6384_v6 = vpop.eup %6383  ;;  %6389 = vrsqrt.f32 %v3214_v17  ;;  %v3215_v16 = vadd.f32 1e-05, %v3183_v55  ;;  %v3184_v56 = vmul.f32 0.03125, %v3136_v53 }
 0x7ab   : > { %v3313_v51 = vmul.f32 %v8270_v9, %v3274_v33  ;;  %v3275_v47 = vmul.f32 %v6384_v6, %v8177_v12  ;;  %v8379_v54 = vadd.f32 %v8289_v1, %v3312_v41 }
 0x7ac   : > { %v6386_v11 = vpop.eup %6385  ;;  %6391 = vrsqrt.f32 %v3215_v16  ;;  %v3216_v59 = vadd.f32 1e-05, %v3184_v56  ;;  %5943 = vmatpush3.bf16.msra.mxu0 %v6116_v63  ;;  %v6118_v63 = vld [vmem:[%s9501_s11 + $0x18] sm:$0xff]  }
 0x7ad   : > { %v8382_v15 = vadd.f32 %v8289_v1, %v3313_v51  ;;  %v3276_v30 = vmul.f32 %v6386_v11, %v8183_v46  ;;  %v3314_v20 = vmul.f32 %v8270_v9, %v3275_v47  ;;  %5944 = vmatprep.subr.bf16.mxu0 %v6117_v34 }
 0x7ae   : > { %6393 = vrsqrt.f32 %v3216_v59 }
 0x7af   : > { %v3379_v23 = vpack.c.bf16 %v8382_v15, %v8379_v54  ;;  %v3315_v7 = vmul.f32 %v8270_v9, %v3276_v30  ;;  %v8390_v12 = vadd.f32 %v8289_v1, %v3314_v20 }
 0x7b0   : > { %5945 = vmatpush3.bf16.msra.mxu0 %v6117_v34 }
 0x7b1   : > { %5916 = vmatprep.mubr.bf16.mxu1 %v3379_v23  ;;  %v8393_v49 = vadd.f32 %v8289_v1, %v3315_v7  ;;  %5946 = vmatprep.subr.bf16.mxu0 %v6118_v63 }
 0x7b2   : > { %v6388_v60 = vpop.eup %6387 }
 0x7b3   : > { %v3138_v21 = vpop.xlane.xlu0 %3137  ;;  %v3380_v46 = vpack.c.bf16 %v8393_v49, %v8390_v12  ;;  %v3277_v4 = vmul.f32 %v6388_v60, %v8197_v37 }
 0x7b4   : > { %v6390_v24 = vpop.eup %6389  ;;  %v3185_v28 = vmul.f32 0.03125, %v3138_v21  ;;  %5947 = vmatpush3.bf16.msra.mxu0 %v6118_v63 }
 0x7b5   : > { %v3140_v39 = vpop.xlane.xlu1 %3139  ;;  %5917 = vmatmul.mubr.bf16.gmra.mrb[136].mxu1 %v3380_v46  ;;  %v3278_v2 = vmul.f32 %v6390_v24, %v8201_v8  ;;  %v3316_v22 = vmul.f32 %v8270_v9, %v3277_v4 }
 0x7b6   : > { %v6392_v17 = vpop.eup %6391  ;;  %v3217_v55 = vadd.f32 1e-05, %v3185_v28  ;;  %v3186_v37 = vmul.f32 0.03125, %v3140_v39 }
 0x7b7   : > { %v3142_v53 = vpop.xlane.xlu0 %3141  ;;  %v3317_v33 = vmul.f32 %v8270_v9, %v3278_v2  ;;  %v3279_v41 = vmul.f32 %v6392_v17, %v8207_v48  ;;  %v8409_v8 = vadd.f32 %v8289_v1, %v3316_v22 }
 0x7b8   : > { %v6394_v6 = vpop.eup %6393  ;;  %6395 = vrsqrt.f32 %v3217_v55  ;;  %v3218_v16 = vadd.f32 1e-05, %v3186_v37  ;;  %v3187_v56 = vmul.f32 0.03125, %v3142_v53  ;;  %v6119_v37 = vld [vmem:[%s9501_s11 + $0x20] sm:$0xff]  }
 0x7b9   : > { %v3144_v51 = vpop.xlane.xlu1 %3143  ;;  %v8412_v47 = vadd.f32 %v8289_v1, %v3317_v33  ;;  %v3280_v11 = vmul.f32 %v6394_v6, %v8213_v61  ;;  %v3318_v59 = vmul.f32 %v8270_v9, %v3279_v41  ;;  %5948 = vmatprep.subr.bf16.mxu0 %v6119_v37 }
 0x7ba   : > { %6397 = vrsqrt.f32 %v3218_v16  ;;  %v3219_v30 = vadd.f32 1e-05, %v3187_v56  ;;  %v3188_v20 = vmul.f32 0.03125, %v3144_v51  ;;  %5949 = vmatpush3.bf16.msra.mxu0 %v6119_v37 }
 0x7bb   : > { %v3381_v48 = vpack.c.bf16 %v8412_v47, %v8409_v8  ;;  %v3319_v23 = vmul.f32 %v8270_v9, %v3280_v11  ;;  %v8420_v60 = vadd.f32 %v8289_v1, %v3318_v59 }
 0x7bc   : > { %6399 = vrsqrt.f32 %v3219_v30  ;;  %v3220_v7 = vadd.f32 1e-05, %v3188_v20  ;;  %v6120_v20 = vld [vmem:[%s9501_s11 + $0x28] sm:$0xff]  }
 0x7bd   : > { %5920 = vmatprep.mubr.bf16.mxu1 %v3381_v48  ;;  %v8423_v21 = vadd.f32 %v8289_v1, %v3319_v23  ;;  %5950 = vmatprep.subr.bf16.mxu0 %v6120_v20 }
 0x7be   : > { %6401 = vrsqrt.f32 %v3220_v7  ;;  %5951 = vmatpush3.bf16.msra.mxu0 %v6120_v20 }
 0x7bf   : > { %v3382_v61 = vpack.c.bf16 %v8423_v21, %v8420_v60 }
 0x7c1   : > { %5921 = vmatmul.mubr.bf16.gmra.mrb[140].mxu1 %v3382_v61 }
 0x7c2   : > { %v6396_v46 = vpop.eup %6395 }
 0x7c3   : > { %v3281_v4 = vmul.f32 %v6396_v46, %v8221_v50 }
 0x7c4   : > { %v6398_v24 = vpop.eup %6397 }
 0x7c5   : > { %v3282_v28 = vmul.f32 %v6398_v24, %v8225_v36  ;;  %v3320_v39 = vmul.f32 %v8270_v9, %v3281_v4 }
 0x7c6   : > { %v6400_v2 = vpop.eup %6399  ;;  %v3146_v22 = vpop.xlane.xlu0 %3145 }
 0x7c7   : > { %v3189_v17 = vmul.f32 0.03125, %v3146_v22  ;;  %v3321_v50 = vmul.f32 %v8270_v9, %v3282_v28  ;;  %v3283_v55 = vmul.f32 %v6400_v2, %v8231_v19  ;;  %v8442_v36 = vadd.f32 %v8289_v1, %v3320_v39 }
 0x7c8   : > { %v6402_v53 = vpop.eup %6401  ;;  %v3148_v33 = vpop.xlane.xlu1 %3147 }
 0x7c9   : > { %v3221_v41 = vadd.f32 1e-05, %v3189_v17  ;;  %v3190_v6 = vmul.f32 0.03125, %v3148_v33  ;;  %v8445_v16 = vadd.f32 %v8289_v1, %v3321_v50  ;;  %v3284_v56 = vmul.f32 %v6402_v53, %v8237_v3 }
 0x7ca   : > { %v3150_v51 = vpop.xlane.xlu0 %3149  ;;  %v3322_v19 = vmul.f32 %v8270_v9, %v3283_v55 }
 0x7cb   : > { %6403 = vrsqrt.f32 %v3221_v41  ;;  %v3222_v11 = vadd.f32 1e-05, %v3190_v6  ;;  %v3191_v59 = vmul.f32 0.03125, %v3150_v51  ;;  %v3383_v30 = vpack.c.bf16 %v8445_v16, %v8442_v36  ;;  %v6122_v51 = vld [vmem:[%s9501_s11 + $0x38] sm:$0xff]  }
 0x7cc   : > { %v3152_v48 = vpop.xlane.xlu1 %3151  ;;  %v3323_v23 = vmul.f32 %v8270_v9, %v3284_v56  ;;  %v8456_v61 = vadd.f32 %v8289_v1, %v3322_v19 }
 0x7cd   : > { %6405 = vrsqrt.f32 %v3222_v11  ;;  %v3223_v3 = vadd.f32 1e-05, %v3191_v59  ;;  %v3192_v7 = vmul.f32 0.03125, %v3152_v48  ;;  %5924 = vmatprep.mubr.bf16.mxu1 %v3383_v30 }
 0x7ce   : > { %v8459_v46 = vadd.f32 %v8289_v1, %v3323_v23 }
 0x7cf   : > { %6407 = vrsqrt.f32 %v3223_v3  ;;  %v3224_v4 = vadd.f32 1e-05, %v3192_v7 }
 0x7d0   : > { %v3384_v34 = vpack.c.bf16 %v8459_v46, %v8456_v61 }
 0x7d1   : > { %6409 = vrsqrt.f32 %v3224_v4 }
 0x7d2   : > { %5925 = vmatmul.mubr.bf16.gmra.mrb[144].mxu1 %v3384_v34 }
 0x7d5   : > { %v6404_v63 = vpop.eup %6403 }
 0x7d6   : > { %v3285_v24 = vmul.f32 %v6404_v63, %v8247_v29 }
 0x7d7   : > { %v6406_v28 = vpop.eup %6405 }
 0x7d8   : > { %v3286_v39 = vmul.f32 %v6406_v28, %v8254_v14  ;;  %v3324_v2 = vmul.f32 %v8270_v9, %v3285_v24 }
 0x7d9   : > { %v6408_v22 = vpop.eup %6407 }
 0x7da   : > { %v3325_v17 = vmul.f32 %v8270_v9, %v3286_v39  ;;  %v3287_v50 = vmul.f32 %v6408_v22, %v8251_v62  ;;  %v8469_v37 = vadd.f32 %v8289_v1, %v3324_v2 }
 0x7db   : > { %v6410_v55 = vpop.eup %6409 }
 0x7dc   : > { %v8472_v53 = vadd.f32 %v8289_v1, %v3325_v17  ;;  %v3288_v33 = vmul.f32 %v6410_v55, %v8259_v18  ;;  %v3326_v29 = vmul.f32 %v8270_v9, %v3287_v50  ;;  %v6121_v18 = vld [vmem:[%s9501_s11 + $0x30] sm:$0xff]  }
 0x7dd   : > { %5952 = vmatprep.subr.bf16.mxu0 %v6121_v18 }
 0x7de   : > { %v3385_v14 = vpack.c.bf16 %v8472_v53, %v8469_v37  ;;  %v3327_v41 = vmul.f32 %v8270_v9, %v3288_v33  ;;  %v8480_v6 = vadd.f32 %v8289_v1, %v3326_v29  ;;  %5953 = vmatpush3.bf16.msra.mxu0 %v6121_v18 }
 0x7df   : > { %5954 = vmatprep.subr.bf16.mxu0 %v6122_v51 }
 0x7e0   : > { %5928 = vmatprep.mubr.bf16.mxu1 %v3385_v14  ;;  %v8483_v62 = vadd.f32 %v8289_v1, %v3327_v41 }
 0x7e2   : > { %v3386_v56 = vpack.c.bf16 %v8483_v62, %v8480_v6  ;;  %5955 = vmatpush3.bf16.msra.mxu0 %v6122_v51 }
 0x7e4   : > { %5929 = vmatmul.mubr.bf16.gmra.mrb[148].mxu1 %v3386_v56 }
 0x815   : > { %v3154_v19 = vpop.xlane.xlu0 %3153 }
 0x816   : > { %v3193_v11 = vmul.f32 0.03125, %v3154_v19 }
 0x817   : > { %v3156_v59 = vpop.xlane.xlu1 %3155 }
 0x818   : > { %v3225_v30 = vadd.f32 1e-05, %v3193_v11  ;;  %v3194_v20 = vmul.f32 0.03125, %v3156_v59 }
 0x819   : > { %v3158_v48 = vpop.xlane.xlu0 %3157 }
 0x81a   : > { %6411 = vrsqrt.f32 %v3225_v30  ;;  %v3226_v23 = vadd.f32 1e-05, %v3194_v20  ;;  %v3195_v3 = vmul.f32 0.03125, %v3158_v48 }
 0x81b   : > { %v3160_v7 = vpop.xlane.xlu1 %3159 }
 0x81c   : > { %6413 = vrsqrt.f32 %v3226_v23  ;;  %v3227_v4 = vadd.f32 1e-05, %v3195_v3  ;;  %v3196_v34 = vmul.f32 0.03125, %v3160_v7 }
 0x81e   : > { %6415 = vrsqrt.f32 %v3227_v4  ;;  %v3228_v63 = vadd.f32 1e-05, %v3196_v34 }
 0x820   : > { %6417 = vrsqrt.f32 %v3228_v63 }
 0x824   : > { %v6412_v24 = vpop.eup %6411 }
 0x825   : > { %v3162_v28 = vpop.xlane.xlu0 %3161  ;;  %v3289_v39 = vmul.f32 %v6412_v24, %v8275_v0 }
 0x826   : > { %v6414_v2 = vpop.eup %6413  ;;  %v3197_v22 = vmul.f32 0.03125, %v3162_v28 }
 0x827   : > { %v3164_v17 = vpop.xlane.xlu1 %3163  ;;  %v3290_v50 = vmul.f32 %v6414_v2, %v8281_v42  ;;  %v3328_v55 = vmul.f32 %v8270_v9, %v3289_v39 }
 0x828   : > { %v6416_v33 = vpop.eup %6415  ;;  %v3229_v29 = vadd.f32 1e-05, %v3197_v22  ;;  %v3198_v14 = vmul.f32 0.03125, %v3164_v17 }
 0x829   : > { %v3166_v41 = vpop.xlane.xlu0 %3165  ;;  %v3329_v56 = vmul.f32 %v8270_v9, %v3290_v50  ;;  %v3291_v18 = vmul.f32 %v6416_v33, %v8294_v27  ;;  %v8499_v59 = vadd.f32 %v8289_v1, %v3328_v55 }
 0x82a   : > { %v6418_v51 = vpop.eup %6417  ;;  %6419 = vrsqrt.f32 %v3229_v29  ;;  %v3230_v19 = vadd.f32 1e-05, %v3198_v14  ;;  %v3199_v11 = vmul.f32 0.03125, %v3166_v41 }
 0x82b   : > { %v3168_v0 = vpop.xlane.xlu1 %3167  ;;  %v8502_v42 = vadd.f32 %v8289_v1, %v3329_v56  ;;  %v3292_v30 = vmul.f32 %v6418_v51, %v8308_v35  ;;  %v3330_v20 = vmul.f32 %v8270_v9, %v3291_v18 }
 0x82c   : > { %6421 = vrsqrt.f32 %v3230_v19  ;;  %v3231_v48 = vadd.f32 1e-05, %v3199_v11  ;;  %v3200_v23 = vmul.f32 0.03125, %v3168_v0 }
 0x82d   : > { %v3387_v27 = vpack.c.bf16 %v8502_v42, %v8499_v59  ;;  %v3331_v3 = vmul.f32 %v8270_v9, %v3292_v30  ;;  %v8510_v4 = vadd.f32 %v8289_v1, %v3330_v20 }
 0x82e   : > { %6423 = vrsqrt.f32 %v3231_v48  ;;  %v3232_v7 = vadd.f32 1e-05, %v3200_v23 }
 0x82f   : > { %5932 = vmatprep.mubr.bf16.mxu1 %v3387_v27  ;;  %v8513_v34 = vadd.f32 %v8289_v1, %v3331_v3 }
 0x830   : > { %6425 = vrsqrt.f32 %v3232_v7 }
 0x831   : > { %v3388_v35 = vpack.c.bf16 %v8513_v34, %v8510_v4 }
 0x833   : > { %5933 = vmatmul.mubr.bf16.gmra.mrb[152].mxu1 %v3388_v35 }
 0x834   : > { %v6420_v63 = vpop.eup %6419 }
 0x835   : > { %v3293_v24 = vmul.f32 %v6420_v63, %v8327_v13 }
 0x836   : > { %v6422_v28 = vpop.eup %6421 }
 0x837   : > { %v3294_v39 = vmul.f32 %v6422_v28, %v8331_v57  ;;  %v3332_v2 = vmul.f32 %v8270_v9, %v3293_v24 }
 0x838   : > { %v6424_v22 = vpop.eup %6423 }
 0x839   : > { %v3333_v17 = vmul.f32 %v8270_v9, %v3294_v39  ;;  %v3295_v50 = vmul.f32 %v6424_v22, %v8338_v44  ;;  %v8523_v33 = vadd.f32 %v8289_v1, %v3332_v2 }
 0x83a   : > { %v6426_v55 = vpop.eup %6425 }
 0x83b   : > { %v8526_v29 = vadd.f32 %v8289_v1, %v3333_v17  ;;  %v3296_v14 = vmul.f32 %v6426_v55, %v8346_v32  ;;  %v3334_v13 = vmul.f32 %v8270_v9, %v3295_v50  ;;  %v8544_v32 = vld [vmem:[%s9807_s30] ss:$0 sm:$0xff] }
 0x83d   : > { %v3389_v57 = vpack.c.bf16 %v8526_v29, %v8523_v33  ;;  %v3335_v41 = vmul.f32 %v8270_v9, %v3296_v14  ;;  %v8534_v56 = vadd.f32 %v8289_v1, %v3334_v13 }
 0x83f   : > { %5936 = vmatprep.mubr.bf16.mxu1 %v3389_v57  ;;  %v8537_v44 = vadd.f32 %v8289_v1, %v3335_v41 }
 0x841   : > { %v3390_v18 = vpack.c.bf16 %v8537_v44, %v8534_v56 }
 0x843   : > { %5937 = vmatmul.mubr.bf16.gmra.mrb[156].mxu1 %v3390_v18 }
 0x844   : > { %6004 = vmatprep.mubr.msk.bf16.mxu1 %vm6514_vm1, %v9619_v5 }
 0x864   : > { %v5910_v51 = vpop.f32.mrb[128].mxu1 }
 0x865   : > { %v3505_v19 = vadd.f32 %v5910_v51, %v8544_v32  ;;  %v3496_v9 = vpop.f32.mrb[129].mxu1 }
 0x866   : > { %v3497_v11 = vadd.f32 %v8544_v32, %v3496_v9  ;;  %v5911_v0 = vpop.f32.mrb[130].mxu1 }
 0x867   : > { %v3508_v30 = vadd.f32 %v5911_v0, %v8544_v32  ;;  %v3499_v1 = vpop.f32.mrb[131].mxu1  ;;  %v3625_v48 = vmax.f32 %v3505_v19, 0.0 }
 0x868   : > { %v3500_v20 = vadd.f32 %v8544_v32, %v3499_v1  ;;  %v3623_v27 = vmax.f32 %v3497_v11, 0.0 }
 0x869   : > { %v3626_v23 = vmax.f32 %v3508_v30, 0.0 }
 0x86a   : > { %v3624_v3 = vmax.f32 %v3500_v20, 0.0 }
 0x86b   : > { %v3656_v7 = vpack.c.bf16 %v3626_v23, %v3625_v48 }
 0x86c   : > { %v3655_v35 = vpack.c.bf16 %v3624_v3, %v3623_v27 }
 0x86e   : > { %5956 = vmatprep.mubr.bf16.mxu0 %v3655_v35 }
 0x86f   : > { %5957 = vmatmul.mubr.bf16.vlgmr.msra.gmra.mrb[160].mxu0 %v3656_v7 }
 0x878   : > { %v5914_v63 = vpop.f32.mrb[132].mxu1 }
 0x879   : > { %v3521_v24 = vadd.f32 %v5914_v63, %v8544_v32  ;;  %v3512_v28 = vpop.f32.mrb[133].mxu1 }
 0x87a   : > { %v3513_v39 = vadd.f32 %v8544_v32, %v3512_v28  ;;  %v5915_v2 = vpop.f32.mrb[134].mxu1 }
 0x87b   : > { %v3524_v22 = vadd.f32 %v5915_v2, %v8544_v32  ;;  %v3515_v17 = vpop.f32.mrb[135].mxu1  ;;  %v3629_v55 = vmax.f32 %v3521_v24, 0.0 }
 0x87c   : > { %v3516_v50 = vadd.f32 %v8544_v32, %v3515_v17  ;;  %v3627_v13 = vmax.f32 %v3513_v39, 0.0 }
 0x87d   : > { %v3630_v14 = vmax.f32 %v3524_v22, 0.0 }
 0x87e   : > { %v3628_v57 = vmax.f32 %v3516_v50, 0.0 }
 0x87f   : > { %v3658_v41 = vpack.c.bf16 %v3630_v14, %v3629_v55 }
 0x880   : > { %v3657_v18 = vpack.c.bf16 %v3628_v57, %v3627_v13 }
 0x882   : > { %5960 = vmatprep.mubr.bf16.mxu0 %v3657_v18 }
 0x883   : > { %5961 = vmatmul.mubr.bf16.gmra.mrb[164].mxu0 %v3658_v41 }
 0x888   : > { %v5918_v51 = vpop.f32.mrb[136].mxu1 }
 0x889   : > { %v3537_v19 = vadd.f32 %v5918_v51, %v8544_v32  ;;  %v3528_v9 = vpop.f32.mrb[137].mxu1 }
 0x88a   : > { %v3529_v11 = vadd.f32 %v8544_v32, %v3528_v9  ;;  %v5919_v0 = vpop.f32.mrb[138].mxu1 }
 0x88b   : > { %v3540_v30 = vadd.f32 %v5919_v0, %v8544_v32  ;;  %v3531_v1 = vpop.f32.mrb[139].mxu1  ;;  %v3633_v48 = vmax.f32 %v3537_v19, 0.0 }
 0x88c   : > { %v3532_v20 = vadd.f32 %v8544_v32, %v3531_v1  ;;  %v3631_v27 = vmax.f32 %v3529_v11, 0.0 }
 0x88d   : > { %v3634_v23 = vmax.f32 %v3540_v30, 0.0 }
 0x88e   : > { %v3632_v3 = vmax.f32 %v3532_v20, 0.0 }
 0x88f   : > { %v3660_v7 = vpack.c.bf16 %v3634_v23, %v3633_v48 }
 0x890   : > { %v3659_v35 = vpack.c.bf16 %v3632_v3, %v3631_v27 }
 0x892   : > { %5964 = vmatprep.mubr.bf16.mxu0 %v3659_v35 }
 0x893   : > { %5965 = vmatmul.mubr.bf16.gmra.mrb[168].mxu0 %v3660_v7 }
 0x894   : > { %v5922_v63 = vpop.f32.mrb[140].mxu1 }
 0x895   : > { %v3553_v24 = vadd.f32 %v5922_v63, %v8544_v32  ;;  %v3544_v28 = vpop.f32.mrb[141].mxu1 }
 0x896   : > { %v3545_v39 = vadd.f32 %v8544_v32, %v3544_v28  ;;  %v5923_v2 = vpop.f32.mrb[142].mxu1 }
 0x897   : > { %v3556_v22 = vadd.f32 %v5923_v2, %v8544_v32  ;;  %v3547_v17 = vpop.f32.mrb[143].mxu1  ;;  %v3637_v55 = vmax.f32 %v3553_v24, 0.0 }
 0x898   : > { %v3548_v50 = vadd.f32 %v8544_v32, %v3547_v17  ;;  %v3635_v13 = vmax.f32 %v3545_v39, 0.0 }
 0x899   : > { %v3638_v14 = vmax.f32 %v3556_v22, 0.0 }
 0x89a   : > { %v3636_v57 = vmax.f32 %v3548_v50, 0.0 }
 0x89b   : > { %v3662_v41 = vpack.c.bf16 %v3638_v14, %v3637_v55 }
 0x89c   : > { %v3661_v18 = vpack.c.bf16 %v3636_v57, %v3635_v13 }
 0x89e   : > { %5968 = vmatprep.mubr.bf16.mxu0 %v3661_v18 }
 0x89f   : > { %5969 = vmatmul.mubr.bf16.gmra.mrb[172].mxu0 %v3662_v41 }
 0x8a5   : > { %v5926_v51 = vpop.f32.mrb[144].mxu1 }
 0x8a6   : > { %v3569_v19 = vadd.f32 %v5926_v51, %v8544_v32  ;;  %v3560_v9 = vpop.f32.mrb[145].mxu1 }
 0x8a7   : > { %v3561_v11 = vadd.f32 %v8544_v32, %v3560_v9  ;;  %v5927_v0 = vpop.f32.mrb[146].mxu1 }
 0x8a8   : > { %v3572_v30 = vadd.f32 %v5927_v0, %v8544_v32  ;;  %v3563_v1 = vpop.f32.mrb[147].mxu1  ;;  %v3641_v48 = vmax.f32 %v3569_v19, 0.0 }
 0x8a9   : > { %v3564_v20 = vadd.f32 %v8544_v32, %v3563_v1  ;;  %v3639_v27 = vmax.f32 %v3561_v11, 0.0 }
 0x8aa   : > { %v3642_v23 = vmax.f32 %v3572_v30, 0.0 }
 0x8ab   : > { %v3640_v3 = vmax.f32 %v3564_v20, 0.0 }
 0x8ac   : > { %v3664_v7 = vpack.c.bf16 %v3642_v23, %v3641_v48 }
 0x8ad   : > { %v3663_v35 = vpack.c.bf16 %v3640_v3, %v3639_v27 }
 0x8af   : > { %5972 = vmatprep.mubr.bf16.mxu0 %v3663_v35 }
 0x8b0   : > { %5973 = vmatmul.mubr.bf16.gmra.mrb[176].mxu0 %v3664_v7 }
 0x8b7   : > { %v5930_v63 = vpop.f32.mrb[148].mxu1 }
 0x8b8   : > { %v3585_v24 = vadd.f32 %v5930_v63, %v8544_v32  ;;  %v3576_v28 = vpop.f32.mrb[149].mxu1 }
 0x8b9   : > { %v3577_v39 = vadd.f32 %v8544_v32, %v3576_v28  ;;  %v5931_v2 = vpop.f32.mrb[150].mxu1 }
 0x8ba   : > { %v3588_v22 = vadd.f32 %v5931_v2, %v8544_v32  ;;  %v3579_v17 = vpop.f32.mrb[151].mxu1  ;;  %v3645_v55 = vmax.f32 %v3585_v24, 0.0 }
 0x8bb   : > { %v3580_v50 = vadd.f32 %v8544_v32, %v3579_v17  ;;  %v3643_v13 = vmax.f32 %v3577_v39, 0.0 }
 0x8bc   : > { %v3646_v14 = vmax.f32 %v3588_v22, 0.0 }
 0x8bd   : > { %v3644_v57 = vmax.f32 %v3580_v50, 0.0 }
 0x8be   : > { %v3666_v41 = vpack.c.bf16 %v3646_v14, %v3645_v55 }
 0x8bf   : > { %v3665_v18 = vpack.c.bf16 %v3644_v57, %v3643_v13 }
 0x8c1   : > { %5976 = vmatprep.mubr.bf16.mxu0 %v3665_v18 }
 0x8c2   : > { %5977 = vmatmul.mubr.bf16.gmra.mrb[180].mxu0 %v3666_v41 }
 0x906   : > { %v5934_v51 = vpop.f32.mrb[152].mxu1 }
 0x907   : > { %v3601_v19 = vadd.f32 %v5934_v51, %v8544_v32  ;;  %v3592_v9 = vpop.f32.mrb[153].mxu1  ;;  %v8581_v51 = vld [vmem:[%s9502_s12] ss:$0 sm:$0xff] }
 0x908   : > { %v3593_v11 = vadd.f32 %v8544_v32, %v3592_v9  ;;  %v5935_v0 = vpop.f32.mrb[154].mxu1 }
 0x909   : > { %v3604_v30 = vadd.f32 %v5935_v0, %v8544_v32  ;;  %v3595_v1 = vpop.f32.mrb[155].mxu1  ;;  %v3649_v48 = vmax.f32 %v3601_v19, 0.0 }
 0x90a   : > { %v3596_v20 = vadd.f32 %v8544_v32, %v3595_v1  ;;  %v3647_v27 = vmax.f32 %v3593_v11, 0.0 }
 0x90b   : > { %v3650_v23 = vmax.f32 %v3604_v30, 0.0 }
 0x90c   : > { %v3648_v3 = vmax.f32 %v3596_v20, 0.0 }
 0x90d   : > { %v3668_v7 = vpack.c.bf16 %v3650_v23, %v3649_v48 }
 0x90e   : > { %v3667_v35 = vpack.c.bf16 %v3648_v3, %v3647_v27 }
 0x910   : > { %5980 = vmatprep.mubr.bf16.mxu0 %v3667_v35 }
 0x911   : > { %5981 = vmatmul.mubr.bf16.gmra.mrb[184].mxu0 %v3668_v7 }
 0x916   : > { %v5938_v63 = vpop.f32.mrb[156].mxu1 }
 0x917   : > { %v3617_v24 = vadd.f32 %v5938_v63, %v8544_v32  ;;  %v3608_v28 = vpop.f32.mrb[157].mxu1 }
 0x918   : > { %v3609_v39 = vadd.f32 %v8544_v32, %v3608_v28  ;;  %v5939_v2 = vpop.f32.mrb[158].mxu1 }
 0x919   : > { %v3620_v22 = vadd.f32 %v5939_v2, %v8544_v32  ;;  %v3611_v17 = vpop.f32.mrb[159].mxu1  ;;  %v3653_v55 = vmax.f32 %v3617_v24, 0.0 }
 0x91a   : > { %v3612_v50 = vadd.f32 %v8544_v32, %v3611_v17  ;;  %v3651_v13 = vmax.f32 %v3609_v39, 0.0 }
 0x91b   : > { %v3654_v14 = vmax.f32 %v3620_v22, 0.0 }
 0x91c   : > { %v3652_v57 = vmax.f32 %v3612_v50, 0.0 }
 0x91d   : > { %v3670_v41 = vpack.c.bf16 %v3654_v14, %v3653_v55 }
 0x91e   : > { %v3669_v18 = vpack.c.bf16 %v3652_v57, %v3651_v13 }
 0x920   : > { %5984 = vmatprep.mubr.bf16.mxu0 %v3669_v18 }
 0x921   : > { %5985 = vmatmul.mubr.bf16.gmra.mrb[188].mxu0 %v3670_v41 }
 0x942   : > { %v5958_v19 = vpop.f32.mrb[160].mxu0 }
 0x943   : > { %v3776_v9 = vpop.f32.mrb[161].mxu0  ;;  %v3785_v32 = vadd.f32 %v5958_v19, %v8581_v51 }
 0x944   : > { %v3777_v11 = vadd.f32 %v8581_v51, %v3776_v9  ;;  %v5959_v0 = vpop.f32.mrb[162].mxu0 }
 0x945   : > { %v3779_v30 = vpop.f32.mrb[163].mxu0  ;;  %v3788_v48 = vadd.f32 %v5959_v0, %v8581_v51  ;;  %v8595_v27 = vadd.f32 %v3785_v32, %v8318_v58 }
 0x946   : > { %v8586_v1 = vadd.f32 %v3777_v11, %v8302_v52  ;;  %v3780_v20 = vadd.f32 %v8581_v51, %v3779_v30 }
 0x947   : > { %v8599_v3 = vadd.f32 %v3788_v48, %v8321_v25 }
 0x948   : > { %v8591_v23 = vadd.f32 %v3780_v20, %v8305_v45  ;;  %3935 = vadd.xlane.f32.xlu0 %v8586_v1 }
 0x94a   : > { %3937 = vadd.xlane.f32.xlu1 %v8591_v23 }
 0x94c   : > { %3939 = vadd.xlane.f32.xlu0 %v8595_v27 }
 0x94e   : > { %3941 = vadd.xlane.f32.xlu1 %v8599_v3 }
 0x956   : > { %v5962_v52 = vpop.f32.mrb[164].mxu0 }
 0x957   : > { %v3792_v7 = vpop.f32.mrb[165].mxu0  ;;  %v3801_v24 = vadd.f32 %v5962_v52, %v8581_v51 }
 0x958   : > { %v3793_v35 = vadd.f32 %v8581_v51, %v3792_v7  ;;  %v5963_v45 = vpop.f32.mrb[166].mxu0 }
 0x959   : > { %v3795_v63 = vpop.f32.mrb[167].mxu0  ;;  %v3804_v25 = vadd.f32 %v5963_v45, %v8581_v51  ;;  %v8615_v2 = vadd.f32 %v3801_v24, %v8366_v38 }
 0x95a   : > { %v8606_v58 = vadd.f32 %v3793_v35, %v8355_v26  ;;  %v3796_v28 = vadd.f32 %v8581_v51, %v3795_v63 }
 0x95b   : > { %v8619_v22 = vadd.f32 %v3804_v25, %v8369_v40 }
 0x95c   : > { %v8611_v39 = vadd.f32 %v3796_v28, %v8358_v10  ;;  %3943 = vadd.xlane.f32.xlu0 %v8606_v58 }
 0x95e   : > { %3945 = vadd.xlane.f32.xlu1 %v8611_v39 }
 0x960   : > { %3947 = vadd.xlane.f32.xlu0 %v8615_v2 }
 0x962   : > { %3949 = vadd.xlane.f32.xlu1 %v8619_v22 }
 0x966   : > { %v5966_v26 = vpop.f32.mrb[168].mxu0 }
 0x967   : > { %v3808_v17 = vpop.f32.mrb[169].mxu0  ;;  %v3817_v14 = vadd.f32 %v5966_v26, %v8581_v51 }
 0x968   : > { %v3809_v50 = vadd.f32 %v8581_v51, %v3808_v17  ;;  %v5967_v10 = vpop.f32.mrb[170].mxu0 }
 0x969   : > { %v3811_v55 = vpop.f32.mrb[171].mxu0  ;;  %v3820_v40 = vadd.f32 %v5967_v10, %v8581_v51  ;;  %v8635_v41 = vadd.f32 %v3817_v14, %v8390_v12  ;;  %v6126_v14 = vld [vmem:[%s9506_s16 + $0x18] sm:$0xff]  }
 0x96a   : > { %v8626_v38 = vadd.f32 %v3809_v50, %v8379_v54  ;;  %v3812_v13 = vadd.f32 %v8581_v51, %v3811_v55 }
 0x96b   : > { %v8639_v18 = vadd.f32 %v3820_v40, %v8393_v49  ;;  %v6128_v40 = vld [vmem:[%s9506_s16 + $0x28] sm:$0xff]  }
 0x96c   : > { %v8631_v57 = vadd.f32 %v3812_v13, %v8382_v15  ;;  %3951 = vadd.xlane.f32.xlu0 %v8626_v38  ;;  %v6127_v13 = vld [vmem:[%s9506_s16 + $0x20] sm:$0xff]  }
 0x96e   : > { %3953 = vadd.xlane.f32.xlu1 %v8631_v57 }
 0x970   : > { %3955 = vadd.xlane.f32.xlu0 %v8635_v41 }
 0x972   : > { %v5970_v54 = vpop.f32.mrb[172].mxu0  ;;  %3957 = vadd.xlane.f32.xlu1 %v8639_v18 }
 0x973   : > { %v3824_v19 = vpop.f32.mrb[173].mxu0  ;;  %v3833_v0 = vadd.f32 %v5970_v54, %v8581_v51  ;;  %v6129_v54 = vld [vmem:[%s9506_s16 + $0x30] sm:$0xff]  }
 0x974   : > { %v3825_v9 = vadd.f32 %v8581_v51, %v3824_v19  ;;  %v5971_v15 = vpop.f32.mrb[174].mxu0  ;;  %v6130_v19 = vld [vmem:[%s9506_s16 + $0x38] sm:$0xff]  }
 0x975   : > { %v3827_v11 = vpop.f32.mrb[175].mxu0  ;;  %v3836_v49 = vadd.f32 %v5971_v15, %v8581_v51  ;;  %v8655_v20 = vadd.f32 %v3833_v0, %v8420_v60  ;;  %v6133_v15 = vld [vmem:[%s9508_s18 + $0x4] ss:$8 sps:$4 sm:$0xff]   ;;  %v6131_v0 = vld [vmem:[%s9508_s18] ss:$8 sps:$4 sm:$0xff]  }
 0x976   : > { %v8646_v12 = vadd.f32 %v3825_v9, %v8409_v8  ;;  %v3828_v30 = vadd.f32 %v8581_v51, %v3827_v11  ;;  %v4397_v9 = vld [vmem:[%s9505_s15] sm:$0xff] }
 0x977   : > { %v8659_v48 = vadd.f32 %v3836_v49, %v8423_v21  ;;  %v4398_v11 = vpack.c.bf16 %v4397_v9, %v4397_v9 }
 0x978   : > { %v8651_v32 = vadd.f32 %v3828_v30, %v8412_v47  ;;  %3959 = vadd.xlane.f32.xlu0 %v8646_v12  ;;  %v6136_v30 = vld [vmem:[%s9508_s18 + $0x14] ss:$8 sps:$4 sm:$0xff]  }
 0x97a   : > { %3961 = vadd.xlane.f32.xlu1 %v8651_v32 }
 0x97c   : > { %3963 = vadd.xlane.f32.xlu0 %v8655_v20 }
 0x97e   : > { %3965 = vadd.xlane.f32.xlu1 %v8659_v48 }
 0x983   : > { %v5974_v8 = vpop.f32.mrb[176].mxu0 }
 0x984   : > { %v3840_v52 = vpop.f32.mrb[177].mxu0  ;;  %v3849_v45 = vadd.f32 %v5974_v8, %v8581_v51  ;;  %v6134_v8 = vld [vmem:[%s9508_s18 + $0x10] ss:$8 sps:$4 sm:$0xff]  }
 0x985   : > { %v3841_v7 = vadd.f32 %v8581_v51, %v3840_v52  ;;  %v5975_v47 = vpop.f32.mrb[178].mxu0  ;;  %v9808_v52 = vmov 0  }
 0x986   : > { %v3843_v35 = vpop.f32.mrb[179].mxu0  ;;  %v3852_v21 = vadd.f32 %v5975_v47, %v8581_v51  ;;  %v8675_v28 = vadd.f32 %v3849_v45, %v8456_v61 }
 0x987   : > { %v8666_v60 = vadd.f32 %v3841_v7, %v8442_v36  ;;  %v3844_v63 = vadd.f32 %v8581_v51, %v3843_v35 }
 0x988   : > { %v8679_v25 = vadd.f32 %v3852_v21, %v8459_v46  ;;  %v6123_v46 = vld [vmem:[%s9506_s16] sm:$0xff]  }
 0x989   : > { %v8671_v24 = vadd.f32 %v3844_v63, %v8445_v16  ;;  %3967 = vadd.xlane.f32.xlu0 %v8666_v60  ;;  %5989 = vmatpush3.bf16.msra.mxu1 %v6123_v46 }
 0x98a   : > { %5990 = vmatprep.subr.bf16.mxu1 %v9619_v5 }
 0x98b   : > { %3969 = vadd.xlane.f32.xlu1 %v8671_v24 }
 0x98d   : > { %3971 = vadd.xlane.f32.xlu0 %v8675_v28 }
 0x98f   : > { %3973 = vadd.xlane.f32.xlu1 %v8679_v25 }
 0x995   : > { %v5978_v36 = vpop.f32.mrb[180].mxu0 }
 0x996   : > { %v3856_v26 = vpop.f32.mrb[181].mxu0 }
 0x997   : > { %v3857_v17 = vadd.f32 %v8581_v51, %v3856_v26  ;;  %v5979_v16 = vpop.f32.mrb[182].mxu0 }
 0x998   : > { %v3859_v50 = vpop.f32.mrb[183].mxu0 }
 0x999   : > { %v8685_v10 = vadd.f32 %v3857_v17, %v8469_v37  ;;  %v3860_v61 = vadd.f32 %v8581_v51, %v3859_v50  ;;  %v6124_v37 = vld [vmem:[%s9506_s16 + $0x8] sm:$0xff]   ;;  %v3865_v50 = vadd.f32 %v5978_v36, %v8581_v51 }
 0x99a   : > { %5991 = vmatpush3.bf16.msra.mxu1 %v6124_v37 }
 0x99b   : > { %v8689_v55 = vadd.f32 %v3860_v61, %v8472_v53  ;;  %3975 = vadd.xlane.f32.xlu0 %v8685_v10  ;;  %v6125_v53 = vld [vmem:[%s9506_s16 + $0x10] sm:$0xff]   ;;  %5992 = vmatprep.subr.bf16.mxu1 %v9619_v5  ;;  %v8759_v36 = vadd.f32 %v3865_v50, %v8480_v6 }
 0x99d   : > { %3977 = vadd.xlane.f32.xlu1 %v8689_v55 }
 0x99e   : > { %5993 = vmatpush3.bf16.msra.mxu1 %v6125_v53 }
 0x99f   : > { %5994 = vmatprep.subr.bf16.mxu1 %v9619_v5 }
 0x9a2   : > { %5995 = vmatpush3.bf16.msra.mxu1 %v6126_v14  ;;  %v3868_v14 = vadd.f32 %v5979_v16, %v8581_v51 }
 0x9a3   : > { %5996 = vmatprep.subr.bf16.mxu1 %v9619_v5 }
 0x9a6   : > { %5997 = vmatpush3.bf16.msra.mxu1 %v6127_v13 }
 0x9a7   : > { %5998 = vmatprep.subr.bf16.mxu1 %v9619_v5 }
 0x9aa   : > { %5999 = vmatpush3.bf16.msra.mxu1 %v6128_v40 }
 0x9ab   : > { %6000 = vmatprep.subr.bf16.mxu1 %v9619_v5 }
 0x9ae   : > { %6001 = vmatpush3.bf16.msra.mxu1 %v6129_v54 }
 0x9af   : > { %6002 = vmatprep.subr.bf16.mxu1 %v9619_v5 }
 0x9b2   : > { %6003 = vmatpush3.bf16.msra.mxu1 %v6130_v19 }
 0x9b3   : > { %4634 = vmatprep.subr.bf16.mxu1 %v6133_v15 }
 0x9b5   : > { %6005 = vmatmul.mubr.bf16.vlgmr.msra.gmra.mrb[160].mxu1 %v4398_v11 }
 0x9b6   : > { %4635 = vmatpush1.bf16.msra.mxu1 %v6131_v0  ;;  %4666 = vmatprep.mubr.bf16.mxu1 %v9808_v52 }
 0x9b7   : > { %4636 = vmatprep.subr.bf16.mxu1 %v6136_v30 }
 0x9ba   : > { %4637 = vmatpush1.bf16.msra.mxu1 %v6134_v8 }
 0x9d5   : > { %v3936_v49 = vpop.xlane.xlu0 %3935 }
 0x9d6   : > { %v3999_v7 = vmul.f32 0.03125, %v3936_v49 }
 0x9d7   : > { %v3938_v47 = vpop.xlane.xlu1 %3937 }
 0x9d8   : > { %v4031_v35 = vsub.f32 %v8586_v1, %v3999_v7  ;;  %v4000_v45 = vmul.f32 0.03125, %v3938_v47 }
 0x9d9   : > { %v3940_v63 = vpop.xlane.xlu0 %3939 }
 0x9da   : > { %v8744_v21 = vmul.f32 %v8066_v31, %v4031_v35  ;;  %v4032_v26 = vsub.f32 %v8591_v23, %v4000_v45  ;;  %v4001_v17 = vmul.f32 0.03125, %v3940_v63  ;;  %v6137_v63 = vld [vmem:[%s9508_s18 + $0x20] ss:$8 sps:$4 sm:$0xff]  }
 0x9db   : > { %v3942_v61 = vpop.xlane.xlu1 %3941 }
 0x9dc   : > { %v8749_v46 = vmul.f32 %v8066_v31, %v4032_v26  ;;  %v4033_v37 = vsub.f32 %v8595_v27, %v4001_v17  ;;  %v4002_v53 = vmul.f32 0.03125, %v3942_v61  ;;  %v4095_v1 = vmul.f32 %v8744_v21, %v8744_v21 }
 0x9dd   : > { %v8765_v27 = vadd.f32 %v3868_v14, %v8483_v62  ;;  %v6142_v14 = vld [vmem:[%s9508_s18 + $0x34] ss:$8 sps:$4 sm:$0xff]  }
 0x9de   : > { %v4034_v13 = vsub.f32 %v8599_v3, %v4002_v53  ;;  %4127 = vadd.xlane.f32.xlu0 %v4095_v1  ;;  %v4096_v23 = vmul.f32 %v8749_v46, %v8749_v46  ;;  %v8762_v40 = vmul.f32 %v8066_v31, %v4033_v37 }
 0x9e0   : > { %4129 = vadd.xlane.f32.xlu1 %v4096_v23  ;;  %v8768_v54 = vmul.f32 %v8066_v31, %v4034_v13  ;;  %v4097_v16 = vmul.f32 %v8762_v40, %v8762_v40 }
 0x9e2   : > { %3979 = vadd.xlane.f32.xlu0 %v8759_v36  ;;  %v4098_v62 = vmul.f32 %v8768_v54, %v8768_v54 }
 0x9e4   : > { %3981 = vadd.xlane.f32.xlu1 %v8765_v27  ;;  %v5982_v3 = vpop.f32.mrb[184].mxu0 }
 0x9e5   : > { %v3872_v6 = vpop.f32.mrb[185].mxu0 }
 0x9e6   : > { %4131 = vadd.xlane.f32.xlu0 %v4097_v16  ;;  %v3873_v19 = vadd.f32 %v8581_v51, %v3872_v6  ;;  %v5983_v9 = vpop.f32.mrb[186].mxu0 }
 0x9e7   : > { %v3875_v15 = vpop.f32.mrb[187].mxu0  ;;  %v3884_v13 = vadd.f32 %v5983_v9, %v8581_v51 }
 0x9e8   : > { %v8778_v11 = vadd.f32 %v3873_v19, %v8499_v59  ;;  %v3876_v0 = vadd.f32 %v8581_v51, %v3875_v15  ;;  %4133 = vadd.xlane.f32.xlu1 %v4098_v62  ;;  %v6139_v59 = vld [vmem:[%s9508_s18 + $0x24] ss:$8 sps:$4 sm:$0xff]  }
 0x9e9   : > { %v3944_v30 = vpop.xlane.xlu0 %3943  ;;  %4638 = vmatprep.subr.bf16.mxu1 %v6139_v59  ;;  %v6145_v19 = vld [vmem:[%s9508_s18 + $0x44] ss:$8 sps:$4 sm:$0xff]   ;;  %v8827_v62 = vadd.f32 %v3884_v13, %v8513_v34  ;;  %v6148_v34 = vld [vmem:[%s9508_s18 + $0x54] ss:$8 sps:$4 sm:$0xff]  }
 0x9ea   : > { %v8782_v49 = vadd.f32 %v3876_v0, %v8502_v42  ;;  %v4003_v8 = vmul.f32 0.03125, %v3944_v30  ;;  %3983 = vadd.xlane.f32.xlu0 %v8778_v11  ;;  %4639 = vmatpush1.bf16.msra.mxu1 %v6137_v63 }
 0x9eb   : > { %v3946_v7 = vpop.xlane.xlu1 %3945  ;;  %4640 = vmatprep.subr.bf16.mxu1 %v6142_v14 }
 0x9ec   : > { %v4035_v47 = vsub.f32 %v8606_v58, %v4003_v8  ;;  %v4004_v35 = vmul.f32 0.03125, %v3946_v7  ;;  %3985 = vadd.xlane.f32.xlu1 %v8782_v49  ;;  %v3881_v58 = vadd.f32 %v5982_v3, %v8581_v51 }
 0x9ed   : > { %v3948_v45 = vpop.xlane.xlu0 %3947 }
 0x9ee   : > { %v8794_v42 = vmul.f32 %v8066_v31, %v4035_v47  ;;  %v4036_v26 = vsub.f32 %v8611_v39, %v4004_v35  ;;  %v4005_v17 = vmul.f32 0.03125, %v3948_v45  ;;  %v6140_v39 = vld [vmem:[%s9508_s18 + $0x30] ss:$8 sps:$4 sm:$0xff]   ;;  %v8815_v3 = vadd.f32 %v3881_v58, %v8510_v4 }
 0x9ef   : > { %v3950_v50 = vpop.xlane.xlu1 %3949  ;;  %4641 = vmatpush1.bf16.msra.mxu1 %v6140_v39  ;;  %v6146_v47 = vld [vmem:[%s9508_s18 + $0x50] ss:$8 sps:$4 sm:$0xff]  }
 0x9f0   : > { %v8799_v61 = vmul.f32 %v8066_v31, %v4036_v26  ;;  %v4037_v37 = vsub.f32 %v8615_v2, %v4005_v17  ;;  %v4006_v53 = vmul.f32 0.03125, %v3950_v50  ;;  %v4099_v1 = vmul.f32 %v8794_v42, %v8794_v42  ;;  %4642 = vmatprep.subr.bf16.mxu1 %v6145_v19  ;;  %v6151_v50 = vld [vmem:[%s9508_s18 + $0x64] ss:$8 sps:$4 sm:$0xff]  }
 0x9f2   : > { %v4038_v23 = vsub.f32 %v8619_v22, %v4006_v53  ;;  %4135 = vadd.xlane.f32.xlu0 %v4099_v1  ;;  %v4100_v2 = vmul.f32 %v8799_v61, %v8799_v61  ;;  %v8818_v16 = vmul.f32 %v8066_v31, %v4037_v37  ;;  %v6143_v22 = vld [vmem:[%s9508_s18 + $0x40] ss:$8 sps:$4 sm:$0xff]  }
 0x9f3   : > { %4643 = vmatpush1.bf16.msra.mxu1 %v6143_v22  ;;  %v6149_v53 = vld [vmem:[%s9508_s18 + $0x60] ss:$8 sps:$4 sm:$0xff]  }
 0x9f4   : > { %v5986_v6 = vpop.f32.mrb[188].mxu0  ;;  %4137 = vadd.xlane.f32.xlu1 %v4100_v2  ;;  %v8830_v4 = vmul.f32 %v8066_v31, %v4038_v23  ;;  %v4101_v8 = vmul.f32 %v8818_v16, %v8818_v16  ;;  %4644 = vmatprep.subr.bf16.mxu1 %v6148_v34 }
 0x9f5   : > { %v3888_v9 = vpop.f32.mrb[189].mxu0  ;;  %v3897_v39 = vadd.f32 %v5986_v6, %v8581_v51  ;;  %v6152_v6 = vld [vmem:[%s9508_s18 + $0x70] ss:$8 sps:$4 sm:$0xff]  }
 0x9f6   : > { %3987 = vadd.xlane.f32.xlu0 %v8815_v3  ;;  %v5987_v15 = vpop.f32.mrb[190].mxu0  ;;  %v3889_v30 = vadd.f32 %v8581_v51, %v3888_v9  ;;  %v4102_v45 = vmul.f32 %v8830_v4, %v8830_v4 }
 0x9f7   : > { %v3891_v0 = vpop.f32.mrb[191].mxu0  ;;  %4645 = vmatpush1.bf16.msra.mxu1 %v6146_v47  ;;  %v3900_v9 = vadd.f32 %v5987_v15, %v8581_v51 }
 0x9f8   : > { %3989 = vadd.xlane.f32.xlu1 %v8827_v62  ;;  %v3892_v35 = vadd.f32 %v8581_v51, %v3891_v0  ;;  %v8847_v26 = vadd.f32 %v3889_v30, %v8523_v33  ;;  %4646 = vmatprep.subr.bf16.mxu1 %v6151_v50  ;;  %v8883_v0 = vadd.f32 %v3897_v39, %v8534_v56 }
 0x9f9   : > { %v3952_v7 = vpop.xlane.xlu0 %3951  ;;  %v8889_v34 = vadd.f32 %v3900_v9, %v8537_v44 }
 0x9fa   : > { %v4007_v59 = vmul.f32 0.03125, %v3952_v7  ;;  %4139 = vadd.xlane.f32.xlu0 %v4101_v8  ;;  %v8857_v1 = vadd.f32 %v3892_v35, %v8526_v29 }
 0x9fb   : > { %v3954_v63 = vpop.xlane.xlu1 %3953  ;;  %4647 = vmatpush1.bf16.msra.mxu1 %v6149_v53 }
 0x9fc   : > { %v4039_v17 = vsub.f32 %v8626_v38, %v4007_v59  ;;  %v4008_v58 = vmul.f32 0.03125, %v3954_v63  ;;  %4141 = vadd.xlane.f32.xlu1 %v4102_v45 }
 0x9fd   : > { %v3956_v37 = vpop.xlane.xlu0 %3955 }
 0x9fe   : > { %v8860_v14 = vmul.f32 %v8066_v31, %v4039_v17  ;;  %v4040_v33 = vsub.f32 %v8631_v57, %v4008_v58  ;;  %v4009_v38 = vmul.f32 0.03125, %v3956_v37  ;;  %3991 = vadd.xlane.f32.xlu0 %v8847_v26  ;;  %v6154_v57 = vld [vmem:[%s9508_s18 + $0x74] ss:$8 sps:$4 sm:$0xff]  }
 0x9ff   : > { %v3958_v13 = vpop.xlane.xlu1 %3957  ;;  %4648 = vmatprep.subr.bf16.mxu1 %v6154_v57 }
 0xa00   : > { %v8866_v23 = vmul.f32 %v8066_v31, %v4040_v33  ;;  %v4041_v2 = vsub.f32 %v8635_v41, %v4009_v38  ;;  %v4010_v29 = vmul.f32 0.03125, %v3958_v13  ;;  %3993 = vadd.xlane.f32.xlu1 %v8857_v1  ;;  %v4103_v19 = vmul.f32 %v8860_v14, %v8860_v14  ;;  %4649 = vmatpush1.bf16.msra.mxu1 %v6152_v6 }
 0xa02   : > { %v4042_v22 = vsub.f32 %v8639_v18, %v4010_v29  ;;  %4143 = vadd.xlane.f32.xlu0 %v4103_v19  ;;  %v4104_v41 = vmul.f32 %v8866_v23, %v8866_v23  ;;  %v8886_v30 = vmul.f32 %v8066_v31, %v4041_v2 }
 0xa04   : > { %4145 = vadd.xlane.f32.xlu1 %v4104_v41  ;;  %v8892_v51 = vmul.f32 %v8066_v31, %v4042_v22  ;;  %v4105_v56 = vmul.f32 %v8886_v30, %v8886_v30 }
 0xa05   : > { %v3960_v8 = vpop.xlane.xlu0 %3959 }
 0xa06   : > { %v4011_v18 = vmul.f32 0.03125, %v3960_v8  ;;  %3995 = vadd.xlane.f32.xlu0 %v8883_v0  ;;  %v4106_v63 = vmul.f32 %v8892_v51, %v8892_v51 }
 0xa07   : > { %v3962_v15 = vpop.xlane.xlu1 %3961 }
 0xa08   : > { %v4043_v7 = vsub.f32 %v8646_v12, %v4011_v18  ;;  %v4012_v47 = vmul.f32 0.03125, %v3962_v15  ;;  %3997 = vadd.xlane.f32.xlu1 %v8889_v34 }
 0xa09   : > { %v3964_v35 = vpop.xlane.xlu0 %3963 }
 0xa0a   : > { %v8900_v59 = vmul.f32 %v8066_v31, %v4043_v7  ;;  %v4044_v44 = vsub.f32 %v8651_v32, %v4012_v47  ;;  %v4013_v45 = vmul.f32 0.03125, %v3964_v35  ;;  %4147 = vadd.xlane.f32.xlu0 %v4105_v56 }
 0xa0b   : > { %v3966_v17 = vpop.xlane.xlu1 %3965 }
 0xa0c   : > { %v8906_v12 = vmul.f32 %v8066_v31, %v4044_v44  ;;  %v4045_v58 = vsub.f32 %v8655_v20, %v4013_v45  ;;  %v4014_v50 = vmul.f32 0.03125, %v3966_v17  ;;  %4149 = vadd.xlane.f32.xlu1 %v4106_v63  ;;  %v4107_v37 = vmul.f32 %v8900_v59, %v8900_v59 }
 0xa0e   : > { %v8912_v53 = vmul.f32 %v8066_v31, %v4045_v58  ;;  %v4046_v32 = vsub.f32 %v8659_v48, %v4014_v50  ;;  %4151 = vadd.xlane.f32.xlu0 %v4107_v37  ;;  %v4108_v33 = vmul.f32 %v8906_v12, %v8906_v12 }
 0xa10   : > { %v8918_v38 = vmul.f32 %v8066_v31, %v4046_v32  ;;  %4153 = vadd.xlane.f32.xlu1 %v4108_v33  ;;  %v4109_v20 = vmul.f32 %v8912_v53, %v8912_v53 }
 0xa12   : > { %4155 = vadd.xlane.f32.xlu0 %v4109_v20  ;;  %v4110_v39 = vmul.f32 %v8918_v38, %v8918_v38 }
 0xa14   : > { %4157 = vadd.xlane.f32.xlu1 %v4110_v39 }
 0xa16   : > { %v3968_v13 = vpop.xlane.xlu0 %3967 }
 0xa17   : > { %v4015_v2 = vmul.f32 0.03125, %v3968_v13 }
 0xa18   : > { %v3970_v29 = vpop.xlane.xlu1 %3969 }
 0xa19   : > { %v4047_v48 = vsub.f32 %v8666_v60, %v4015_v2  ;;  %v4016_v19 = vmul.f32 0.03125, %v3970_v29 }
 0xa1a   : > { %v3972_v57 = vpop.xlane.xlu0 %3971 }
 0xa1b   : > { %v8926_v6 = vmul.f32 %v8066_v31, %v4047_v48  ;;  %v4048_v9 = vsub.f32 %v8671_v24, %v4016_v19  ;;  %v4017_v22 = vmul.f32 0.03125, %v3972_v57 }
 0xa1c   : > { %v3974_v41 = vpop.xlane.xlu1 %3973 }
 0xa1d   : > { %v8930_v8 = vmul.f32 %v8066_v31, %v4048_v9  ;;  %v4049_v18 = vsub.f32 %v8675_v28, %v4017_v22  ;;  %v4018_v15 = vmul.f32 0.03125, %v3974_v41  ;;  %v4111_v7 = vmul.f32 %v8926_v6, %v8926_v6 }
 0xa1f   : > { %v8936_v60 = vmul.f32 %v8066_v31, %v4049_v18  ;;  %v4050_v47 = vsub.f32 %v8679_v25, %v4018_v15  ;;  %4159 = vadd.xlane.f32.xlu0 %v4111_v7  ;;  %v4112_v24 = vmul.f32 %v8930_v8, %v8930_v8 }
 0xa21   : > { %v8942_v56 = vmul.f32 %v8066_v31, %v4050_v47  ;;  %4161 = vadd.xlane.f32.xlu1 %v4112_v24  ;;  %v4113_v28 = vmul.f32 %v8936_v60, %v8936_v60 }
 0xa23   : > { %4163 = vadd.xlane.f32.xlu0 %v4113_v28  ;;  %v4114_v35 = vmul.f32 %v8942_v56, %v8942_v56 }
 0xa25   : > { %4165 = vadd.xlane.f32.xlu1 %v4114_v35 }
 0xa28   : > { %v3976_v44 = vpop.xlane.xlu0 %3975 }
 0xa29   : > { %v4019_v45 = vmul.f32 0.03125, %v3976_v44 }
 0xa2a   : > { %v3978_v63 = vpop.xlane.xlu1 %3977 }
 0xa2b   : > { %v4051_v25 = vsub.f32 %v8685_v10, %v4019_v45  ;;  %v4020_v17 = vmul.f32 0.03125, %v3978_v63 }
 0xa2d   : > { %v8950_v58 = vmul.f32 %v8066_v31, %v4051_v25  ;;  %v4052_v50 = vsub.f32 %v8689_v55, %v4020_v17 }
 0xa2f   : > { %v8954_v37 = vmul.f32 %v8066_v31, %v4052_v50  ;;  %v4115_v32 = vmul.f32 %v8950_v58, %v8950_v58 }
 0xa31   : > { %4167 = vadd.xlane.f32.xlu0 %v4115_v32  ;;  %v4116_v33 = vmul.f32 %v8954_v37, %v8954_v37  ;;  %v8976_v32 = vld [vmem:[%s9503_s13] ss:$0 sm:$0xff] }
 0xa33   : > { %4169 = vadd.xlane.f32.xlu1 %v4116_v33 }
 0xa6b   : > { %v4128_v20 = vpop.xlane.xlu0 %4127 }
 0xa6c   : > { %v4191_v39 = vmul.f32 0.03125, %v4128_v20 }
 0xa6d   : > { %v4130_v10 = vpop.xlane.xlu1 %4129 }
 0xa6e   : > { %v4223_v13 = vadd.f32 1e-05, %v4191_v39  ;;  %v4192_v2 = vmul.f32 0.03125, %v4130_v10 }
 0xa6f   : > { %v3980_v29 = vpop.xlane.xlu0 %3979 }
 0xa70   : > { %6427 = vrsqrt.f32 %v4223_v13  ;;  %v4224_v48 = vadd.f32 1e-05, %v4192_v2  ;;  %v4021_v55 = vmul.f32 0.03125, %v3980_v29 }
 0xa71   : > { %v3982_v19 = vpop.xlane.xlu1 %3981 }
 0xa72   : > { %6429 = vrsqrt.f32 %v4224_v48  ;;  %v4053_v57 = vsub.f32 %v8759_v36, %v4021_v55  ;;  %v4022_v9 = vmul.f32 0.03125, %v3982_v19 }
 0xa73   : > { %v4132_v22 = vpop.xlane.xlu0 %4131 }
 0xa74   : > { %v8962_v41 = vmul.f32 %v8066_v31, %v4053_v57  ;;  %v4054_v18 = vsub.f32 %v8765_v27, %v4022_v9  ;;  %v4193_v15 = vmul.f32 0.03125, %v4132_v22 }
 0xa75   : > { %v4134_v7 = vpop.xlane.xlu1 %4133 }
 0xa76   : > { %v8966_v47 = vmul.f32 %v8066_v31, %v4054_v18  ;;  %v4225_v24 = vadd.f32 1e-05, %v4193_v15  ;;  %v4194_v28 = vmul.f32 0.03125, %v4134_v7  ;;  %v4117_v35 = vmul.f32 %v8962_v41, %v8962_v41 }
 0xa77   : > { %v3984_v44 = vpop.xlane.xlu0 %3983 }
 0xa78   : > { %6431 = vrsqrt.f32 %v4225_v24  ;;  %v4226_v36 = vadd.f32 1e-05, %v4194_v28  ;;  %v4023_v45 = vmul.f32 0.03125, %v3984_v44  ;;  %4171 = vadd.xlane.f32.xlu0 %v4117_v35  ;;  %v4118_v63 = vmul.f32 %v8966_v47, %v8966_v47 }
 0xa79   : > { %v3986_v25 = vpop.xlane.xlu1 %3985 }
 0xa7a   : > { %v6428_v27 = vpop.eup %6427  ;;  %6433 = vrsqrt.f32 %v4226_v36  ;;  %v4055_v17 = vsub.f32 %v8778_v11, %v4023_v45  ;;  %4173 = vadd.xlane.f32.xlu1 %v4118_v63  ;;  %v4024_v50 = vmul.f32 0.03125, %v3986_v25 }
 0xa7b   : > { %v4287_v33 = vmul.f32 %v6428_v27, %v8744_v21  ;;  %v8993_v21 = vld [vmem:[%s9504_s14] ss:$0 sm:$0xff] }
 0xa7c   : > { %v6430_v20 = vpop.eup %6429  ;;  %v8980_v39 = vmul.f32 %v8066_v31, %v4055_v17  ;;  %v4056_v10 = vsub.f32 %v8782_v49, %v4024_v50 }
 0xa7d   : > { %v4288_v13 = vmul.f32 %v6430_v20, %v8749_v46  ;;  %v4326_v2 = vmul.f32 %v8976_v32, %v4287_v33 }
 0xa7e   : > { %v8986_v11 = vmul.f32 %v8066_v31, %v4056_v10  ;;  %v4119_v29 = vmul.f32 %v8980_v39, %v8980_v39 }
 0xa7f   : > { %v4136_v48 = vpop.xlane.xlu0 %4135  ;;  %v4327_v55 = vmul.f32 %v8976_v32, %v4288_v13  ;;  %v4365_v57 = vadd.f32 %v8993_v21, %v4326_v2 }
 0xa80   : > { %v4195_v19 = vmul.f32 0.03125, %v4136_v48  ;;  %4175 = vadd.xlane.f32.xlu0 %v4119_v29  ;;  %v4120_v46 = vmul.f32 %v8986_v11, %v8986_v11 }
 0xa81   : > { %v4138_v49 = vpop.xlane.xlu1 %4137  ;;  %v4366_v9 = vadd.f32 %v8993_v21, %v4327_v55 }
 0xa82   : > { %v6432_v22 = vpop.eup %6431  ;;  %v4227_v18 = vadd.f32 1e-05, %v4195_v19  ;;  %v4196_v15 = vmul.f32 0.03125, %v4138_v49  ;;  %4177 = vadd.xlane.f32.xlu1 %v4120_v46 }
 0xa83   : > { %v3988_v7 = vpop.xlane.xlu0 %3987  ;;  %v4510_v24 = vpack.c.bf16 %v4366_v9, %v4365_v57  ;;  %v4289_v28 = vmul.f32 %v6432_v22, %v8762_v40 }
 0xa84   : > { %v6434_v35 = vpop.eup %6433  ;;  %6435 = vrsqrt.f32 %v4227_v18  ;;  %v4228_v44 = vadd.f32 1e-05, %v4196_v15  ;;  %v4025_v36 = vmul.f32 0.03125, %v3988_v7 }
 0xa85   : > { %4667 = vmatmul.mubr.bf16.vlgmr.msra.gmra.mrb[164].mxu1 %v4510_v24  ;;  %v3990_v45 = vpop.xlane.xlu1 %3989  ;;  %v4290_v63 = vmul.f32 %v6434_v35, %v8768_v54  ;;  %v4328_v25 = vmul.f32 %v8976_v32, %v4289_v28 }
 0xa86   : > { %6437 = vrsqrt.f32 %v4228_v44  ;;  %v4057_v27 = vsub.f32 %v8815_v3, %v4025_v36  ;;  %v4026_v17 = vmul.f32 0.03125, %v3990_v45  ;;  %4676 = vmatprep.mubr.bf16.mxu1 %v9808_v52 }
 0xa87   : > { %v4140_v50 = vpop.xlane.xlu0 %4139  ;;  %v4329_v33 = vmul.f32 %v8976_v32, %v4290_v63  ;;  %v4367_v54 = vadd.f32 %v8993_v21, %v4328_v25 }
 0xa88   : > { %v9007_v40 = vmul.f32 %v8066_v31, %v4057_v27  ;;  %v4058_v20 = vsub.f32 %v8827_v62, %v4026_v17  ;;  %v4197_v10 = vmul.f32 0.03125, %v4140_v50 }
 0xa89   : > { %v4142_v13 = vpop.xlane.xlu1 %4141  ;;  %v4368_v2 = vadd.f32 %v8993_v21, %v4329_v33 }
 0xa8a   : > { %v9013_v29 = vmul.f32 %v8066_v31, %v4058_v20  ;;  %v4229_v3 = vadd.f32 1e-05, %v4197_v10  ;;  %v4198_v48 = vmul.f32 0.03125, %v4142_v13  ;;  %v4121_v55 = vmul.f32 %v9007_v40, %v9007_v40 }
 0xa8b   : > { %v3992_v19 = vpop.xlane.xlu0 %3991  ;;  %v4511_v46 = vpack.c.bf16 %v4368_v2, %v4367_v54 }
 0xa8c   : > { %6439 = vrsqrt.f32 %v4229_v3  ;;  %v4230_v49 = vadd.f32 1e-05, %v4198_v48  ;;  %v4027_v57 = vmul.f32 0.03125, %v3992_v19  ;;  %4179 = vadd.xlane.f32.xlu0 %v4121_v55  ;;  %v4122_v62 = vmul.f32 %v9013_v29, %v9013_v29 }
 0xa8d   : > { %4677 = vmatmul.mubr.bf16.gmra.mrb[168].mxu1 %v4511_v46  ;;  %v3994_v9 = vpop.xlane.xlu1 %3993 }
 0xa8e   : > { %v6436_v22 = vpop.eup %6435  ;;  %6441 = vrsqrt.f32 %v4230_v49  ;;  %v4059_v18 = vsub.f32 %v8847_v26, %v4027_v57  ;;  %v4028_v15 = vmul.f32 0.03125, %v3994_v9  ;;  %4181 = vadd.xlane.f32.xlu1 %v4122_v62  ;;  %4686 = vmatprep.mubr.bf16.mxu1 %v9808_v52 }
 0xa8f   : > { %v4144_v7 = vpop.xlane.xlu0 %4143  ;;  %v4291_v24 = vmul.f32 %v6436_v22, %v8794_v42 }
 0xa90   : > { %v6438_v28 = vpop.eup %6437  ;;  %v9023_v35 = vmul.f32 %v8066_v31, %v4059_v18  ;;  %v4060_v44 = vsub.f32 %v8857_v1, %v4028_v15  ;;  %v4199_v36 = vmul.f32 0.03125, %v4144_v7 }
 0xa91   : > { %v4146_v45 = vpop.xlane.xlu1 %4145  ;;  %v4292_v63 = vmul.f32 %v6438_v28, %v8799_v61  ;;  %v4330_v25 = vmul.f32 %v8976_v32, %v4291_v24 }
 0xa92   : > { %v9029_v26 = vmul.f32 %v8066_v31, %v4060_v44  ;;  %v4231_v27 = vadd.f32 1e-05, %v4199_v36  ;;  %v4200_v17 = vmul.f32 0.03125, %v4146_v45  ;;  %v4123_v42 = vmul.f32 %v9023_v35, %v9023_v35 }
 0xa93   : > { %v3996_v50 = vpop.xlane.xlu0 %3995  ;;  %v4331_v33 = vmul.f32 %v8976_v32, %v4292_v63  ;;  %v4369_v13 = vadd.f32 %v8993_v21, %v4330_v25 }
 0xa94   : > { %6443 = vrsqrt.f32 %v4231_v27  ;;  %v4232_v20 = vadd.f32 1e-05, %v4200_v17  ;;  %v4029_v1 = vmul.f32 0.03125, %v3996_v50  ;;  %4183 = vadd.xlane.f32.xlu0 %v4123_v42  ;;  %v4124_v61 = vmul.f32 %v9029_v26, %v9029_v26 }
 0xa95   : > { %v3998_v10 = vpop.xlane.xlu1 %3997  ;;  %v4370_v54 = vadd.f32 %v8993_v21, %v4331_v33 }
 0xa96   : > { %v6440_v2 = vpop.eup %6439  ;;  %6445 = vrsqrt.f32 %v4232_v20  ;;  %v4061_v3 = vsub.f32 %v8883_v0, %v4029_v1  ;;  %v4030_v48 = vmul.f32 0.03125, %v3998_v10  ;;  %4185 = vadd.xlane.f32.xlu1 %v4124_v61 }
 0xa97   : > { %v4148_v55 = vpop.xlane.xlu0 %4147  ;;  %v4512_v19 = vpack.c.bf16 %v4370_v54, %v4369_v13  ;;  %v4293_v46 = vmul.f32 %v6440_v2, %v8818_v16 }
 0xa98   : > { %v6442_v49 = vpop.eup %6441  ;;  %v9041_v57 = vmul.f32 %v8066_v31, %v4061_v3  ;;  %v4062_v62 = vsub.f32 %v8889_v34, %v4030_v48  ;;  %v4201_v9 = vmul.f32 0.03125, %v4148_v55 }
 0xa99   : > { %4687 = vmatmul.mubr.bf16.gmra.mrb[172].mxu1 %v4512_v19  ;;  %v4150_v22 = vpop.xlane.xlu1 %4149  ;;  %v4294_v18 = vmul.f32 %v6442_v49, %v8830_v4  ;;  %v4332_v15 = vmul.f32 %v8976_v32, %v4293_v46 }
 0xa9a   : > { %v9047_v0 = vmul.f32 %v8066_v31, %v4062_v62  ;;  %v4233_v7 = vadd.f32 1e-05, %v4201_v9  ;;  %v4202_v24 = vmul.f32 0.03125, %v4150_v22  ;;  %v4125_v16 = vmul.f32 %v9041_v57, %v9041_v57  ;;  %4696 = vmatprep.mubr.bf16.mxu1 %v9808_v52 }
 0xa9b   : > { %v4152_v28 = vpop.xlane.xlu0 %4151  ;;  %v4333_v34 = vmul.f32 %v8976_v32, %v4294_v18  ;;  %v4371_v63 = vadd.f32 %v8993_v21, %v4332_v15 }
 0xa9c   : > { %6447 = vrsqrt.f32 %v4233_v7  ;;  %v4234_v44 = vadd.f32 1e-05, %v4202_v24  ;;  %v4203_v36 = vmul.f32 0.03125, %v4152_v28  ;;  %4187 = vadd.xlane.f32.xlu0 %v4125_v16  ;;  %v4126_v4 = vmul.f32 %v9047_v0, %v9047_v0 }
 0xa9d   : > { %v4154_v45 = vpop.xlane.xlu1 %4153  ;;  %v4372_v25 = vadd.f32 %v8993_v21, %v4333_v34 }
 0xa9e   : > { %v6444_v27 = vpop.eup %6443  ;;  %6449 = vrsqrt.f32 %v4234_v44  ;;  %v4235_v17 = vadd.f32 1e-05, %v4203_v36  ;;  %v4204_v42 = vmul.f32 0.03125, %v4154_v45  ;;  %4189 = vadd.xlane.f32.xlu1 %v4126_v4 }
 0xa9f   : > { %v4156_v50 = vpop.xlane.xlu0 %4155  ;;  %v4513_v33 = vpack.c.bf16 %v4372_v25, %v4371_v63  ;;  %v4295_v20 = vmul.f32 %v6444_v27, %v8860_v14 }
 0xaa0   : > { %v6446_v1 = vpop.eup %6445  ;;  %6451 = vrsqrt.f32 %v4235_v17  ;;  %v4236_v61 = vadd.f32 1e-05, %v4204_v42  ;;  %v4205_v10 = vmul.f32 0.03125, %v4156_v50 }
 0xaa1   : > { %4697 = vmatmul.mubr.bf16.gmra.mrb[176].mxu1 %v4513_v33  ;;  %v4158_v13 = vpop.xlane.xlu1 %4157  ;;  %v4296_v54 = vmul.f32 %v6446_v1, %v8866_v23  ;;  %v4334_v2 = vmul.f32 %v8976_v32, %v4295_v20 }
 0xaa2   : > { %6453 = vrsqrt.f32 %v4236_v61  ;;  %v4206_v3 = vmul.f32 0.03125, %v4158_v13  ;;  %4706 = vmatprep.mubr.bf16.mxu1 %v9808_v52  ;;  %v4237_v55 = vadd.f32 1e-05, %v4205_v10 }
 0xaa3   : > { %v4335_v48 = vmul.f32 %v8976_v32, %v4296_v54  ;;  %v4373_v14 = vadd.f32 %v8993_v21, %v4334_v2 }
 0xaa4   : > { %v4238_v19 = vadd.f32 1e-05, %v4206_v3 }
 0xaa5   : > { %v4374_v46 = vadd.f32 %v8993_v21, %v4335_v48 }
 0xaa6   : > { %v6448_v49 = vpop.eup %6447  ;;  %6455 = vrsqrt.f32 %v4238_v19 }
 0xaa7   : > { %v4514_v62 = vpack.c.bf16 %v4374_v46, %v4373_v14  ;;  %v4297_v9 = vmul.f32 %v6448_v49, %v8886_v30  ;;  %6457 = vrsqrt.f32 %v4237_v55 }
 0xaa8   : > { %v6450_v23 = vpop.eup %6449 }
 0xaa9   : > { %4707 = vmatmul.mubr.bf16.gmra.mrb[180].mxu1 %v4514_v62  ;;  %v4298_v22 = vmul.f32 %v6450_v23, %v8892_v51  ;;  %v4336_v18 = vmul.f32 %v8976_v32, %v4297_v9 }
 0xaaa   : > { %v6452_v15 = vpop.eup %6451  ;;  %4716 = vmatprep.mubr.bf16.mxu1 %v9808_v52 }
 0xaab   : > { %v4337_v7 = vmul.f32 %v8976_v32, %v4298_v22  ;;  %v4375_v28 = vadd.f32 %v8993_v21, %v4336_v18  ;;  %v4299_v30 = vmul.f32 %v6452_v15, %v8900_v59 }
 0xaac   : > { %v6454_v24 = vpop.eup %6453  ;;  %v4160_v16 = vpop.xlane.xlu0 %4159 }
 0xaad   : > { %v4207_v34 = vmul.f32 0.03125, %v4160_v16  ;;  %v4376_v44 = vadd.f32 %v8993_v21, %v4337_v7  ;;  %v4300_v36 = vmul.f32 %v6454_v24, %v8906_v12  ;;  %v4338_v33 = vmul.f32 %v8976_v32, %v4299_v30  ;;  %v4504_v30 = vpop.f32.mrb[160].mxu1 }
 0xaae   : > { %v4162_v4 = vpop.xlane.xlu1 %4161 }
 0xaaf   : > { %v4239_v51 = vadd.f32 1e-05, %v4207_v34  ;;  %v4208_v45 = vmul.f32 0.03125, %v4162_v4  ;;  %v4515_v63 = vpack.c.bf16 %v4376_v44, %v4375_v28  ;;  %v4339_v25 = vmul.f32 %v8976_v32, %v4300_v36  ;;  %v5352_v44 = vld [vmem:[%s9507_s17] ss:$0 sm:$0xff]  ;;  %v6006_v4 = vpop.f32.mrb[161].mxu1 }
 0xab0   : > { %v6456_v27 = vpop.eup %6455  ;;  %v4164_v17 = vpop.xlane.xlu0 %4163  ;;  %v4377_v54 = vadd.f32 %v8993_v21, %v4338_v33  ;;  %v4505_v36 = vadd.f32 %v5352_v44, %v4504_v30 }
 0xab1   : > { %6459 = vrsqrt.f32 %v4239_v51  ;;  %v4240_v42 = vadd.f32 1e-05, %v4208_v45  ;;  %v4209_v50 = vmul.f32 0.03125, %v4164_v17  ;;  %4717 = vmatmul.mubr.bf16.gmra.mrb[184].mxu1 %v4515_v63  ;;  %v6458_v20 = vpop.eup %6457  ;;  %v4378_v12 = vadd.f32 %v8993_v21, %v4339_v25  ;;  %v4507_v63 = vpop.f32.mrb[162].mxu1 }
 0xab2   : > { %v4166_v1 = vpop.xlane.xlu1 %4165  ;;  %4726 = vmatprep.mubr.bf16.mxu1 %v9808_v52  ;;  %v4302_v61 = vmul.f32 %v6456_v27, %v8918_v38  ;;  %v4301_v2 = vmul.f32 %v6458_v20, %v8912_v53  ;;  %v9097_v25 = vpack.c.bf16 %v4505_v36, %v4505_v36  ;;  %v6007_v27 = vpop.f32.mrb[163].mxu1 }
 0xab3   : > { %6461 = vrsqrt.f32 %v4240_v42  ;;  %v4210_v59 = vmul.f32 0.03125, %v4166_v1  ;;  %v4241_v10 = vadd.f32 1e-05, %v4209_v50  ;;  %v4516_v3 = vpack.c.bf16 %v4378_v12, %v4377_v54 }
 0xab4   : > { %v4341_v48 = vmul.f32 %v8976_v32, %v4302_v61  ;;  %v4340_v55 = vmul.f32 %v8976_v32, %v4301_v2  ;;  %5706 = vmatprep.mubr.bf16.mxu0 %v9097_v25 }
 0xab5   : > { %v4242_v13 = vadd.f32 1e-05, %v4210_v59 }
 0xab6   : > { %v4380_v14 = vadd.f32 %v8993_v21, %v4341_v48  ;;  %v4379_v46 = vadd.f32 %v8993_v21, %v4340_v55 }
 0xab7   : > { %6463 = vrsqrt.f32 %v4242_v13 }
 0xab8   : > { %6465 = vrsqrt.f32 %v4241_v10  ;;  %v4517_v23 = vpack.c.bf16 %v4380_v14, %v4379_v46 }
 0xab9   : > { %4727 = vmatmul.mubr.bf16.gmra.mrb[188].mxu1 %v4516_v3 }
 0xaba   : > { %4736 = vmatprep.mubr.bf16.mxu1 %v9808_v52 }
 0xabb   : > { %v6460_v19 = vpop.eup %6459 }
 0xabc   : > { %v4303_v49 = vmul.f32 %v6460_v19, %v8926_v6 }
 0xabd   : > { %v6462_v38 = vpop.eup %6461 }
 0xabe   : > { %v4168_v62 = vpop.xlane.xlu0 %4167  ;;  %v4304_v53 = vmul.f32 %v6462_v38, %v8930_v8  ;;  %v4342_v16 = vmul.f32 %v8976_v32, %v4303_v49 }
 0xabf   : > { %v4211_v9 = vmul.f32 0.03125, %v4168_v62 }
 0xac0   : > { %v4170_v22 = vpop.xlane.xlu1 %4169  ;;  %v4343_v18 = vmul.f32 %v8976_v32, %v4304_v53  ;;  %v4381_v51 = vadd.f32 %v8993_v21, %v4342_v16 }
 0xac1   : > { %v6464_v15 = vpop.eup %6463  ;;  %v4243_v7 = vadd.f32 1e-05, %v4211_v9  ;;  %v4212_v24 = vmul.f32 0.03125, %v4170_v22  ;;  %4737 = vmatmul.mubr.bf16.gmra.mrb[192].mxu1 %v4517_v23 }
 0xac2   : > { %v6466_v28 = vpop.eup %6465  ;;  %4746 = vmatprep.mubr.bf16.mxu1 %v9808_v52  ;;  %v4382_v6 = vadd.f32 %v8993_v21, %v4343_v18  ;;  %v4306_v8 = vmul.f32 %v6464_v15, %v8942_v56 }
 0xac3   : > { %6467 = vrsqrt.f32 %v4243_v7  ;;  %v4244_v34 = vadd.f32 1e-05, %v4212_v24  ;;  %v4305_v45 = vmul.f32 %v6466_v28, %v8936_v60 }
 0xac4   : > { %v4518_v17 = vpack.c.bf16 %v4382_v6, %v4381_v51  ;;  %v4345_v42 = vmul.f32 %v8976_v32, %v4306_v8 }
 0xac5   : > { %6469 = vrsqrt.f32 %v4244_v34  ;;  %v4344_v56 = vmul.f32 %v8976_v32, %v4305_v45 }
 0xac6   : > { %v4384_v50 = vadd.f32 %v8993_v21, %v4345_v42 }
 0xac7   : > { %v4383_v20 = vadd.f32 %v8993_v21, %v4344_v56 }
 0xac9   : > { %4747 = vmatmul.mubr.bf16.gmra.mrb[196].mxu1 %v4518_v17  ;;  %v4519_v59 = vpack.c.bf16 %v4384_v50, %v4383_v20 }
 0xaca   : > { %4756 = vmatprep.mubr.bf16.mxu1 %v9808_v52 }
 0xacd   : > { %v6468_v33 = vpop.eup %6467 }
 0xace   : > { %v4307_v60 = vmul.f32 %v6468_v33, %v8950_v58 }
 0xacf   : > { %v6470_v1 = vpop.eup %6469 }
 0xad0   : > { %v4308_v12 = vmul.f32 %v6470_v1, %v8954_v37  ;;  %v4346_v61 = vmul.f32 %v8976_v32, %v4307_v60 }
 0xad1   : > { %4757 = vmatmul.mubr.bf16.gmra.mrb[200].mxu1 %v4519_v59 }
 0xad2   : > { %4766 = vmatprep.mubr.bf16.mxu1 %v9808_v52  ;;  %v4347_v10 = vmul.f32 %v8976_v32, %v4308_v12  ;;  %v4385_v54 = vadd.f32 %v8993_v21, %v4346_v61 }
 0xad4   : > { %v4386_v13 = vadd.f32 %v8993_v21, %v4347_v10 }
 0xad6   : > { %v4520_v2 = vpack.c.bf16 %v4386_v13, %v4385_v54 }
 0xad9   : > { %4767 = vmatmul.mubr.bf16.gmra.mrb[204].mxu1 %v4520_v2 }
 0xada   : > { %4776 = vmatprep.mubr.bf16.mxu1 %v9808_v52 }
 0xb05   : > { %v4172_v58 = vpop.xlane.xlu0 %4171 }
 0xb06   : > { %v4213_v3 = vmul.f32 0.03125, %v4172_v58 }
 0xb07   : > { %v4174_v48 = vpop.xlane.xlu1 %4173 }
 0xb08   : > { %v4245_v55 = vadd.f32 1e-05, %v4213_v3  ;;  %v4214_v37 = vmul.f32 0.03125, %v4174_v48 }
 0xb0a   : > { %6471 = vrsqrt.f32 %v4245_v55  ;;  %v4246_v19 = vadd.f32 1e-05, %v4214_v37 }
 0xb0c   : > { %6473 = vrsqrt.f32 %v4246_v19 }
 0xb0d   : > { %v4176_v14 = vpop.xlane.xlu0 %4175 }
 0xb0e   : > { %v4215_v38 = vmul.f32 0.03125, %v4176_v14 }
 0xb0f   : > { %v4178_v46 = vpop.xlane.xlu1 %4177 }
 0xb10   : > { %v4247_v49 = vadd.f32 1e-05, %v4215_v38  ;;  %v4216_v62 = vmul.f32 0.03125, %v4178_v46 }
 0xb12   : > { %6475 = vrsqrt.f32 %v4247_v49  ;;  %v4248_v53 = vadd.f32 1e-05, %v4216_v62 }
 0xb14   : > { %v6472_v9 = vpop.eup %6471  ;;  %6477 = vrsqrt.f32 %v4248_v53 }
 0xb15   : > { %v4309_v23 = vmul.f32 %v6472_v9, %v8962_v41 }
 0xb16   : > { %v6474_v22 = vpop.eup %6473 }
 0xb17   : > { %v4310_v18 = vmul.f32 %v6474_v22, %v8966_v47  ;;  %v4348_v15 = vmul.f32 %v8976_v32, %v4309_v23 }
 0xb19   : > { %v4180_v7 = vpop.xlane.xlu0 %4179  ;;  %v4349_v24 = vmul.f32 %v8976_v32, %v4310_v18  ;;  %v4387_v34 = vadd.f32 %v8993_v21, %v4348_v15 }
 0xb1a   : > { %v4217_v16 = vmul.f32 0.03125, %v4180_v7 }
 0xb1b   : > { %v4182_v28 = vpop.xlane.xlu1 %4181  ;;  %v4388_v6 = vadd.f32 %v8993_v21, %v4349_v24 }
 0xb1c   : > { %v6476_v8 = vpop.eup %6475  ;;  %v4249_v44 = vadd.f32 1e-05, %v4217_v16  ;;  %v4218_v30 = vmul.f32 0.03125, %v4182_v28  ;;  %v9809_v28 = vld [vmem:[#allocation34_spill] sm:$0xff] }
 0xb1d   : > { %v4521_v36 = vpack.c.bf16 %v4388_v6, %v4387_v34  ;;  %v4311_v41 = vmul.f32 %v6476_v8, %v8980_v39  ;;  %v9810_v34 = vsub.s32 1, %v9809_v28 }
 0xb1e   : > { %v6478_v4 = vpop.eup %6477  ;;  %6479 = vrsqrt.f32 %v4249_v44  ;;  %v4250_v47 = vadd.f32 1e-05, %v4218_v30 }
 0xb1f   : > { %4777 = vmatmul.mubr.bf16.gmra.mrb[208].mxu1 %v4521_v36  ;;  %v4312_v51 = vmul.f32 %v6478_v4, %v8986_v11  ;;  %v4350_v45 = vmul.f32 %v8976_v32, %v4311_v41 }
 0xb20   : > { %6481 = vrsqrt.f32 %v4250_v47  ;;  %4786 = vmatprep.mubr.bf16.mxu1 %v9808_v52 }
 0xb21   : > { %v4184_v63 = vpop.xlane.xlu0 %4183  ;;  %v4351_v27 = vmul.f32 %v8976_v32, %v4312_v51  ;;  %v4389_v56 = vadd.f32 %v8993_v21, %v4350_v45 }
 0xb22   : > { %v4219_v17 = vmul.f32 0.03125, %v4184_v63 }
 0xb23   : > { %v4186_v42 = vpop.xlane.xlu1 %4185  ;;  %v4390_v39 = vadd.f32 %v8993_v21, %v4351_v27 }
 0xb24   : > { %v4251_v50 = vadd.f32 1e-05, %v4219_v17  ;;  %v4220_v33 = vmul.f32 0.03125, %v4186_v42 }
 0xb25   : > { %v4522_v20 = vpack.c.bf16 %v4390_v39, %v4389_v56 }
 0xb26   : > { %6483 = vrsqrt.f32 %v4251_v50  ;;  %v4252_v60 = vadd.f32 1e-05, %v4220_v33 }
 0xb27   : > { %4787 = vmatmul.mubr.bf16.gmra.mrb[212].mxu1 %v4522_v20 }
 0xb28   : > { %v6480_v11 = vpop.eup %6479  ;;  %6485 = vrsqrt.f32 %v4252_v60  ;;  %4796 = vmatprep.mubr.bf16.mxu1 %v9808_v52 }
 0xb29   : > { %v4188_v1 = vpop.xlane.xlu0 %4187  ;;  %v4313_v59 = vmul.f32 %v6480_v11, %v9007_v40 }
 0xb2a   : > { %v6482_v12 = vpop.eup %6481  ;;  %v4221_v61 = vmul.f32 0.03125, %v4188_v1 }
 0xb2b   : > { %v4190_v10 = vpop.xlane.xlu1 %4189  ;;  %v4314_v13 = vmul.f32 %v6482_v12, %v9013_v29  ;;  %v4352_v54 = vmul.f32 %v8976_v32, %v4313_v59 }
 0xb2c   : > { %v4253_v2 = vadd.f32 1e-05, %v4221_v61  ;;  %v4222_v58 = vmul.f32 0.03125, %v4190_v10 }
 0xb2d   : > { %v4353_v3 = vmul.f32 %v8976_v32, %v4314_v13  ;;  %v4391_v55 = vadd.f32 %v8993_v21, %v4352_v54 }
 0xb2e   : > { %6487 = vrsqrt.f32 %v4253_v2  ;;  %v4254_v48 = vadd.f32 1e-05, %v4222_v58 }
 0xb2f   : > { %v4392_v37 = vadd.f32 %v8993_v21, %v4353_v3 }
 0xb30   : > { %v6484_v19 = vpop.eup %6483  ;;  %6489 = vrsqrt.f32 %v4254_v48 }
 0xb31   : > { %v4523_v40 = vpack.c.bf16 %v4392_v37, %v4391_v55  ;;  %v4315_v14 = vmul.f32 %v6484_v19, %v9023_v35 }
 0xb32   : > { %v6486_v38 = vpop.eup %6485 }
 0xb33   : > { %4797 = vmatmul.mubr.bf16.gmra.mrb[216].mxu1 %v4523_v40  ;;  %v4316_v29 = vmul.f32 %v6486_v38, %v9029_v26  ;;  %v4354_v46 = vmul.f32 %v8976_v32, %v4315_v14 }
 0xb34   : > { %4806 = vmatprep.mubr.bf16.mxu1 %v9808_v52 }
 0xb35   : > { %v4355_v49 = vmul.f32 %v8976_v32, %v4316_v29  ;;  %v4393_v62 = vadd.f32 %v8993_v21, %v4354_v46 }
 0xb37   : > { %v4394_v53 = vadd.f32 %v8993_v21, %v4355_v49 }
 0xb38   : > { %v6488_v9 = vpop.eup %6487 }
 0xb39   : > { %v4524_v23 = vpack.c.bf16 %v4394_v53, %v4393_v62  ;;  %v4317_v22 = vmul.f32 %v6488_v9, %v9041_v57  ;;  %v4542_v57 = vld [vmem:[%s9509_s19] sm:$0x3] }
 0xb3a   : > { %v6490_v18 = vpop.eup %6489  ;;  %v9152_v6 = vrot.slane %v4542_v57, %v9810_v34 }
 0xb3b   : > { %4807 = vmatmul.mubr.bf16.gmra.mrb[220].mxu1 %v4524_v23  ;;  %v4318_v35 = vmul.f32 %v6490_v18, %v9047_v0  ;;  %v4356_v26 = vmul.f32 %v8976_v32, %v4317_v22  ;;  %v9811_v0 = vsub.s32 0, %v9809_v28 }
 0xb3c   : > { %4816 = vmatprep.mubr.bf16.mxu1 %v9808_v52 }
 0xb3d   : > { %v4357_v15 = vmul.f32 %v8976_v32, %v4318_v35  ;;  %v4395_v7 = vadd.f32 %v8993_v21, %v4356_v26  ;;  %v9156_v8 = vrot.slane %v4542_v57, %v9811_v0 }
 0xb3f   : > { %v4396_v24 = vadd.f32 %v8993_v21, %v4357_v15 }
 0xb41   : > { %v4525_v16 = vpack.c.bf16 %v4396_v24, %v4395_v7 }
 0xb43   : > { %4817 = vmatmul.mubr.bf16.gmra.mrb[224].mxu1 %v4525_v16 }
 0xb58   : > { %v4668_v52 = vpop.f32.mrb[164].mxu1 }
 0xb59   : > { %v4670_v32 = vpop.f32.mrb[165].mxu1  ;;  %v9162_v30 = vadd.f32 %v4668_v52, %v9156_v8 }
 0xb5a   : > { %v9159_v44 = vadd.f32 %v4670_v32, %v9152_v6  ;;  %v4672_v21 = vpop.f32.mrb[166].mxu1 }
 0xb5b   : > { %v9165_v36 = vadd.f32 %v4672_v21, %v9156_v8  ;;  %v4674_v41 = vpop.f32.mrb[167].mxu1 }
 0xb5c   : > { %v9168_v4 = vadd.f32 %v4674_v41, %v9152_v6 }
 0xb5d   : > { %v4828_v47 = vpack.c.bf16 %v9165_v36, %v9162_v30 }
 0xb5e   : > { %v4904_v51 = vpack.c.bf16 %v9168_v4, %v9159_v44  ;;  %v9815_v44 = vmov 0.0  }
 0xb60   : > { %v4678_v45 = vpop.f32.mrb[168].mxu1 }
 0xb61   : > { %v4680_v63 = vpop.f32.mrb[169].mxu1  ;;  %v9178_v42 = vadd.f32 %v4678_v45, %v9156_v8 }
 0xb62   : > { %v9175_v27 = vadd.f32 %v4680_v63, %v9152_v6  ;;  %v4682_v17 = vpop.f32.mrb[170].mxu1 }
 0xb63   : > { %v9181_v56 = vadd.f32 %v4682_v17, %v9156_v8  ;;  %v4684_v39 = vpop.f32.mrb[171].mxu1 }
 0xb64   : > { %v9184_v50 = vadd.f32 %v4684_v39, %v9152_v6 }
 0xb65   : > { %v4829_v33 = vpack.c.bf16 %v9181_v56, %v9178_v42 }
 0xb66   : > { %v4905_v20 = vpack.c.bf16 %v9184_v50, %v9175_v27 }
 0xb6c   : > { %v4688_v60 = vpop.f32.mrb[172].mxu1 }
 0xb6d   : > { %v4690_v11 = vpop.f32.mrb[173].mxu1  ;;  %v9194_v12 = vadd.f32 %v4688_v60, %v9156_v8 }
 0xb6e   : > { %v9191_v1 = vadd.f32 %v4690_v11, %v9152_v6  ;;  %v4692_v59 = vpop.f32.mrb[174].mxu1 }
 0xb6f   : > { %v9197_v61 = vadd.f32 %v4692_v59, %v9156_v8  ;;  %v4694_v10 = vpop.f32.mrb[175].mxu1 }
 0xb70   : > { %v9200_v13 = vadd.f32 %v4694_v10, %v9152_v6 }
 0xb71   : > { %v4830_v54 = vpack.c.bf16 %v9197_v61, %v9194_v12 }
 0xb72   : > { %v4906_v2 = vpack.c.bf16 %v9200_v13, %v9191_v1 }
 0xb74   : > { %v4698_v58 = vpop.f32.mrb[176].mxu1 }
 0xb75   : > { %v4700_v3 = vpop.f32.mrb[177].mxu1  ;;  %v9210_v37 = vadd.f32 %v4698_v58, %v9156_v8 }
 0xb76   : > { %v9207_v48 = vadd.f32 %v4700_v3, %v9152_v6  ;;  %v4702_v55 = vpop.f32.mrb[178].mxu1 }
 0xb77   : > { %v9213_v19 = vadd.f32 %v4702_v55, %v9156_v8  ;;  %v4704_v40 = vpop.f32.mrb[179].mxu1 }
 0xb78   : > { %v9216_v14 = vadd.f32 %v4704_v40, %v9152_v6 }
 0xb79   : > { %v4831_v38 = vpack.c.bf16 %v9213_v19, %v9210_v37 }
 0xb7a   : > { %v4907_v29 = vpack.c.bf16 %v9216_v14, %v9207_v48 }
 0xb7c   : > { %v4708_v46 = vpop.f32.mrb[180].mxu1 }
 0xb7d   : > { %v4710_v49 = vpop.f32.mrb[181].mxu1  ;;  %v9226_v9 = vadd.f32 %v4708_v46, %v9156_v8 }
 0xb7e   : > { %v9223_v62 = vadd.f32 %v4710_v49, %v9152_v6  ;;  %v4712_v53 = vpop.f32.mrb[182].mxu1 }
 0xb7f   : > { %v9229_v23 = vadd.f32 %v4712_v53, %v9156_v8  ;;  %v4714_v22 = vpop.f32.mrb[183].mxu1 }
 0xb80   : > { %v9232_v18 = vadd.f32 %v4714_v22, %v9152_v6 }
 0xb81   : > { %v4832_v35 = vpack.c.bf16 %v9229_v23, %v9226_v9 }
 0xb82   : > { %v4908_v26 = vpack.c.bf16 %v9232_v18, %v9223_v62 }
 0xb84   : > { %v4718_v15 = vpop.f32.mrb[184].mxu1 }
 0xb85   : > { %v4720_v7 = vpop.f32.mrb[185].mxu1  ;;  %v9242_v57 = vadd.f32 %v4718_v15, %v9156_v8 }
 0xb86   : > { %v9239_v24 = vadd.f32 %v4720_v7, %v9152_v6  ;;  %v4722_v16 = vpop.f32.mrb[186].mxu1 }
 0xb87   : > { %v9245_v28 = vadd.f32 %v4722_v16, %v9156_v8  ;;  %v4724_v34 = vpop.f32.mrb[187].mxu1 }
 0xb88   : > { %v9248_v0 = vadd.f32 %v4724_v34, %v9152_v6 }
 0xb89   : > { %v4833_v52 = vpack.c.bf16 %v9245_v28, %v9242_v57 }
 0xb8c   : > { %v4728_v21 = vpop.f32.mrb[188].mxu1 }
 0xb8d   : > { %v4730_v41 = vpop.f32.mrb[189].mxu1  ;;  %v9258_v17 = vadd.f32 %v4728_v21, %v9156_v8 }
 0xb8e   : > { %v9255_v45 = vadd.f32 %v4730_v41, %v9152_v6  ;;  %v4732_v63 = vpop.f32.mrb[190].mxu1 }
 0xb8f   : > { %v9261_v39 = vadd.f32 %v4732_v63, %v9156_v8  ;;  %v4734_v60 = vpop.f32.mrb[191].mxu1 }
 0xb90   : > { %v9264_v11 = vadd.f32 %v4734_v60, %v9152_v6 }
 0xb91   : > { %v4834_v59 = vpack.c.bf16 %v9261_v39, %v9258_v17 }
 0xb94   : > { %v4738_v58 = vpop.f32.mrb[192].mxu1 }
 0xb95   : > { %v4740_v3 = vpop.f32.mrb[193].mxu1  ;;  %v9274_v46 = vadd.f32 %v4738_v58, %v9156_v8 }
 0xb96   : > { %v9271_v55 = vadd.f32 %v4740_v3, %v9152_v6  ;;  %v4742_v40 = vpop.f32.mrb[194].mxu1 }
 0xb97   : > { %v9277_v49 = vadd.f32 %v4742_v40, %v9156_v8  ;;  %v4744_v53 = vpop.f32.mrb[195].mxu1 }
 0xb98   : > { %v9280_v22 = vadd.f32 %v4744_v53, %v9152_v6 }
 0xb99   : > { %v4835_v15 = vpack.c.bf16 %v9277_v49, %v9274_v46  ;;  %v6156_v46 = vld [vmem:[%s9510_s20 + $0x8] sm:$0xff]   ;;  %v6157_v49 = vld [vmem:[%s9510_s20 + $0x10] sm:$0xff]  }
 0xb9c   : > { %v4748_v16 = vpop.f32.mrb[196].mxu1 }
 0xb9d   : > { %v4750_v34 = vpop.f32.mrb[197].mxu1  ;;  %v4749_v63 = vadd.f32 %v4748_v16, %v9156_v8 }
 0xb9e   : > { %v9287_v21 = vadd.f32 %v4750_v34, %v9152_v6  ;;  %v4752_v41 = vpop.f32.mrb[198].mxu1 }
 0xb9f   : > { %v4753_v60 = vadd.f32 %v4752_v41, %v9156_v8  ;;  %v4754_v58 = vpop.f32.mrb[199].mxu1 }
 0xba0   : > { %v9292_v3 = vadd.f32 %v4754_v58, %v9152_v6 }
 0xba1   : > { %v4836_v40 = vpack.c.bf16 %v4753_v60, %v4749_v63 }
 0xba2   : > { %v4912_v53 = vpack.c.bf16 %v9292_v3, %v9287_v21  ;;  %v6161_v21 = vld [vmem:[%s9510_s20 + $0x30] sm:$0xff]   ;;  %v6162_v3 = vld [vmem:[%s9510_s20 + $0x38] sm:$0xff]  }
 0xba3   : > { %5690 = vmatprep.subr.bf16.mxu0 %v4836_v40 }
 0xba4   : > { %v4758_v5 = vpop.f32.mrb[200].mxu1  ;;  %5691 = vmatpush3.bf16.xpose.msra.mxu0 %v4828_v47 }
 0xba5   : > { %v4760_v34 = vpop.f32.mrb[201].mxu1  ;;  %v4759_v41 = vadd.f32 %v4758_v5, %v9156_v8 }
 0xba6   : > { %v9300_v7 = vadd.f32 %v4760_v34, %v9152_v6  ;;  %v4762_v16 = vpop.f32.mrb[202].mxu1 }
 0xba7   : > { %v4763_v58 = vadd.f32 %v4762_v16, %v9156_v8  ;;  %v4764_v10 = vpop.f32.mrb[203].mxu1 }
 0xba8   : > { %v9305_v63 = vadd.f32 %v4764_v10, %v9152_v6 }
 0xba9   : > { %v4837_v60 = vpack.c.bf16 %v4763_v58, %v4759_v41 }
 0xbaa   : > { %v4913_v40 = vpack.c.bf16 %v9305_v63, %v9300_v7  ;;  %v6160_v7 = vld [vmem:[%s9510_s20 + $0x28] sm:$0xff]  }
 0xbab   : > { %5692 = vmatprep.subr.bf16.mxu0 %v4837_v60 }
 0xbac   : > { %v4768_v30 = vpop.f32.mrb[204].mxu1  ;;  %5693 = vmatpush3.bf16.xpose.msra.mxu0 %v4829_v33 }
 0xbad   : > { %v4770_v36 = vpop.f32.mrb[205].mxu1  ;;  %v4769_v34 = vadd.f32 %v4768_v30, %v9156_v8 }
 0xbae   : > { %v9313_v47 = vadd.f32 %v4770_v36, %v9152_v6  ;;  %v4772_v5 = vpop.f32.mrb[206].mxu1 }
 0xbaf   : > { %v4773_v10 = vadd.f32 %v4772_v5, %v9156_v8  ;;  %v4774_v16 = vpop.f32.mrb[207].mxu1 }
 0xbb0   : > { %v9318_v41 = vadd.f32 %v4774_v16, %v9152_v6 }
 0xbb1   : > { %v4838_v58 = vpack.c.bf16 %v4773_v10, %v4769_v34 }
 0xbb2   : > { %v4914_v60 = vpack.c.bf16 %v9318_v41, %v9313_v47 }
 0xbb3   : > { %5694 = vmatprep.subr.bf16.mxu0 %v4838_v58 }
 0xbb4   : > { %5695 = vmatpush3.bf16.xpose.msra.mxu0 %v4830_v54 }
 0xbf2   : > { %v4778_v42 = vpop.f32.mrb[208].mxu1 }
 0xbf3   : > { %v4780_v56 = vpop.f32.mrb[209].mxu1  ;;  %v4779_v36 = vadd.f32 %v4778_v42, %v9156_v8 }
 0xbf4   : > { %v9326_v33 = vadd.f32 %v4780_v56, %v9152_v6  ;;  %v4782_v30 = vpop.f32.mrb[210].mxu1 }
 0xbf5   : > { %v4783_v5 = vadd.f32 %v4782_v30, %v9156_v8  ;;  %v4784_v16 = vpop.f32.mrb[211].mxu1 }
 0xbf6   : > { %v4785_v34 = vadd.f32 %v4784_v16, %v9152_v6 }
 0xbf7   : > { %v4839_v10 = vpack.c.bf16 %v4783_v5, %v4779_v36 }
 0xbf8   : > { %v4915_v58 = vpack.c.bf16 %v4785_v34, %v9326_v33 }
 0xbf9   : > { %5696 = vmatprep.subr.bf16.mxu0 %v4839_v10 }
 0xbfa   : > { %5697 = vmatpush3.bf16.xpose.msra.mxu0 %v4831_v38  ;;  %v4788_v12 = vpop.f32.mrb[212].mxu1 }
 0xbfb   : > { %v4790_v61 = vpop.f32.mrb[213].mxu1  ;;  %v4789_v42 = vadd.f32 %v4788_v12, %v9156_v8 }
 0xbfc   : > { %v4791_v54 = vadd.f32 %v4790_v61, %v9152_v6  ;;  %v4792_v56 = vpop.f32.mrb[214].mxu1 }
 0xbfd   : > { %v4793_v30 = vadd.f32 %v4792_v56, %v9156_v8  ;;  %v4794_v32 = vpop.f32.mrb[215].mxu1 }
 0xbfe   : > { %v4795_v16 = vadd.f32 %v4794_v32, %v9152_v6 }
 0xbff   : > { %v4840_v36 = vpack.c.bf16 %v4793_v30, %v4789_v42 }
 0xc00   : > { %v4916_v5 = vpack.c.bf16 %v4795_v16, %v4791_v54 }
 0xc01   : > { %5698 = vmatprep.subr.bf16.mxu0 %v4840_v36 }
 0xc02   : > { %5699 = vmatpush3.bf16.xpose.msra.mxu0 %v4832_v35 }
 0xc06   : > { %v4798_v37 = vpop.f32.mrb[216].mxu1 }
 0xc07   : > { %v4800_v19 = vpop.f32.mrb[217].mxu1  ;;  %v4799_v34 = vadd.f32 %v4798_v37, %v9156_v8 }
 0xc08   : > { %v4801_v38 = vadd.f32 %v4800_v19, %v9152_v6  ;;  %v4802_v33 = vpop.f32.mrb[218].mxu1 }
 0xc09   : > { %v4803_v10 = vadd.f32 %v4802_v33, %v9156_v8  ;;  %v4804_v12 = vpop.f32.mrb[219].mxu1 }
 0xc0a   : > { %v4805_v61 = vadd.f32 %v4804_v12, %v9152_v6 }
 0xc0b   : > { %v4841_v32 = vpack.c.bf16 %v4803_v10, %v4799_v34 }
 0xc0c   : > { %v4917_v56 = vpack.c.bf16 %v4805_v61, %v4801_v38 }
 0xc0d   : > { %5700 = vmatprep.subr.bf16.mxu0 %v4841_v32 }
 0xc0e   : > { %v4808_v54 = vpop.f32.mrb[220].mxu1  ;;  %5701 = vmatpush3.bf16.xpose.msra.mxu0 %v4833_v52 }
 0xc0f   : > { %v4810_v9 = vpop.f32.mrb[221].mxu1  ;;  %v4809_v42 = vadd.f32 %v4808_v54, %v9156_v8 }
 0xc10   : > { %v4811_v23 = vadd.f32 %v4810_v9, %v9152_v6  ;;  %v4812_v35 = vpop.f32.mrb[222].mxu1 }
 0xc11   : > { %v4813_v30 = vadd.f32 %v4812_v35, %v9156_v8  ;;  %v4814_v16 = vpop.f32.mrb[223].mxu1 }
 0xc12   : > { %v4815_v36 = vadd.f32 %v4814_v16, %v9152_v6  ;;  %v6164_v16 = vld [vmem:[%s9514_s24 + $0x8] sm:$0xff]  }
 0xc13   : > { %v4842_v37 = vpack.c.bf16 %v4813_v30, %v4809_v42  ;;  %v6163_v30 = vld [vmem:[%s9514_s24] sm:$0xff]  }
 0xc14   : > { %v4918_v19 = vpack.c.bf16 %v4815_v36, %v4811_v23  ;;  %v6503_v23 = vld [vmem:[%s9505_s15] sm:$0xff] }
 0xc15   : > { %5702 = vmatprep.subr.bf16.mxu0 %v4842_v37 }
 0xc16   : > { %v4818_v38 = vpop.f32.mrb[224].mxu1  ;;  %5703 = vmatpush3.bf16.xpose.msra.mxu0 %v4834_v59 }
 0xc17   : > { %v4820_v57 = vpop.f32.mrb[225].mxu1  ;;  %v4819_v33 = vadd.f32 %v4818_v38, %v9156_v8 }
 0xc18   : > { %v4821_v28 = vadd.f32 %v4820_v57, %v9152_v6  ;;  %v4822_v52 = vpop.f32.mrb[226].mxu1 }
 0xc19   : > { %v4823_v34 = vadd.f32 %v4822_v52, %v9156_v8  ;;  %v4824_v10 = vpop.f32.mrb[227].mxu1  ;;  %v9814_v8 = vpack.c.bf16 %v9280_v22, %v9271_v55  ;;  %v6155_v55 = vld [vmem:[%s9510_s20] sm:$0xff]   ;;  %v6158_v22 = vld [vmem:[%s9510_s20 + $0x18] sm:$0xff]  }
 0xc1a   : > { %v4825_v12 = vadd.f32 %v4824_v10, %v9152_v6  ;;  %v9813_v6 = vpack.c.bf16 %v9264_v11, %v9255_v45  ;;  %v6166_v52 = vld [vmem:[%s9514_s24 + $0x18] sm:$0xff]  }
 0xc1b   : > { %v4843_v61 = vpack.c.bf16 %v4823_v34, %v4819_v33  ;;  %v6168_v33 = vld [vmem:[%s9514_s24 + $0x28] sm:$0xff]   ;;  %v6169_v34 = vld [vmem:[%s9514_s24 + $0x30] sm:$0xff]   ;;  %v6170_v10 = vld [vmem:[%s9514_s24 + $0x38] sm:$0xff]  }
 0xc1c   : > { %v4919_v32 = vpack.c.bf16 %v4825_v12, %v4821_v28  ;;  %v6165_v28 = vld [vmem:[%s9514_s24 + $0x10] sm:$0xff]  }
 0xc1d   : > { %5704 = vmatprep.subr.bf16.mxu0 %v4843_v61 }
 0xc1e   : > { %5705 = vmatpush3.bf16.xpose.msra.mxu0 %v4835_v15  ;;  %v6159_v15 = vld [vmem:[%s9510_s20 + $0x20] sm:$0xff]  }
 0xc1f   : > { %5708 = vmatprep.subr.bf16.mxu0 %v4912_v53 }
 0xc25   : > { %5707 = vmatmul.mubr.bf16.vlgmr.msra.gmra.mrb[192].mxu0 %v9097_v25  ;;  %v9812_v25 = vpack.c.bf16 %v9248_v0, %v9239_v24 }
 0xc26   : > { %5709 = vmatpush3.bf16.msra.mxu0 %v4904_v51 }
 0xc27   : > { %5710 = vmatprep.subr.bf16.mxu0 %v4913_v40 }
 0xc2a   : > { %5711 = vmatpush3.bf16.msra.mxu0 %v4905_v20 }
 0xc2b   : > { %5712 = vmatprep.subr.bf16.mxu0 %v4914_v60 }
 0xc2e   : > { %5713 = vmatpush3.bf16.msra.mxu0 %v4906_v2 }
 0xc2f   : > { %5714 = vmatprep.subr.bf16.mxu0 %v4915_v58  ;;  %v5377_v58 = vld [vmem:[%s9511_s21] ss:$0 sm:$0xff] }
 0xc32   : > { %5715 = vmatpush3.bf16.msra.mxu0 %v4907_v29 }
 0xc33   : > { %5716 = vmatprep.subr.bf16.mxu0 %v4916_v5 }
 0xc36   : > { %5717 = vmatpush3.bf16.msra.mxu0 %v4908_v26 }
 0xc37   : > { %5718 = vmatprep.subr.bf16.mxu0 %v4917_v56 }
 0xc3a   : > { %5719 = vmatpush3.bf16.msra.mxu0 %v9812_v25 }
 0xc3b   : > { %5720 = vmatprep.subr.bf16.mxu0 %v4918_v19 }
 0xc3e   : > { %5721 = vmatpush3.bf16.msra.mxu0 %v9813_v6  ;;  %v5386_v6 = vld [vmem:[%s9512_s22] ss:$0 sm:$0xff] }
 0xc3f   : > { %5722 = vmatprep.subr.bf16.mxu0 %v4919_v32 }
 0xc42   : > { %5723 = vmatpush3.bf16.msra.mxu0 %v9814_v8 }
 0xc43   : > { %6008 = vmatprep.subr.bf16.mxu0 %v9815_v44 }
 0xcf8   : > { %v4878_v4 = vpop.f32.mrb[192].mxu0 }
 0xcf9   : > { %v4885_v51 = vmul.f32 0.17677669, %v4878_v4  ;;  %v4880_v27 = vpop.f32.mrb[193].mxu0  ;;  %v5387_v4 = vld [vmem:[%s9513_s23] ss:$0 sm:$0xff] }
 0xcfa   : > { %v4886_v50 = vmul.f32 0.17677669, %v4880_v27  ;;  %v4882_v20 = vpop.f32.mrb[194].mxu0 }
 0xcfb   : > { %v4883_v1 = vpop.f32.mrb[195].mxu0 }
 0xcfc   : > { %v4887_v13 = vmax.f32 %v4885_v51, %v4886_v50 }
 0xcfe   : > { %4888 = vmax.xlane.f32.xlu0 %v4887_v13 }
 0xd8b   : > { %v4889_v2 = vpop.xlane.xlu0 %4888 }
 0xd8c   : > { %v4890_v48 = vsub.f32 %v4885_v51, %v4889_v2  ;;  %v4891_v14 = vsub.f32 %v4886_v50, %v4889_v2 }
 0xd8e   : > { %v4892_v29 = vmul.f32 1.442695, %v4890_v48  ;;  %v4894_v62 = vmul.f32 1.442695, %v4891_v14 }
 0xd90   : > { %6491 = vpow2.f32 %v4892_v29 }
 0xd91   : > { %6493 = vpow2.f32 %v4894_v62 }
 0xd9a   : > { %v6492_v18 = vpop.eup %6491 }
 0xd9b   : > { %v6494_v26 = vpop.eup %6493 }
 0xd9c   : > { %v4896_v24 = vadd.f32 %v6494_v26, %v6492_v18 }
 0xd9e   : > { %4897 = vadd.xlane.f32.xlu1 %v4896_v24 }
 0xe2b   : > { %v4898_v0 = vpop.xlane.xlu1 %4897 }
 0xe2c   : > { %6495 = vrcp.f32 %v4898_v0 }
 0xe36   : > { %v6496_v45 = vpop.eup %6495 }
 0xe37   : > { %v4901_v17 = vmul.f32 %v6496_v45, %v6494_v26  ;;  %v4900_v39 = vmul.f32 %v6496_v45, %v6492_v18 }
 0xe39   : > { %v4903_v11 = vpack.c.bf16 %v4901_v17, %v4901_v17  ;;  %v4902_v59 = vpack.c.bf16 %v4900_v39, %v4900_v39 }
 0xe3b   : > { %4952 = vmatprep.mubr.bf16.mxu0 %v4903_v11 }
 0xe3c   : > { %4953 = vmatmul.mubr.bf16.vlgmr.msra.gmra.mrb[196].mxu0 %v4902_v59 }
 0xe3d   : > { %6009 = vmatpush3.bf16.msra.mxu0 %v6155_v55  ;;  %6024 = vmatprep.mubr.msk.bf16.mxu0 %vm6514_vm1, %v9815_v44 }
 0xe3e   : > { %6010 = vmatprep.subr.bf16.mxu0 %v9815_v44 }
 0xe41   : > { %6011 = vmatpush3.bf16.msra.mxu0 %v6156_v46 }
 0xe42   : > { %6012 = vmatprep.subr.bf16.mxu0 %v9815_v44 }
 0xe45   : > { %6013 = vmatpush3.bf16.msra.mxu0 %v6157_v49 }
 0xe46   : > { %6014 = vmatprep.subr.bf16.mxu0 %v9815_v44 }
 0xe49   : > { %6015 = vmatpush3.bf16.msra.mxu0 %v6158_v22 }
 0xe4a   : > { %6016 = vmatprep.subr.bf16.mxu0 %v9815_v44 }
 0xe4d   : > { %6017 = vmatpush3.bf16.msra.mxu0 %v6159_v15 }
 0xe4e   : > { %6018 = vmatprep.subr.bf16.mxu0 %v9815_v44 }
 0xe51   : > { %6019 = vmatpush3.bf16.msra.mxu0 %v6160_v7 }
 0xe52   : > { %6020 = vmatprep.subr.bf16.mxu0 %v9815_v44 }
 0xe55   : > { %6021 = vmatpush3.bf16.msra.mxu0 %v6161_v21 }
 0xe56   : > { %6022 = vmatprep.subr.bf16.mxu0 %v9815_v44 }
 0xe59   : > { %6023 = vmatpush3.bf16.msra.mxu0 %v6162_v3 }
 0xe5a   : > { %6028 = vmatprep.subr.bf16.mxu0 %v9815_v44 }
 0xf0f   : > { %v5724_v53 = vpop.f32.mrb[196].mxu0 }
 0xf10   : > { %v5725_v63 = vpop.f32.mrb[197].mxu0 }
 0xf11   : > { %v5726_v40 = vadd.f32 %v5725_v63, %v5724_v53  ;;  %v5727_v47 = vpop.f32.mrb[198].mxu0 }
 0xf12   : > { %v5728_v41 = vpop.f32.mrb[199].mxu0 }
 0xf13   : > { %v4960_v60 = vpack.c.bf16 %v5726_v40, %v5726_v40 }
 0xf15   : > { %6025 = vmatmul.mubr.bf16.vlgmr.msra.gmra.mrb[200].mxu0 %v4960_v60 }
 0xf16   : > { %6044 = vmatprep.mubr.msk.bf16.mxu0 %vm6514_vm1, %v9815_v44  ;;  %6029 = vmatpush3.bf16.msra.mxu0 %v6163_v30 }
 0xf17   : > { %6030 = vmatprep.subr.bf16.mxu0 %v9815_v44 }
 0xf1a   : > { %6031 = vmatpush3.bf16.msra.mxu0 %v6164_v16 }
 0xf1b   : > { %6032 = vmatprep.subr.bf16.mxu0 %v9815_v44 }
 0xf1e   : > { %6033 = vmatpush3.bf16.msra.mxu0 %v6165_v28 }
 0xf1f   : > { %6034 = vmatprep.subr.bf16.mxu0 %v9815_v44 }
 0xf22   : > { %6035 = vmatpush3.bf16.msra.mxu0 %v6166_v52 }
 0xf23   : > { %6036 = vmatprep.subr.bf16.mxu0 %v9815_v44 }
 0xfe8   : > { %v5066_v5 = vpop.f32.mrb[200].mxu0 }
 0xfe9   : > { %v5067_v56 = vadd.f32 %v5377_v58, %v5066_v5  ;;  %v6026_v54 = vpop.f32.mrb[201].mxu0 }
 0xfea   : > { %v5069_v9 = vpop.f32.mrb[202].mxu0 }
 0xfeb   : > { %v5072_v35 = vadd.f32 %v6503_v23, %v5067_v56  ;;  %v6027_v42 = vpop.f32.mrb[203].mxu0 }
 0xfed   : > { %5073 = vadd.xlane.f32.xlu0 %v5072_v35 }
0x107a   : > { %v5074_v36 = vpop.xlane.xlu0 %5073 }
0x107b   : > { %v5075_v37 = vmul.f32 0.03125, %v5074_v36 }
0x107d   : > { %v5076_v19 = vsub.f32 %v5072_v35, %v5075_v37 }
0x107f   : > { %v5077_v38 = vmul.f32 %v8066_v31, %v5076_v19  ;;  %v6167_v31 = vld [vmem:[%s9514_s24 + $0x20] sm:$0xff]  }
0x1080   : > { %6037 = vmatpush3.bf16.msra.mxu0 %v6167_v31 }
0x1081   : > { %v5078_v57 = vmul.f32 %v5077_v38, %v5077_v38  ;;  %6038 = vmatprep.subr.bf16.mxu0 %v9815_v44 }
0x1083   : > { %5079 = vadd.xlane.f32.xlu1 %v5078_v57 }
0x1084   : > { %6039 = vmatpush3.bf16.msra.mxu0 %v6168_v33 }
0x1085   : > { %6040 = vmatprep.subr.bf16.mxu0 %v9815_v44 }
0x1088   : > { %6041 = vmatpush3.bf16.msra.mxu0 %v6169_v34 }
0x1089   : > { %6042 = vmatprep.subr.bf16.mxu0 %v9815_v44  ;;  %v5388_v44 = vld [vmem:[%s9515_s25] ss:$0 sm:$0xff] }
0x108c   : > { %6043 = vmatpush3.bf16.msra.mxu0 %v6170_v10 }
0x1110   : > { %v5080_v12 = vpop.xlane.xlu1 %5079 }
0x1111   : > { %v5081_v61 = vmul.f32 0.03125, %v5080_v12 }
0x1113   : > { %v5082_v32 = vadd.f32 1e-05, %v5081_v61 }
0x1115   : > { %6497 = vrsqrt.f32 %v5082_v32 }
0x111f   : > { %v6498_v25 = vpop.eup %6497 }
0x1120   : > { %v5084_v8 = vmul.f32 %v6498_v25, %v5077_v38 }
0x1122   : > { %v5092_v51 = vmul.f32 %v5386_v6, %v5084_v8 }
0x1124   : > { %v5100_v27 = vadd.f32 %v5387_v4, %v5092_v51 }
0x1126   : > { %v5101_v50 = vpack.c.bf16 %v5100_v27, %v5100_v27 }
0x1128   : > { %6045 = vmatmul.mubr.bf16.vlgmr.msra.gmra.mrb[204].mxu0 %v5101_v50 }
0x11fb   : > { %v5207_v20 = vpop.f32.mrb[204].mxu0 }
0x11fc   : > { %v5208_v1 = vadd.f32 %v5388_v44, %v5207_v20  ;;  %v6046_v13 = vpop.f32.mrb[205].mxu0 }
0x11fd   : > { %v5210_v2 = vpop.f32.mrb[206].mxu0 }
0x11fe   : > { %v5397_v48 = vmul.f32 -1.442695, %v5208_v1  ;;  %v6047_v14 = vpop.f32.mrb[207].mxu0 }
0x1200   : > { %6499 = vpow2.f32 %v5397_v48 }
0x120a   : > { %v6500_v29 = vpop.eup %6499 }
0x120b   : > { %v5219_v62 = vadd.f32 1.0, %v6500_v29 }
0x120d   : > { %6501 = vrcp.f32 %v5219_v62 }
0x1217   : > { %v6502_v18 = vpop.eup %6501 }
0x1218   : > { %v5224_v26 = vsel %vm5215_vm4, %v6502_v18, %v5208_v1 }
0x1219   : > { %5225 = vst [vmem:[%s789_s0] sm:$0xff] %v5224_v26 }
0x121a PF: > { %s36_s27 = sadd.s32 1, %s6510_s27  }
0x121b   : > { %p33_p4 = scmp.ge.s32.totalorder %s36_s27, 4  }
0x121d   :  { %35 = sbr.rel (!%p33_p4) target bundleno = 12 (0xc), region = 154 }

</bundles_post_ra>
